<compile_context>
chip_gen: v5e
topology: v5e:2x2
jax: 0.10.0
libtpu: 0.0.40
codegen_flags: <defaults>
</compile_context>

<pallas_src>
import jax
import jax.numpy as jnp
from jax.experimental import pallas as pl
from jax.experimental.pallas import tpu as pltpu

# TODO(synk): full 12-layer BertModel('bert-base-cased') encoder is a pretrained
# checkpoint and is not re-implemented; only the pooler head of the backbone is
# computed in-kernel from the supplied last hidden states.


def _head_kernel(cls_ref, small_ref,
                 wp_ref, bp_ref,          # BERT pooler: 768 -> 768, tanh (bf16 W)
                 wt_ref, bt_ref,          # forward_text: 768 -> 512 (bf16 W)
                 wsm_ref, bsm_ref,        # fused forward_line_nos + total_ln: 48 -> 128 (f32)
                 wf_ref, bf_ref,          # forward_final: 640 -> 128 (bf16 W, row-split)
                 wc_ref, bc_ref,          # classification: 128 -> padded classes (bf16 W)
                 out_ref):
    f32 = jnp.float32
    bf16 = jnp.bfloat16

    # [CLS] rows arrive as f32 straight from HBM; cast to bf16 in-kernel
    # (VPU cast is hidden under the MXU-bound critical path).
    cls_bf = cls_ref[...].astype(bf16)

    # BERT pooler over the [CLS] token: bf16 MXU inputs, f32 accumulation,
    # bias add / tanh kept in f32.
    pooled = jnp.tanh(
        jnp.dot(cls_bf, wp_ref[...], preferred_element_type=f32) + bp_ref[...])

    # layer1 = relu(forward_text(pooler_output))                       [tb, 512]
    layer1 = jnp.maximum(
        jnp.dot(pooled.astype(bf16), wt_ref[...], preferred_element_type=f32)
        + bt_ref[...], 0.0)

    # layer2 || layer3 = relu(block-diag(W_line_nos, W_total_ln) @ padded input)
    # Fully f32 (tiny matmul, <1% of FLOPs) so integer-like features stay exact.
    layer23 = jnp.maximum(
        jnp.dot(small_ref[...], wsm_ref[...], preferred_element_type=f32)
        + bsm_ref[...], 0.0)                                           # [tb, 128]

    # x = cat([layer1, layer2, layer3], dim=1); dropout (eval) is identity.
    # concat @ Wf  ==  layer1 @ Wf[0:512] + layer23 @ Wf[512:640]  (static,
    # tile-aligned ref views -> no lane concat, no extra copies).
    h = (jnp.dot(layer1.astype(bf16), wf_ref[0:512, :], preferred_element_type=f32)
         + jnp.dot(layer23.astype(bf16), wf_ref[512:640, :], preferred_element_type=f32)
         + bf_ref[...])
    h = jnp.maximum(h, 0.0)          # relu(forward_final(x)); dropout -> identity

    out_ref[...] = (jnp.dot(h.astype(bf16), wc_ref[...], preferred_element_type=f32)
                    + bc_ref[...]).astype(out_ref.dtype)               # bf16 store


def _round_up(x, m):
    return (x + m - 1) // m * m


def custom_bert_head(hidden_states, line_nos, total_lns, params):
    """hidden_states: [B, S, 768] last hidden states of the (frozen) backbone."""
    f32, bf16 = jnp.float32, jnp.bfloat16

    B, S, H = hidden_states.shape
    classes = params["bc"].shape[-1]

    # Flat row-major view [B, S*768]: the first 768 lanes of each row are the
    # [CLS] token, so the kernel DMAs exactly those columns (no wrapper-side
    # slice/cast pass, no extra HBM round trip).
    hs_flat = hidden_states.reshape(B, S * H)

    # ---- weight prep (bf16 streaming weights, f32 biases) -------------------
    wp = params["wp"].astype(bf16)
    bp = params["bp"].astype(f32)
    wt = params["wt"].astype(bf16)
    bt = params["bt"].astype(f32)

    # Fuse the two tiny branches into one lane-dense block-diagonal [48,128]
    # weight, kept in f32 (numerically exact, negligible FLOPs).
    w_small = jnp.zeros((48, 128), f32)
    w_small = w_small.at[0:20, 0:64].set(params["wl"])
    w_small = w_small.at[24:48, 64:128].set(params["wtl"])
    b_small = jnp.concatenate([params["bl"], params["btl"]], axis=-1).astype(f32)

    wf = params["wf"].astype(bf16)                 # [640, 128], row-split in kernel
    bf = params["bf"].astype(f32)

    # Lane-dense classification head: pad output columns to a multiple of 128.
    n_pad = max(128, _round_up(classes, 128))
    wc = jnp.zeros((128, n_pad), f32).at[:, :classes].set(params["wc"]).astype(bf16)
    bc = jnp.zeros((1, n_pad), f32).at[:, :classes].set(params["bc"])

    # ---- activation prep (tiny branch input stays f32) ----------------------
    small_in = jnp.zeros((B, 48), f32)
    small_in = small_in.at[:, 0:20].set(line_nos).at[:, 24:48].set(total_lns)

    # ---- grid / tile selection ----------------------------------------------
    # Tile cap 512: per-step MXU work well above the ~0.35 us fixed step
    # overhead; double-buffered activations + f32 temporaries stay ~<16 MiB.
    # For B > 8, force >= 2 grid steps so both v7x TensorCores get work.
    cap = 512
    if B > 8:
        tile_b = min(cap, _round_up(-(-B // 2), 8))
    else:
        tile_b = _round_up(B, 8)
    grid = (pl.cdiv(B, tile_b),)

    def batch_map(i):
        return (i, 0)

    def const_map(i):
        return (0, 0)

    in_specs = [
        pl.BlockSpec((tile_b, 768), batch_map),      # [CLS] rows of hs_flat (f32)
        pl.BlockSpec((tile_b, 48), batch_map),       # fused line_nos/total_lns (f32)
        pl.BlockSpec((768, 768), const_map),         # wp (VMEM-resident across grid)
        pl.BlockSpec((1, 768), const_map),           # bp
        pl.BlockSpec((768, 512), const_map),         # wt
        pl.BlockSpec((1, 512), const_map),           # bt
        pl.BlockSpec((48, 128), const_map),          # w_small (f32)
        pl.BlockSpec((1, 128), const_map),           # b_small
        pl.BlockSpec((640, 128), const_map),         # wf
        pl.BlockSpec((1, 128), const_map),           # bf
        pl.BlockSpec((128, n_pad), const_map),       # wc (padded)
        pl.BlockSpec((1, n_pad), const_map),         # bc (padded)
    ]
    out_specs = pl.BlockSpec((tile_b, n_pad), batch_map)

    matmul_flops = 2 * B * (768 * 768 + 768 * 512 + 48 * 128 + 640 * 128 + 128 * n_pad)
    weight_bytes = (2 * (768 * 768 + 768 * 512 + 640 * 128 + 128 * n_pad)
                    + 4 * 48 * 128
                    + 4 * (768 + 512 + 128 + 128 + n_pad))
    act_bytes = B * (768 * 4 + 48 * 4 + n_pad * 2)
    cost = pl.CostEstimate(flops=matmul_flops,
                           transcendentals=B * 768,
                           bytes_accessed=weight_bytes + act_bytes)

    out = pl.pallas_call(
        _head_kernel,
        out_shape=jax.ShapeDtypeStruct((B, n_pad), jnp.bfloat16),
        grid=grid,
        in_specs=in_specs,
        out_specs=out_specs,
        compiler_params=pltpu.CompilerParams(
            dimension_semantics=("parallel",),
            vmem_limit_bytes=40 * 1024 * 1024),      # v5e default scoped is 16 MiB
        cost_estimate=cost,
    )(hs_flat, small_in, wp, bp, wt, bt, w_small, b_small, wf, bf, wc, bc)

    return out[:, :classes].astype(jnp.float32)


def _linear_init(key, fan_in, fan_out):
    """PyTorch nn.Linear default init: U(-1/sqrt(fan_in), 1/sqrt(fan_in))."""
    kw, kb = jax.random.split(key)
    bound = 1.0 / jnp.sqrt(jnp.asarray(fan_in, jnp.float32))
    w = jax.random.uniform(kw, (fan_in, fan_out), jnp.float32, -bound, bound)
    b = jax.random.uniform(kb, (1, fan_out), jnp.float32, -bound, bound)
    return w, b


def make_params(key, classes):
    keys = jax.random.split(key, 6)
    wp, bp = _linear_init(keys[0], 768, 768)      # BERT pooler dense
    wt, bt = _linear_init(keys[1], 768, 512)      # forward_text
    wl, bl = _linear_init(keys[2], 20, 64)        # forward_line_nos
    wtl, btl = _linear_init(keys[3], 24, 64)      # total_ln
    wf, bf = _linear_init(keys[4], 640, 128)      # forward_final (512 + 64 + 64)
    wc, bc = _linear_init(keys[5], 128, classes)  # classification
    return dict(wp=wp, bp=bp, wt=wt, bt=bt, wl=wl, bl=bl,
                wtl=wtl, btl=btl, wf=wf, bf=bf, wc=wc, bc=bc)


def _reference(hidden_states, line_nos, total_lns, p):
    """Original (concat-based) module graph; big matmuls use the same bf16
    input / f32 accumulate numerics as the kernel, tiny branches stay f32."""
    f32, bf16 = jnp.float32, jnp.bfloat16
    hi = jax.lax.Precision.HIGHEST
    cls_tok = hidden_states[:, 0, :].astype(bf16)
    pooled = jnp.tanh(jnp.dot(cls_tok, p["wp"].astype(bf16),
                              preferred_element_type=f32) + p["bp"])
    l1 = jax.nn.relu(jnp.dot(pooled.astype(bf16), p["wt"].astype(bf16),
                             preferred_element_type=f32) + p["bt"])
    l2 = jax.nn.relu(jnp.dot(line_nos, p["wl"], precision=hi) + p["bl"])
    l3 = jax.nn.relu(jnp.dot(total_lns, p["wtl"], precision=hi) + p["btl"])
    x = jnp.concatenate([l1, l2, l3], axis=1)
    x = jax.nn.relu(jnp.dot(x.astype(bf16), p["wf"].astype(bf16),
                            preferred_element_type=f32) + p["bf"])
    return jnp.dot(x.astype(bf16), p["wc"].astype(bf16),
                   preferred_element_type=f32) + p["bc"]


if __name__ == "__main__":
    key = jax.random.PRNGKey(0)
    k_h, k_ln, k_tl, k_p = jax.random.split(key, 4)

    B, S, CLASSES = 8, 8, 8
    hidden_states = jax.random.normal(k_h, (B, S, 768), jnp.float32)   # backbone output
    line_nos = jax.random.normal(k_ln, (B, 20), jnp.float32)
    total_lns = jax.random.normal(k_tl, (B, 24), jnp.float32)
    params = make_params(k_p, CLASSES)

    head = jax.jit(custom_bert_head)
    out = head(hidden_states, line_nos, total_lns, params)
    out = jax.block_until_ready(out)

    ref = _reference(hidden_states, line_nos, total_lns, params)
    assert out.shape == (B, CLASSES)
    # Kernel emits bf16 logits (rounded) and splits the concat matmul; tolerance
    # covers bf16 output rounding + accumulation-order differences.
    assert jnp.allclose(out, ref, atol=3e-2, rtol=3e-2), "kernel mismatch vs JAX reference"
    print("KERNEL_OK")
</pallas_src>

<mosaic_0001>
module attributes {stable_mosaic.version = 11 : i64} {
  func.func @_head_kernel(%arg0: i32, %arg1: memref<8x768xf32, #tpu.memory_space<vmem>>, %arg2: memref<8x48xf32, #tpu.memory_space<vmem>>, %arg3: memref<768x768xbf16, #tpu.memory_space<vmem>>, %arg4: memref<1x768xf32, #tpu.memory_space<vmem>>, %arg5: memref<768x512xbf16, #tpu.memory_space<vmem>>, %arg6: memref<1x512xf32, #tpu.memory_space<vmem>>, %arg7: memref<48x128xf32, #tpu.memory_space<vmem>>, %arg8: memref<1x128xf32, #tpu.memory_space<vmem>>, %arg9: memref<640x128xbf16, #tpu.memory_space<vmem>>, %arg10: memref<1x128xf32, #tpu.memory_space<vmem>>, %arg11: memref<128x128xbf16, #tpu.memory_space<vmem>>, %arg12: memref<1x128xf32, #tpu.memory_space<vmem>>, %arg13: memref<8x128xbf16, #tpu.memory_space<vmem>>) attributes {dimension_semantics = [#tpu.dimension_semantics<parallel>], iteration_bounds = array<i64: 1>, scalar_prefetch = 0 : i64, scratch_operands = 0 : i64, tpu.core_type = #tpu.core_type<tc>, window_params = [{transform_indices = @transform_0, window_bounds = array<i64: 8, 768>}, {transform_indices = @transform_1, window_bounds = array<i64: 8, 48>}, {pipeline_mode = #tpu.pipeline_mode<synchronous>, transform_indices = @transform_2, window_bounds = array<i64: 768, 768>}, {pipeline_mode = #tpu.pipeline_mode<synchronous>, transform_indices = @transform_3, window_bounds = array<i64: 1, 768>}, {pipeline_mode = #tpu.pipeline_mode<synchronous>, transform_indices = @transform_4, window_bounds = array<i64: 768, 512>}, {pipeline_mode = #tpu.pipeline_mode<synchronous>, transform_indices = @transform_5, window_bounds = array<i64: 1, 512>}, {pipeline_mode = #tpu.pipeline_mode<synchronous>, transform_indices = @transform_6, window_bounds = array<i64: 48, 128>}, {pipeline_mode = #tpu.pipeline_mode<synchronous>, transform_indices = @transform_7, window_bounds = array<i64: 1, 128>}, {pipeline_mode = #tpu.pipeline_mode<synchronous>, transform_indices = @transform_8, window_bounds = array<i64: 640, 128>}, {pipeline_mode = #tpu.pipeline_mode<synchronous>, transform_indices = @transform_9, window_bounds = array<i64: 1, 128>}, {pipeline_mode = #tpu.pipeline_mode<synchronous>, transform_indices = @transform_10, window_bounds = array<i64: 128, 128>}, {pipeline_mode = #tpu.pipeline_mode<synchronous>, transform_indices = @transform_11, window_bounds = array<i64: 1, 128>}, {transform_indices = @transform_12, window_bounds = array<i64: 8, 128>}]} {
    %c0 = arith.constant 0 : index
    %c0_0 = arith.constant 0 : index
    %0 = vector.load %arg1[%c0, %c0_0] : memref<8x768xf32, #tpu.memory_space<vmem>>, vector<8x768xf32>
    %1 = arith.truncf %0 : vector<8x768xf32> to vector<8x768xbf16>
    %c0_1 = arith.constant 0 : index
    %c0_2 = arith.constant 0 : index
    %2 = vector.load %arg3[%c0_1, %c0_2] : memref<768x768xbf16, #tpu.memory_space<vmem>>, vector<768x768xbf16>
    %cst = arith.constant dense<0.000000e+00> : vector<8x768xf32>
    %3 = tpu.matmul %1, %2, %cst {dimension_numbers = #tpu.dot_dimension_numbers<[1], [0], [0], [1], [0, 0, 1, 1], [], []>} : vector<8x768xbf16>, vector<768x768xbf16>, vector<8x768xf32> -> vector<8x768xf32>
    %c0_3 = arith.constant 0 : index
    %c0_4 = arith.constant 0 : index
    %4 = vector.load %arg4[%c0_3, %c0_4] : memref<1x768xf32, #tpu.memory_space<vmem>>, vector<1x768xf32>
    %5 = vector.broadcast %4 : vector<1x768xf32> to vector<8x768xf32>
    %6 = arith.addf %3, %5 : vector<8x768xf32>
    %7 = math.tanh %6 : vector<8x768xf32>
    %8 = arith.truncf %7 : vector<8x768xf32> to vector<8x768xbf16>
    %c0_5 = arith.constant 0 : index
    %c0_6 = arith.constant 0 : index
    %9 = vector.load %arg5[%c0_5, %c0_6] : memref<768x512xbf16, #tpu.memory_space<vmem>>, vector<768x512xbf16>
    %cst_7 = arith.constant dense<0.000000e+00> : vector<8x512xf32>
    %10 = tpu.matmul %8, %9, %cst_7 {dimension_numbers = #tpu.dot_dimension_numbers<[1], [0], [0], [1], [0, 0, 1, 1], [], []>} : vector<8x768xbf16>, vector<768x512xbf16>, vector<8x512xf32> -> vector<8x512xf32>
    %c0_8 = arith.constant 0 : index
    %c0_9 = arith.constant 0 : index
    %11 = vector.load %arg6[%c0_8, %c0_9] : memref<1x512xf32, #tpu.memory_space<vmem>>, vector<1x512xf32>
    %12 = vector.broadcast %11 : vector<1x512xf32> to vector<8x512xf32>
    %13 = arith.addf %10, %12 : vector<8x512xf32>
    %cst_10 = arith.constant 0.000000e+00 : f32
    %14 = vector.broadcast %cst_10 : f32 to vector<8x512xf32>
    %15 = arith.maximumf %13, %14 : vector<8x512xf32>
    %c0_11 = arith.constant 0 : index
    %c0_12 = arith.constant 0 : index
    %16 = vector.load %arg2[%c0_11, %c0_12] : memref<8x48xf32, #tpu.memory_space<vmem>>, vector<8x48xf32>
    %c0_13 = arith.constant 0 : index
    %c0_14 = arith.constant 0 : index
    %17 = vector.load %arg7[%c0_13, %c0_14] : memref<48x128xf32, #tpu.memory_space<vmem>>, vector<48x128xf32>
    %cst_15 = arith.constant dense<0.000000e+00> : vector<8x128xf32>
    %18 = tpu.matmul %16, %17, %cst_15 {dimension_numbers = #tpu.dot_dimension_numbers<[1], [0], [0], [1], [0, 0, 1, 1], [], []>} : vector<8x48xf32>, vector<48x128xf32>, vector<8x128xf32> -> vector<8x128xf32>
    %c0_16 = arith.constant 0 : index
    %c0_17 = arith.constant 0 : index
    %19 = vector.load %arg8[%c0_16, %c0_17] : memref<1x128xf32, #tpu.memory_space<vmem>>, vector<1x128xf32>
    %20 = vector.broadcast %19 : vector<1x128xf32> to vector<8x128xf32>
    %21 = arith.addf %18, %20 : vector<8x128xf32>
    %cst_18 = arith.constant 0.000000e+00 : f32
    %22 = vector.broadcast %cst_18 : f32 to vector<8x128xf32>
    %23 = arith.maximumf %21, %22 : vector<8x128xf32>
    %24 = arith.truncf %15 : vector<8x512xf32> to vector<8x512xbf16>
    %c0_19 = arith.constant 0 : index
    %c0_20 = arith.constant 0 : index
    %25 = vector.load %arg9[%c0_19, %c0_20] : memref<640x128xbf16, #tpu.memory_space<vmem>>, vector<512x128xbf16>
    %cst_21 = arith.constant dense<0.000000e+00> : vector<8x128xf32>
    %26 = tpu.matmul %24, %25, %cst_21 {dimension_numbers = #tpu.dot_dimension_numbers<[1], [0], [0], [1], [0, 0, 1, 1], [], []>} : vector<8x512xbf16>, vector<512x128xbf16>, vector<8x128xf32> -> vector<8x128xf32>
    %27 = arith.truncf %23 : vector<8x128xf32> to vector<8x128xbf16>
    %c512 = arith.constant 512 : index
    %c0_22 = arith.constant 0 : index
    %28 = vector.load %arg9[%c512, %c0_22] : memref<640x128xbf16, #tpu.memory_space<vmem>>, vector<128x128xbf16>
    %cst_23 = arith.constant dense<0.000000e+00> : vector<8x128xf32>
    %29 = tpu.matmul %27, %28, %cst_23 {dimension_numbers = #tpu.dot_dimension_numbers<[1], [0], [0], [1], [0, 0, 1, 1], [], []>} : vector<8x128xbf16>, vector<128x128xbf16>, vector<8x128xf32> -> vector<8x128xf32>
    %30 = arith.addf %26, %29 : vector<8x128xf32>
    %c0_24 = arith.constant 0 : index
    %c0_25 = arith.constant 0 : index
    %31 = vector.load %arg10[%c0_24, %c0_25] : memref<1x128xf32, #tpu.memory_space<vmem>>, vector<1x128xf32>
    %32 = vector.broadcast %31 : vector<1x128xf32> to vector<8x128xf32>
    %33 = arith.addf %30, %32 : vector<8x128xf32>
    %cst_26 = arith.constant 0.000000e+00 : f32
    %34 = vector.broadcast %cst_26 : f32 to vector<8x128xf32>
    %35 = arith.maximumf %33, %34 : vector<8x128xf32>
    %36 = arith.truncf %35 : vector<8x128xf32> to vector<8x128xbf16>
    %c0_27 = arith.constant 0 : index
    %c0_28 = arith.constant 0 : index
    %37 = vector.load %arg11[%c0_27, %c0_28] : memref<128x128xbf16, #tpu.memory_space<vmem>>, vector<128x128xbf16>
    %cst_29 = arith.constant dense<0.000000e+00> : vector<8x128xf32>
    %38 = tpu.matmul %36, %37, %cst_29 {dimension_numbers = #tpu.dot_dimension_numbers<[1], [0], [0], [1], [0, 0, 1, 1], [], []>} : vector<8x128xbf16>, vector<128x128xbf16>, vector<8x128xf32> -> vector<8x128xf32>
    %c0_30 = arith.constant 0 : index
    %c0_31 = arith.constant 0 : index
    %39 = vector.load %arg12[%c0_30, %c0_31] : memref<1x128xf32, #tpu.memory_space<vmem>>, vector<1x128xf32>
    %40 = vector.broadcast %39 : vector<1x128xf32> to vector<8x128xf32>
    %41 = arith.addf %38, %40 : vector<8x128xf32>
    %42 = arith.truncf %41 : vector<8x128xf32> to vector<8x128xbf16>
    %c0_32 = arith.constant 0 : index
    %c0_33 = arith.constant 0 : index
    %43 = vector.load %arg13[%c0_32, %c0_33] : memref<8x128xbf16, #tpu.memory_space<vmem>>, vector<8x128xbf16>
    tpu.vector_store %arg13[%c0_32, %c0_33], %42 {strides = array<i32>} : memref<8x128xbf16, #tpu.memory_space<vmem>>, vector<8x128xbf16>,
    return
  }
  func.func @transform_0(%arg0: i32) -> (i32, i32) {
    %c0_i32 = arith.constant 0 : i32
    %c0_i32_0 = arith.constant 0 : i32
    return %arg0, %c0_i32 : i32, i32
  }
  func.func @transform_1(%arg0: i32) -> (i32, i32) {
    %c0_i32 = arith.constant 0 : i32
    %c0_i32_0 = arith.constant 0 : i32
    return %arg0, %c0_i32 : i32, i32
  }
  func.func @transform_2(%arg0: i32) -> (i32, i32) {
    %c0_i32 = arith.constant 0 : i32
    %c0_i32_0 = arith.constant 0 : i32
    %c0_i32_1 = arith.constant 0 : i32
    return %c0_i32, %c0_i32_0 : i32, i32
  }
  func.func @transform_3(%arg0: i32) -> (i32, i32) {
    %c0_i32 = arith.constant 0 : i32
    %c0_i32_0 = arith.constant 0 : i32
    %c0_i32_1 = arith.constant 0 : i32
    return %c0_i32, %c0_i32_0 : i32, i32
  }
  func.func @transform_4(%arg0: i32) -> (i32, i32) {
    %c0_i32 = arith.constant 0 : i32
    %c0_i32_0 = arith.constant 0 : i32
    %c0_i32_1 = arith.constant 0 : i32
    return %c0_i32, %c0_i32_0 : i32, i32
  }
  func.func @transform_5(%arg0: i32) -> (i32, i32) {
    %c0_i32 = arith.constant 0 : i32
    %c0_i32_0 = arith.constant 0 : i32
    %c0_i32_1 = arith.constant 0 : i32
    return %c0_i32, %c0_i32_0 : i32, i32
  }
  func.func @transform_6(%arg0: i32) -> (i32, i32) {
    %c0_i32 = arith.constant 0 : i32
    %c0_i32_0 = arith.constant 0 : i32
    %c0_i32_1 = arith.constant 0 : i32
    return %c0_i32, %c0_i32_0 : i32, i32
  }
  func.func @transform_7(%arg0: i32) -> (i32, i32) {
    %c0_i32 = arith.constant 0 : i32
    %c0_i32_0 = arith.constant 0 : i32
    %c0_i32_1 = arith.constant 0 : i32
    return %c0_i32, %c0_i32_0 : i32, i32
  }
  func.func @transform_8(%arg0: i32) -> (i32, i32) {
    %c0_i32 = arith.constant 0 : i32
    %c0_i32_0 = arith.constant 0 : i32
    %c0_i32_1 = arith.constant 0 : i32
    return %c0_i32, %c0_i32_0 : i32, i32
  }
  func.func @transform_9(%arg0: i32) -> (i32, i32) {
    %c0_i32 = arith.constant 0 : i32
    %c0_i32_0 = arith.constant 0 : i32
    %c0_i32_1 = arith.constant 0 : i32
    return %c0_i32, %c0_i32_0 : i32, i32
  }
  func.func @transform_10(%arg0: i32) -> (i32, i32) {
    %c0_i32 = arith.constant 0 : i32
    %c0_i32_0 = arith.constant 0 : i32
    %c0_i32_1 = arith.constant 0 : i32
    return %c0_i32, %c0_i32_0 : i32, i32
  }
  func.func @transform_11(%arg0: i32) -> (i32, i32) {
    %c0_i32 = arith.constant 0 : i32
    %c0_i32_0 = arith.constant 0 : i32
    %c0_i32_1 = arith.constant 0 : i32
    return %c0_i32, %c0_i32_0 : i32, i32
  }
  func.func @transform_12(%arg0: i32) -> (i32, i32) {
    %c0_i32 = arith.constant 0 : i32
    %c0_i32_0 = arith.constant 0 : i32
    return %arg0, %c0_i32 : i32, i32
  }
}

</mosaic_0001>

<bundles_post_ra>
// kernel: custom_bert_head.1
= control target key start
LH: loop header
LB: loop body
LE: loop exit
PB: predicated region body
PF: predicated region fallthrough
CT: control target
= control target key end

     0   :  { %vm3764_vm0 = vcmask 392192   ;;  %s10245_s2 = inlined_call_operand.vmem [shape: bf16[768,768], index: 2, kind: input, shape index: {}]   ;;  %s10246_s0 = inlined_call_operand.vmem [shape: f32[8,6144], index: 0, kind: input, shape index: {}]   ;;  %s10247_s3 = inlined_call_operand.vmem [shape: f32[1,768], index: 3, kind: input, shape index: {}]   ;;  %s10248_s4 = inlined_call_operand.vmem [shape: bf16[768,512], index: 4, kind: input, shape index: {}]   ;;  %s10249_s5 = inlined_call_operand.vmem [shape: f32[1,512], index: 5, kind: input, shape index: {}]   ;;  %s10250_s6 = inlined_call_operand.vmem [shape: f32[48,128], index: 6, kind: input, shape index: {}]   ;;  %s10251_s8 = inlined_call_operand.vmem [shape: bf16[640,128], index: 8, kind: input, shape index: {}]   ;;  %s10252_s1 = inlined_call_operand.vmem [shape: f32[8,48], index: 1, kind: input, shape index: {}]   ;;  %s10253_s7 = inlined_call_operand.vmem [shape: f32[1,128], index: 7, kind: input, shape index: {}]   ;;  %s10254_s9 = inlined_call_operand.vmem [shape: f32[1,128], index: 9, kind: input, shape index: {}]   ;;  %s10255_s11 = inlined_call_operand.vmem [shape: f32[1,128], index: 11, kind: input, shape index: {}]   ;;  %s10256_s10 = inlined_call_operand.vmem [shape: bf16[128,128], index: 10, kind: input, shape index: {}]   ;;  %s10257_s12 = inlined_call_operand.vmem [shape: bf16[8,128], index: 12, kind: output, shape index: {}]  }
   0x1   :  { %v4443_v0 = vld [vmem:[%s10245_s2 + $0x150] sm:$0xf]  ;;  %v6431_v1 = vld [vmem:[%s10245_s2 + $0x164] sm:$0xf0]  ;;  %v4419_v11 = vld [vmem:[%s10245_s2 + $0x120] sm:$0xf] }
   0x2   :  { %v4635_v2 = vld [vmem:[%s10245_s2 + $0x2d0] sm:$0xf]  ;;  %v4444_v3 = vor.u32 %v6431_v1, %v4443_v0  ;;  %v6479_v4 = vld [vmem:[%s10245_s2 + $0x2e4] sm:$0xf0]  ;;  %v6425_v13 = vld [vmem:[%s10245_s2 + $0x134] sm:$0xf0] }
   0x3   :  { %v4827_v5 = vld [vmem:[%s10245_s2 + $0x450] sm:$0xf]  ;;  %v6527_v6 = vld [vmem:[%s10245_s2 + $0x464] sm:$0xf0]  ;;  %v4636_v7 = vor.u32 %v6479_v4, %v4635_v2  ;;  %v4611_v14 = vld [vmem:[%s10245_s2 + $0x2a0] sm:$0xf]  ;;  %v4420_v16 = vor.u32 %v6425_v13, %v4419_v11 }
   0x4   :  { %v4828_v8 = vor.u32 %v6527_v6, %v4827_v5  ;;  %v5019_v9 = vld [vmem:[%s10245_s2 + $0x5d0] sm:$0xf]  ;;  %v6575_v10 = vld [vmem:[%s10245_s2 + $0x5e4] sm:$0xf0]  ;;  %1795 = vmatpush.bf16.msra.mxu0 %v4444_v3  ;;  %v6473_v15 = vld [vmem:[%s10245_s2 + $0x2b4] sm:$0xf0] }
   0x5   :  { %v5020_v12 = vor.u32 %v6575_v10, %v5019_v9  ;;  %1808 = vmatpush.bf16.msra.mxu1 %v4636_v7  ;;  %v4612_v17 = vor.u32 %v6473_v15, %v4611_v14  ;;  %v4803_v18 = vld [vmem:[%s10245_s2 + $0x420] sm:$0xf]  ;;  %v6521_v19 = vld [vmem:[%s10245_s2 + $0x434] sm:$0xf0]  ;;  %v4395_v23 = vld [vmem:[%s10245_s2 + $0xf0] sm:$0xf] }
   0x6   :  { %1821 = vmatpush.bf16.msra.mxu2 %v4828_v8  ;;  %v4995_v20 = vld [vmem:[%s10245_s2 + $0x5a0] sm:$0xf]  ;;  %v4804_v21 = vor.u32 %v6521_v19, %v4803_v18  ;;  %v6569_v22 = vld [vmem:[%s10245_s2 + $0x5b4] sm:$0xf0]  ;;  %v6419_v24 = vld [vmem:[%s10245_s2 + $0x104] sm:$0xf0] }
   0x7   :  { %1834 = vmatpush.bf16.msra.mxu3 %v5020_v12  ;;  %v4996_v25 = vor.u32 %v6569_v22, %v4995_v20  ;;  %v4587_v26 = vld [vmem:[%s10245_s2 + $0x270] sm:$0xf]  ;;  %v6467_v27 = vld [vmem:[%s10245_s2 + $0x284] sm:$0xf0]  ;;  %v4396_v29 = vor.u32 %v6419_v24, %v4395_v23  ;;  %v4371_v35 = vld [vmem:[%s10245_s2 + $0xc0] sm:$0xf] }
   0x8   :  { %v4779_v28 = vld [vmem:[%s10245_s2 + $0x3f0] sm:$0xf]  ;;  %1796 = vmatpush.bf16.msra.mxu0 %v4420_v16  ;;  %v6515_v30 = vld [vmem:[%s10245_s2 + $0x404] sm:$0xf0]  ;;  %v4588_v33 = vor.u32 %v6467_v27, %v4587_v26  ;;  %v6413_v36 = vld [vmem:[%s10245_s2 + $0xd4] sm:$0xf0] }
   0x9   :  { %v4971_v31 = vld [vmem:[%s10245_s2 + $0x570] sm:$0xf]  ;;  %v6563_v32 = vld [vmem:[%s10245_s2 + $0x584] sm:$0xf0]  ;;  %1809 = vmatpush.bf16.msra.mxu1 %v4612_v17  ;;  %v4780_v34 = vor.u32 %v6515_v30, %v4779_v28  ;;  %v4563_v37 = vld [vmem:[%s10245_s2 + $0x240] sm:$0xf]  ;;  %v4372_v44 = vor.u32 %v6413_v36, %v4371_v35 }
   0xa   :  { %1822 = vmatpush.bf16.msra.mxu2 %v4804_v21  ;;  %v4972_v38 = vor.u32 %v6563_v32, %v4971_v31  ;;  %v6461_v39 = vld [vmem:[%s10245_s2 + $0x254] sm:$0xf0]  ;;  %v4755_v40 = vld [vmem:[%s10245_s2 + $0x3c0] sm:$0xf]  ;;  %v4347_v47 = vld [vmem:[%s10245_s2 + $0x90] sm:$0xf] }
   0xb   :  { %1835 = vmatpush.bf16.msra.mxu3 %v4996_v25  ;;  %v6509_v41 = vld [vmem:[%s10245_s2 + $0x3d4] sm:$0xf0]  ;;  %v4947_v42 = vld [vmem:[%s10245_s2 + $0x540] sm:$0xf]  ;;  %v4564_v45 = vor.u32 %v6461_v39, %v4563_v37  ;;  %v6407_v48 = vld [vmem:[%s10245_s2 + $0xa4] sm:$0xf0] }
   0xc   :  { %v6557_v43 = vld [vmem:[%s10245_s2 + $0x554] sm:$0xf0]  ;;  %1797 = vmatpush.bf16.msra.mxu0 %v4396_v29  ;;  %v4756_v46 = vor.u32 %v6509_v41, %v4755_v40  ;;  %v4539_v49 = vld [vmem:[%s10245_s2 + $0x210] sm:$0xf]  ;;  %v6455_v51 = vld [vmem:[%s10245_s2 + $0x224] sm:$0xf0]  ;;  %v4348_v56 = vor.u32 %v6407_v48, %v4347_v47 }
   0xd   :  { %1810 = vmatpush.bf16.msra.mxu1 %v4588_v33  ;;  %v4948_v50 = vor.u32 %v6557_v43, %v4947_v42  ;;  %v4731_v52 = vld [vmem:[%s10245_s2 + $0x390] sm:$0xf]  ;;  %v6503_v53 = vld [vmem:[%s10245_s2 + $0x3a4] sm:$0xf0]  ;;  %v4540_v57 = vor.u32 %v6455_v51, %v4539_v49  ;;  %v4323_v59 = vld [vmem:[%s10245_s2 + $0x60] sm:$0xf] }
   0xe   :  { %1823 = vmatpush.bf16.msra.mxu2 %v4780_v34  ;;  %v4923_v54 = vld [vmem:[%s10245_s2 + $0x510] sm:$0xf]  ;;  %v6551_v55 = vld [vmem:[%s10245_s2 + $0x524] sm:$0xf0]  ;;  %v4732_v58 = vor.u32 %v6503_v53, %v4731_v52  ;;  %v6401_v60 = vld [vmem:[%s10245_s2 + $0x74] sm:$0xf0] }
   0xf   :  { %1836 = vmatpush.bf16.msra.mxu3 %v4972_v38  ;;  %v4515_v61 = vld [vmem:[%s10245_s2 + $0x1e0] sm:$0xf]  ;;  %v4924_v62 = vor.u32 %v6551_v55, %v4923_v54  ;;  %v6449_v63 = vld [vmem:[%s10245_s2 + $0x1f4] sm:$0xf0]  ;;  %v4324_v4 = vor.u32 %v6401_v60, %v4323_v59  ;;  %v4299_v7 = vld [vmem:[%s10245_s2 + $0x30] sm:$0xf] }
  0x10   :  { %1798 = vmatpush.bf16.msra.mxu0 %v4372_v44  ;;  %v4707_v0 = vld [vmem:[%s10245_s2 + $0x360] sm:$0xf]  ;;  %v6497_v1 = vld [vmem:[%s10245_s2 + $0x374] sm:$0xf0]  ;;  %v4516_v5 = vor.u32 %v6449_v63, %v4515_v61  ;;  %v6395_v8 = vld [vmem:[%s10245_s2 + $0x44] sm:$0xf0] }
  0x11   :  { %1811 = vmatpush.bf16.msra.mxu1 %v4564_v45  ;;  %v4899_v2 = vld [vmem:[%s10245_s2 + $0x4e0] sm:$0xf]  ;;  %v6545_v3 = vld [vmem:[%s10245_s2 + $0x4f4] sm:$0xf0]  ;;  %v4708_v6 = vor.u32 %v6497_v1, %v4707_v0  ;;  %v4491_v9 = vld [vmem:[%s10245_s2 + $0x1b0] sm:$0xf]  ;;  %v4300_v16 = vor.u32 %v6395_v8, %v4299_v7 }
  0x12   :  { %1824 = vmatpush.bf16.msra.mxu2 %v4756_v46  ;;  %v4900_v10 = vor.u32 %v6545_v3, %v4899_v2  ;;  %v6443_v11 = vld [vmem:[%s10245_s2 + $0x1c4] sm:$0xf0]  ;;  %v4683_v12 = vld [vmem:[%s10245_s2 + $0x330] sm:$0xf]  ;;  %v4275_v17 = vld [vmem:[%s10245_s2] sm:$0xf] }
  0x13   :  { %1837 = vmatpush.bf16.msra.mxu3 %v4948_v50  ;;  %v6491_v13 = vld [vmem:[%s10245_s2 + $0x344] sm:$0xf0]  ;;  %v4875_v14 = vld [vmem:[%s10245_s2 + $0x4b0] sm:$0xf]  ;;  %v6389_v18 = vld [vmem:[%s10245_s2 + $0x14] sm:$0xf0]  ;;  %v4492_v19 = vor.u32 %v6443_v11, %v4491_v9 }
  0x14   :  { %1799 = vmatpush.bf16.msra.mxu0 %v4348_v56  ;;  %v6539_v15 = vld [vmem:[%s10245_s2 + $0x4c4] sm:$0xf0]  ;;  %v4684_v20 = vor.u32 %v6491_v13, %v4683_v12  ;;  %v4467_v21 = vld [vmem:[%s10245_s2 + $0x180] sm:$0xf]  ;;  %v6437_v22 = vld [vmem:[%s10245_s2 + $0x194] sm:$0xf0]  ;;  %v4276_v31 = vor.u32 %v6389_v18, %v4275_v17 }
  0x15   :  { %1812 = vmatpush.bf16.msra.mxu1 %v4540_v57  ;;  %v4659_v23 = vld [vmem:[%s10245_s2 + $0x300] sm:$0xf]  ;;  %v4876_v24 = vor.u32 %v6539_v15, %v4875_v14  ;;  %v6485_v25 = vld [vmem:[%s10245_s2 + $0x314] sm:$0xf0]  ;;  %v5211_v28 = vld [vmem:[%s10245_s2 + $0x750] sm:$0xf]  ;;  %v4468_v35 = vor.u32 %v6437_v22, %v4467_v21 }
  0x16   :  { %1825 = vmatpush.bf16.msra.mxu2 %v4732_v58  ;;  %v4851_v26 = vld [vmem:[%s10245_s2 + $0x480] sm:$0xf]  ;;  %v6533_v27 = vld [vmem:[%s10245_s2 + $0x494] sm:$0xf0]  ;;  %v6623_v29 = vld [vmem:[%s10245_s2 + $0x764] sm:$0xf0]  ;;  %v4660_v36 = vor.u32 %v6485_v25, %v4659_v23 }
  0x17   :  { %1838 = vmatpush.bf16.msra.mxu3 %v4924_v62  ;;  %v5403_v30 = vld [vmem:[%s10245_s2 + $0x8d0] sm:$0xf]  ;;  %v6671_v32 = vld [vmem:[%s10245_s2 + $0x8e4] sm:$0xf0]  ;;  %v6428_v33 = vld [vmem:[%s10245_s2 + $0x154] sm:$0xf]  ;;  %v4852_v39 = vor.u32 %v6533_v27, %v4851_v26  ;;  %v5212_v40 = vor.u32 %v6623_v29, %v5211_v28 }
  0x18   :  { %1800 = vmatpush.bf16.msra.mxu0 %v4324_v4  ;;  %v4445_v34 = vld [vmem:[%s10245_s2 + $0x168] sm:$0xf0]  ;;  %v6476_v37 = vld [vmem:[%s10245_s2 + $0x2d4] sm:$0xf]  ;;  %v5404_v41 = vor.u32 %v6671_v32, %v5403_v30  ;;  %v5187_v43 = vld [vmem:[%s10245_s2 + $0x720] sm:$0xf] }
  0x19   :  { %1813 = vmatpush.bf16.msra.mxu1 %v4516_v5  ;;  %v4637_v38 = vld [vmem:[%s10245_s2 + $0x2e8] sm:$0xf0]  ;;  %v4448_v42 = vor.u32 %v6428_v33, %v4445_v34  ;;  %v6617_v44 = vld [vmem:[%s10245_s2 + $0x734] sm:$0xf0]  ;;  %v5379_v45 = vld [vmem:[%s10245_s2 + $0x8a0] sm:$0xf] }
  0x1a   :  { %1826 = vmatpush.bf16.msra.mxu2 %v4708_v6  ;;  %v4640_v46 = vor.u32 %v6476_v37, %v4637_v38  ;;  %v6665_v47 = vld [vmem:[%s10245_s2 + $0x8b4] sm:$0xf0]  ;;  %v6422_v48 = vld [vmem:[%s10245_s2 + $0x124] sm:$0xf]  ;;  %v4421_v49 = vld [vmem:[%s10245_s2 + $0x138] sm:$0xf0]  ;;  %v5188_v52 = vor.u32 %v6617_v44, %v5187_v43 }
  0x1b   :  { %1839 = vmatpush.bf16.msra.mxu3 %v4900_v10  ;;  %v6470_v50 = vld [vmem:[%s10245_s2 + $0x2a4] sm:$0xf]  ;;  %v4613_v51 = vld [vmem:[%s10245_s2 + $0x2b8] sm:$0xf0]  ;;  %v5163_v53 = vld [vmem:[%s10245_s2 + $0x6f0] sm:$0xf]  ;;  %v5380_v54 = vor.u32 %v6665_v47, %v5379_v45  ;;  %v4424_v55 = vor.u32 %v6422_v48, %v4421_v49 }
  0x1c   :  { %1801 = vmatpush.bf16.msra.mxu0 %v4300_v16  ;;  %v6611_v56 = vld [vmem:[%s10245_s2 + $0x704] sm:$0xf0]  ;;  %v5355_v57 = vld [vmem:[%s10245_s2 + $0x870] sm:$0xf]  ;;  %v4616_v59 = vor.u32 %v6470_v50, %v4613_v51  ;;  %v6416_v60 = vld [vmem:[%s10245_s2 + $0xf4] sm:$0xf] }
  0x1d   :  { %1814 = vmatpush.bf16.msra.mxu1 %v4492_v19  ;;  %v6659_v58 = vld [vmem:[%s10245_s2 + $0x884] sm:$0xf0]  ;;  %v4397_v61 = vld [vmem:[%s10245_s2 + $0x108] sm:$0xf0]  ;;  %v6464_v62 = vld [vmem:[%s10245_s2 + $0x274] sm:$0xf]  ;;  %v5164_v0 = vor.u32 %v6611_v56, %v5163_v53 }
  0x1e   :  { %1827 = vmatpush.bf16.msra.mxu2 %v4684_v20  ;;  %v4589_v63 = vld [vmem:[%s10245_s2 + $0x288] sm:$0xf0]  ;;  %v5356_v1 = vor.u32 %v6659_v58, %v5355_v57  ;;  %v5139_v2 = vld [vmem:[%s10245_s2 + $0x6c0] sm:$0xf]  ;;  %v43_v3 = vld [vmem:[%s10246_s0 + $0x10] sm:$0xff]  ;;  %v4400_v5 = vor.u32 %v6416_v60, %v4397_v61 }
  0x1f   :  { %1840 = vmatpush.bf16.msra.mxu3 %v4876_v24  ;;  %v41_v4 = vld [vmem:[%s10246_s0] sm:$0xff]  ;;  %v6605_v6 = vld [vmem:[%s10245_s2 + $0x6d4] sm:$0xf0]  ;;  %v7274_v8 = vpack.c.bf16 %v43_v3, %v43_v3  ;;  %v4592_v11 = vor.u32 %v6464_v62, %v4589_v63  ;;  %v4373_v14 = vld [vmem:[%s10245_s2 + $0xd8] sm:$0xf0] }
  0x20   :  { %1802 = vmatpush.bf16.msra.mxu0 %v4276_v31  ;;  %v5331_v7 = vld [vmem:[%s10245_s2 + $0x840] sm:$0xf]  ;;  %v7276_v9 = vpack.c.bf16 %v41_v4, %v41_v4  ;;  %v44_v10 = vld [vmem:[%s10246_s0 + $0x18] sm:$0xff]  ;;  %v6410_v13 = vld [vmem:[%s10245_s2 + $0xc4] sm:$0xf]  ;;  %v5140_v18 = vor.u32 %v6605_v6, %v5139_v2 }
  0x21   :  { %1815 = vmatpush.bf16.msra.mxu1 %v4468_v35  ;;  %v6653_v12 = vld [vmem:[%s10245_s2 + $0x854] sm:$0xf0]  ;;  %v7290_v15 = vpack.c.bf16 %v44_v10, %v44_v10  ;;  %v6458_v16 = vld [vmem:[%s10245_s2 + $0x244] sm:$0xf]  ;;  %v4565_v17 = vld [vmem:[%s10245_s2 + $0x258] sm:$0xf0]  ;;  %v4376_v21 = vor.u32 %v6410_v13, %v4373_v14 }
  0x22   :  { %1828 = vmatpush.bf16.msra.mxu2 %v4660_v36  ;;  %v42_v19 = vld [vmem:[%s10246_s0 + $0x8] sm:$0xff]  ;;  %v5332_v20 = vor.u32 %v6653_v12, %v5331_v7  ;;  %v5115_v22 = vld [vmem:[%s10245_s2 + $0x690] sm:$0xf]  ;;  %v4568_v26 = vor.u32 %v6458_v16, %v4565_v17  ;;  %v6404_v28 = vld [vmem:[%s10245_s2 + $0x94] sm:$0xf] }
  0x23   :  { %1841 = vmatpush.bf16.msra.mxu3 %v4852_v39  ;;  %1803 = vmatmul.bf16.vlgmr.msra.gmra.mxu0 %v7276_v9  ;;  %v6599_v23 = vld [vmem:[%s10245_s2 + $0x6a4] sm:$0xf0]  ;;  %v5307_v24 = vld [vmem:[%s10245_s2 + $0x810] sm:$0xf]  ;;  %v7313_v25 = vpack.c.bf16 %v42_v19, %v42_v19  ;;  %v4349_v29 = vld [vmem:[%s10245_s2 + $0xa8] sm:$0xf0] }
  0x24   :  { %1847 = vmatpush.bf16.msrb.mxu0 %v5212_v40  ;;  %v6647_v27 = vld [vmem:[%s10245_s2 + $0x824] sm:$0xf0]  ;;  %v6452_v30 = vld [vmem:[%s10245_s2 + $0x214] sm:$0xf]  ;;  %v4541_v31 = vld [vmem:[%s10245_s2 + $0x228] sm:$0xf0]  ;;  %v5116_v32 = vor.u32 %v6599_v23, %v5115_v22  ;;  %v4352_v34 = vor.u32 %v6404_v28, %v4349_v29 }
  0x25   :  { %1860 = vmatpush.bf16.msrb.mxu1 %v5404_v41  ;;  %1829 = vmatmul.bf16.vlgmr.msra.gmra.mxu2 %v7274_v8  ;;  %v5308_v33 = vor.u32 %v6647_v27, %v5307_v24  ;;  %v5091_v35 = vld [vmem:[%s10245_s2 + $0x660] sm:$0xf]  ;;  %v6593_v36 = vld [vmem:[%s10245_s2 + $0x674] sm:$0xf0]  ;;  %v4544_v38 = vor.u32 %v6452_v30, %v4541_v31  ;;  %v6398_v40 = vld [vmem:[%s10245_s2 + $0x64] sm:$0xf] }
  0x26   :  { %1873 = vmatpush.bf16.msrb.mxu2 %v4448_v42  ;;  %1842 = vmatmul.bf16.vlgmr.msra.gmra.mxu3 %v7290_v15  ;;  %v5283_v37 = vld [vmem:[%s10245_s2 + $0x7e0] sm:$0xf]  ;;  %v6641_v39 = vld [vmem:[%s10245_s2 + $0x7f4] sm:$0xf0]  ;;  %v4325_v41 = vld [vmem:[%s10245_s2 + $0x78] sm:$0xf0]  ;;  %v5092_v44 = vor.u32 %v6593_v36, %v5091_v35 }
  0x27   :  { %1886 = vmatpush.bf16.msrb.mxu3 %v4640_v46  ;;  %1816 = vmatmul.bf16.vlgmr.msra.gmra.mxu1 %v7313_v25  ;;  %v6446_v42 = vld [vmem:[%s10245_s2 + $0x1e4] sm:$0xf]  ;;  %v4517_v43 = vld [vmem:[%s10245_s2 + $0x1f8] sm:$0xf0]  ;;  %v5284_v45 = vor.u32 %v6641_v39, %v5283_v37  ;;  %v4328_v46 = vor.u32 %v6398_v40, %v4325_v41  ;;  %v5067_v47 = vld [vmem:[%s10245_s2 + $0x630] sm:$0xf] }
  0x28   :  { %1848 = vmatpush.bf16.msrb.mxu0 %v5188_v52  ;;  %v6587_v48 = vld [vmem:[%s10245_s2 + $0x644] sm:$0xf0]  ;;  %v5259_v49 = vld [vmem:[%s10245_s2 + $0x7b0] sm:$0xf]  ;;  %v4520_v50 = vor.u32 %v6446_v42, %v4517_v43  ;;  %v6392_v52 = vld [vmem:[%s10245_s2 + $0x34] sm:$0xf] }
  0x29   :  { %1861 = vmatpush.bf16.msrb.mxu1 %v5380_v54  ;;  %v6635_v51 = vld [vmem:[%s10245_s2 + $0x7c4] sm:$0xf0]  ;;  %v4301_v53 = vld [vmem:[%s10245_s2 + $0x48] sm:$0xf0]  ;;  %v6440_v54 = vld [vmem:[%s10245_s2 + $0x1b4] sm:$0xf]  ;;  %v5068_v56 = vor.u32 %v6587_v48, %v5067_v47 }
  0x2a   :  { %1874 = vmatpush.bf16.msrb.mxu2 %v4424_v55  ;;  %v4493_v55 = vld [vmem:[%s10245_s2 + $0x1c8] sm:$0xf0]  ;;  %v5043_v57 = vld [vmem:[%s10245_s2 + $0x600] sm:$0xf]  ;;  %v6581_v58 = vld [vmem:[%s10245_s2 + $0x614] sm:$0xf0]  ;;  %v4304_v60 = vor.u32 %v6392_v52, %v4301_v53 }
  0x2b   :  { %1887 = vmatpush.bf16.msrb.mxu3 %v4616_v59  ;;  %v5260_v59 = vor.u32 %v6635_v51, %v5259_v49  ;;  %v5235_v61 = vld [vmem:[%s10245_s2 + $0x780] sm:$0xf]  ;;  %v6629_v62 = vld [vmem:[%s10245_s2 + $0x794] sm:$0xf0]  ;;  %v6386_v63 = vld [vmem:[%s10245_s2 + $0x4] sm:$0xf]  ;;  %v5044_v7 = vor.u32 %v6581_v58, %v5043_v57 }
  0x2c   :  { %1849 = vmatpush.bf16.msrb.mxu0 %v5164_v0  ;;  %v4496_v0 = vor.u32 %v6440_v54, %v4493_v55  ;;  %v6434_v2 = vld [vmem:[%s10245_s2 + $0x184] sm:$0xf]  ;;  %v4469_v3 = vld [vmem:[%s10245_s2 + $0x198] sm:$0xf0]  ;;  %v6524_v4 = vld [vmem:[%s10245_s2 + $0x454] sm:$0xf]  ;;  %v5236_v13 = vor.u32 %v6629_v62, %v5235_v61 }
  0x2d   :  { %1862 = vmatpush.bf16.msrb.mxu1 %v5356_v1  ;;  %v4277_v1 = vld [vmem:[%s10245_s2 + $0x18] sm:$0xf0]  ;;  %v6572_v6 = vld [vmem:[%s10245_s2 + $0x5d4] sm:$0xf]  ;;  %v5021_v10 = vld [vmem:[%s10245_s2 + $0x5e8] sm:$0xf0]  ;;  %v4472_v19 = vor.u32 %v6434_v2, %v4469_v3 }
  0x2e   :  { %1875 = vmatpush.bf16.msrb.mxu2 %v4400_v5  ;;  %v4829_v5 = vld [vmem:[%s10245_s2 + $0x468] sm:$0xf0]  ;;  %v4280_v14 = vor.u32 %v6386_v63, %v4277_v1  ;;  %v6668_v16 = vld [vmem:[%s10245_s2 + $0x8d4] sm:$0xf]  ;;  %v5024_v22 = vor.u32 %v6572_v6, %v5021_v10  ;;  %v6518_v24 = vld [vmem:[%s10245_s2 + $0x424] sm:$0xf] }
  0x2f   :  { %1888 = vmatpush.bf16.msrb.mxu3 %v4592_v11  ;;  %v6620_v11 = vld [vmem:[%s10245_s2 + $0x754] sm:$0xf]  ;;  %v5213_v12 = vld [vmem:[%s10245_s2 + $0x768] sm:$0xf0]  ;;  %v6566_v27 = vld [vmem:[%s10245_s2 + $0x5a4] sm:$0xf] }
  0x30   :  { %1850 = vmatpush.bf16.msrb.mxu0 %v5140_v18  ;;  %v5405_v17 = vld [vmem:[%s10245_s2 + $0x8e8] sm:$0xf0]  ;;  %v45_v18 = vld [vmem:[%s10246_s0 + $0x20] sm:$0xff]  ;;  %v5216_v23 = vor.u32 %v6620_v11, %v5213_v12  ;;  %v4997_v29 = vld [vmem:[%s10245_s2 + $0x5b8] sm:$0xf0] }
  0x31   :  { %1863 = vmatpush.bf16.msrb.mxu1 %v5332_v20  ;;  %v4832_v20 = vor.u32 %v6524_v4, %v4829_v5  ;;  %v5408_v28 = vor.u32 %v6668_v16, %v5405_v17  ;;  %v6614_v30 = vld [vmem:[%s10245_s2 + $0x724] sm:$0xf]  ;;  %v5189_v31 = vld [vmem:[%s10245_s2 + $0x738] sm:$0xf0]  ;;  %v5000_v37 = vor.u32 %v6566_v27, %v4997_v29  ;;  %v6512_v39 = vld [vmem:[%s10245_s2 + $0x3f4] sm:$0xf] }
  0x32   :  { %1876 = vmatpush.bf16.msrb.mxu2 %v4376_v21  ;;  %v46_v21 = vld [vmem:[%s10246_s0 + $0x28] sm:$0xff]  ;;  %v6560_v41 = vld [vmem:[%s10245_s2 + $0x574] sm:$0xf]  ;;  %v6506_v51 = vld [vmem:[%s10245_s2 + $0x3c4] sm:$0xf] }
  0x33   :  { %1889 = vmatpush.bf16.msrb.mxu3 %v4568_v26  ;;  %v4805_v26 = vld [vmem:[%s10245_s2 + $0x438] sm:$0xf0]  ;;  %v7459_v35 = vpack.c.bf16 %v46_v21, %v46_v21  ;;  %v4781_v40 = vld [vmem:[%s10245_s2 + $0x408] sm:$0xf0]  ;;  %v6554_v53 = vld [vmem:[%s10245_s2 + $0x544] sm:$0xf] }
  0x34   :  { %1851 = vmatpush.bf16.msrb.mxu0 %v5116_v32  ;;  %v7451_v32 = vpack.c.bf16 %v45_v18, %v45_v18  ;;  %v4808_v36 = vor.u32 %v6518_v24, %v4805_v26  ;;  %v4973_v43 = vld [vmem:[%s10245_s2 + $0x588] sm:$0xf0]  ;;  %v4784_v48 = vor.u32 %v6512_v39, %v4781_v40  ;;  %v4757_v52 = vld [vmem:[%s10245_s2 + $0x3d8] sm:$0xf0]  ;;  %v6650_v58 = vld [vmem:[%s10245_s2 + $0x844] sm:$0xf] }
  0x35   :  { %1864 = vmatpush.bf16.msrb.mxu1 %v5308_v33  ;;  %v6662_v33 = vld [vmem:[%s10245_s2 + $0x8a4] sm:$0xf]  ;;  %v5357_v47 = vld [vmem:[%s10245_s2 + $0x888] sm:$0xf0]  ;;  %v4976_v49 = vor.u32 %v6560_v41, %v4973_v43  ;;  %v4949_v55 = vld [vmem:[%s10245_s2 + $0x558] sm:$0xf0] }
  0x36   :  { %1877 = vmatpush.bf16.msrb.mxu2 %v4352_v34  ;;  %v5381_v34 = vld [vmem:[%s10245_s2 + $0x8b8] sm:$0xf0]  ;;  %v4952_v61 = vor.u32 %v6554_v53, %v4949_v55  ;;  %v6500_v63 = vld [vmem:[%s10245_s2 + $0x394] sm:$0xf]  ;;  %v4925_v3 = vld [vmem:[%s10245_s2 + $0x528] sm:$0xf0] }
  0x37   :  { %1890 = vmatpush.bf16.msrb.mxu3 %v4544_v38  ;;  %v5192_v38 = vor.u32 %v6614_v30, %v5189_v31  ;;  %v5384_v42 = vor.u32 %v6662_v33, %v5381_v34  ;;  %v5141_v57 = vld [vmem:[%s10245_s2 + $0x6d8] sm:$0xf0]  ;;  %v6548_v1 = vld [vmem:[%s10245_s2 + $0x514] sm:$0xf]  ;;  %v5117_v5 = vld [vmem:[%s10245_s2 + $0x6a8] sm:$0xf0] }
  0x38   :  { %1852 = vmatpush.bf16.msrb.mxu0 %v5092_v44  ;;  %v6608_v44 = vld [vmem:[%s10245_s2 + $0x6f4] sm:$0xf]  ;;  %v4928_v11 = vor.u32 %v6548_v1, %v4925_v3  ;;  %v6542_v16 = vld [vmem:[%s10245_s2 + $0x4e4] sm:$0xf]  ;;  %v4901_v18 = vld [vmem:[%s10245_s2 + $0x4f8] sm:$0xf0] }
  0x39   :  { %1865 = vmatpush.bf16.msrb.mxu1 %v5284_v45  ;;  %v5165_v45 = vld [vmem:[%s10245_s2 + $0x708] sm:$0xf0]  ;;  %v6596_v4 = vld [vmem:[%s10245_s2 + $0x694] sm:$0xf]  ;;  %v6638_v21 = vld [vmem:[%s10245_s2 + $0x7e4] sm:$0xf]  ;;  %v4904_v24 = vor.u32 %v6542_v16, %v4901_v18 }
  0x3a   :  { %1878 = vmatpush.bf16.msrb.mxu2 %v4328_v46  ;;  %v6656_v46 = vld [vmem:[%s10245_s2 + $0x874] sm:$0xf]  ;;  %v5120_v12 = vor.u32 %v6596_v4, %v5117_v5  ;;  %v4877_v31 = vld [vmem:[%s10245_s2 + $0x4c8] sm:$0xf0]  ;;  %v6482_v39 = vld [vmem:[%s10245_s2 + $0x304] sm:$0xf] }
  0x3b   :  { %1891 = vmatpush.bf16.msrb.mxu3 %v4520_v50  ;;  %v5168_v50 = vor.u32 %v6608_v44, %v5165_v45  ;;  %v5360_v54 = vor.u32 %v6656_v46, %v5357_v47  ;;  %v6644_v6 = vld [vmem:[%s10245_s2 + $0x814] sm:$0xf]  ;;  %v5069_v34 = vld [vmem:[%s10245_s2 + $0x648] sm:$0xf0]  ;;  %v4661_v40 = vld [vmem:[%s10245_s2 + $0x318] sm:$0xf0] }
  0x3c   :  { %1853 = vmatpush.bf16.msrb.mxu0 %v5068_v56  ;;  %v6602_v56 = vld [vmem:[%s10245_s2 + $0x6c4] sm:$0xf]  ;;  %v6488_v27 = vld [vmem:[%s10245_s2 + $0x334] sm:$0xf]  ;;  %v4853_v44 = vld [vmem:[%s10245_s2 + $0x498] sm:$0xf0]  ;;  %v4664_v53 = vor.u32 %v6482_v39, %v4661_v40 }
  0x3d   :  { %1866 = vmatpush.bf16.msrb.mxu1 %v5260_v59  ;;  %v5333_v59 = vld [vmem:[%s10245_s2 + $0x858] sm:$0xf0]  ;;  %v5144_v62 = vor.u32 %v6602_v56, %v5141_v57  ;;  %v6536_v29 = vld [vmem:[%s10245_s2 + $0x4b4] sm:$0xf]  ;;  %v6530_v43 = vld [vmem:[%s10245_s2 + $0x484] sm:$0xf] }
  0x3e   :  { %1879 = vmatpush.bf16.msrb.mxu2 %v4304_v60  ;;  %v4760_v60 = vor.u32 %v6506_v51, %v4757_v52  ;;  %v5336_v2 = vor.u32 %v6650_v58, %v5333_v59  ;;  %v6584_v33 = vld [vmem:[%s10245_s2 + $0x634] sm:$0xf]  ;;  %v4880_v41 = vor.u32 %v6536_v29, %v4877_v31  ;;  %v6578_v45 = vld [vmem:[%s10245_s2 + $0x604] sm:$0xf]  ;;  %v5045_v47 = vld [vmem:[%s10245_s2 + $0x618] sm:$0xf0]  ;;  %v4856_v57 = vor.u32 %v6530_v43, %v4853_v44 }
  0x3f   :  { %1892 = vmatpush.bf16.msrb.mxu3 %v4496_v0  ;;  %v4733_v0 = vld [vmem:[%s10245_s2 + $0x3a8] sm:$0xf0]  ;;  %v6432_v51 = vld [vmem:[%s10245_s2 + $0x16c] sm:$0xf0]  ;;  %v4643_v52 = vld [vmem:[%s10245_s2 + $0x2d8] sm:$0xf]  ;;  %v5048_v58 = vor.u32 %v6578_v45, %v5045_v47 }
  0x40   :  { %1854 = vmatpush.bf16.msrb.mxu0 %v5044_v7  ;;  %v5309_v7 = vld [vmem:[%s10245_s2 + $0x828] sm:$0xf0]  ;;  %v4736_v10 = vor.u32 %v6500_v63, %v4733_v0  ;;  %v4835_v55 = vld [vmem:[%s10245_s2 + $0x458] sm:$0xf]  ;;  %v6528_v56 = vld [vmem:[%s10245_s2 + $0x46c] sm:$0xf0] }
  0x41   :  { %1867 = vmatpush.bf16.msrb.mxu1 %v5236_v13  ;;  %v6494_v13 = vld [vmem:[%s10245_s2 + $0x364] sm:$0xf]  ;;  %v5312_v17 = vor.u32 %v6644_v6, %v5309_v7  ;;  %v5027_v59 = vld [vmem:[%s10245_s2 + $0x5d8] sm:$0xf]  ;;  %v4836_v0 = vor.u32 %v6528_v56, %v4835_v55  ;;  %v4427_v1 = vld [vmem:[%s10245_s2 + $0x128] sm:$0xf] }
  0x42   :  { %1880 = vmatpush.bf16.msrb.mxu2 %v4280_v14  ;;  %v4709_v14 = vld [vmem:[%s10245_s2 + $0x378] sm:$0xf0]  ;;  %v4619_v3 = vld [vmem:[%s10245_s2 + $0x2a8] sm:$0xf]  ;;  %v6474_v5 = vld [vmem:[%s10245_s2 + $0x2bc] sm:$0xf0] }
  0x43   :  { %1893 = vmatpush.bf16.msrb.mxu3 %v4472_v19  ;;  %1855 = vmatmul.bf16.vlgmr.msrb.gmra.mxu0 %v7451_v32  ;;  %v6590_v19 = vld [vmem:[%s10245_s2 + $0x664] sm:$0xf]  ;;  %v4811_v6 = vld [vmem:[%s10245_s2 + $0x428] sm:$0xf]  ;;  %v6522_v7 = vld [vmem:[%s10245_s2 + $0x43c] sm:$0xf0] }
  0x44   :  { %1899 = vmatpush.bf16.msra.mxu0 %v4832_v20  ;;  %1868 = vmatmul.bf16.vlgmr.msrb.gmra.mxu1 %v7459_v35  ;;  %v5093_v20 = vld [vmem:[%s10245_s2 + $0x678] sm:$0xf0]  ;;  %v4403_v16 = vld [vmem:[%s10245_s2 + $0xf8] sm:$0xf]  ;;  %v4379_v29 = vld [vmem:[%s10245_s2 + $0xc8] sm:$0xf] }
  0x45   :  { %1912 = vmatpush.bf16.msra.mxu1 %v5024_v22  ;;  %1881 = vmatmul.bf16.vlgmr.msrb.gmra.mxu2 %v7276_v9  ;;  %v5285_v22 = vld [vmem:[%s10245_s2 + $0x7f8] sm:$0xf0]  ;;  %v5096_v26 = vor.u32 %v6590_v19, %v5093_v20  ;;  %v4595_v18 = vld [vmem:[%s10245_s2 + $0x278] sm:$0xf]  ;;  %v6468_v20 = vld [vmem:[%s10245_s2 + $0x28c] sm:$0xf0] }
  0x46   :  { %1925 = vmatpush.bf16.msra.mxu2 %v5216_v23  ;;  %1894 = vmatmul.bf16.vlgmr.msrb.gmra.mxu3 %v7313_v25  ;;  %v4712_v23 = vor.u32 %v6494_v13, %v4709_v14  ;;  %v5288_v30 = vor.u32 %v6638_v21, %v5285_v22  ;;  %v4620_v13 = vor.u32 %v6474_v5, %v4619_v3  ;;  %v4787_v21 = vld [vmem:[%s10245_s2 + $0x3f8] sm:$0xf]  ;;  %v6516_v22 = vld [vmem:[%s10245_s2 + $0x40c] sm:$0xf0]  ;;  %v4571_v31 = vld [vmem:[%s10245_s2 + $0x248] sm:$0xf] }
  0x47   :  { %1938 = vmatpush.bf16.msra.mxu3 %v5408_v28  ;;  %v4685_v28 = vld [vmem:[%s10245_s2 + $0x348] sm:$0xf0]  ;;  %v4812_v14 = vor.u32 %v6522_v7, %v4811_v6  ;;  %v6558_v39 = vld [vmem:[%s10245_s2 + $0x55c] sm:$0xf0]  ;;  %v4355_v43 = vld [vmem:[%s10245_s2 + $0x98] sm:$0xf] }
  0x48   :  { %1900 = vmatpush.bf16.msra.mxu0 %v4808_v36  ;;  %v6632_v36 = vld [vmem:[%s10245_s2 + $0x7b4] sm:$0xf]  ;;  %v6408_v44 = vld [vmem:[%s10245_s2 + $0xac] sm:$0xf0]  ;;  %v4547_v45 = vld [vmem:[%s10245_s2 + $0x218] sm:$0xf] }
  0x49   :  { %1913 = vmatpush.bf16.msra.mxu1 %v5000_v37  ;;  %v5261_v37 = vld [vmem:[%s10245_s2 + $0x7c8] sm:$0xf0]  ;;  %v6456_v47 = vld [vmem:[%s10245_s2 + $0x22c] sm:$0xf0]  ;;  %v4331_v55 = vld [vmem:[%s10245_s2 + $0x68] sm:$0xf] }
  0x4a   :  { %1926 = vmatpush.bf16.msra.mxu2 %v5192_v38  ;;  %v4688_v38 = vor.u32 %v6488_v27, %v4685_v28  ;;  %v5264_v46 = vor.u32 %v6632_v36, %v5261_v37  ;;  %v4596_v27 = vor.u32 %v6468_v20, %v4595_v18  ;;  %v4788_v28 = vor.u32 %v6516_v22, %v4787_v21  ;;  %v4763_v36 = vld [vmem:[%s10245_s2 + $0x3c8] sm:$0xf]  ;;  %v6510_v37 = vld [vmem:[%s10245_s2 + $0x3dc] sm:$0xf0]  ;;  %v4307_v3 = vld [vmem:[%s10245_s2 + $0x38] sm:$0xf] }
  0x4b   :  { %1939 = vmatpush.bf16.msra.mxu3 %v5384_v42  ;;  %v5072_v42 = vor.u32 %v6584_v33, %v5069_v34  ;;  %v6462_v34 = vld [vmem:[%s10245_s2 + $0x25c] sm:$0xf0]  ;;  %v4499_v5 = vld [vmem:[%s10245_s2 + $0x1b8] sm:$0xf]  ;;  %v6444_v7 = vld [vmem:[%s10245_s2 + $0x1cc] sm:$0xf0] }
  0x4c   :  { %1901 = vmatpush.bf16.msra.mxu0 %v4784_v48  ;;  %v6626_v48 = vld [vmem:[%s10245_s2 + $0x784] sm:$0xf]  ;;  %v6402_v56 = vld [vmem:[%s10245_s2 + $0x7c] sm:$0xf0]  ;;  %v4500_v18 = vor.u32 %v6444_v7, %v4499_v5  ;;  %v4475_v20 = vld [vmem:[%s10245_s2 + $0x188] sm:$0xf] }
  0x4d   :  { %1914 = vmatpush.bf16.msra.mxu1 %v4976_v49  ;;  %v5237_v49 = vld [vmem:[%s10245_s2 + $0x798] sm:$0xf0]  ;;  %v6438_v21 = vld [vmem:[%s10245_s2 + $0x19c] sm:$0xf0]  ;;  %v4667_v22 = vld [vmem:[%s10245_s2 + $0x308] sm:$0xf] }
  0x4e   :  { %1927 = vmatpush.bf16.msra.mxu2 %v5168_v50  ;;  %v4451_v50 = vld [vmem:[%s10245_s2 + $0x158] sm:$0xf]  ;;  %v5147_v5 = vld [vmem:[%s10245_s2 + $0x6c8] sm:$0xf] }
  0x4f   :  { %1940 = vmatpush.bf16.msra.mxu3 %v5360_v54  ;;  %v6480_v54 = vld [vmem:[%s10245_s2 + $0x2ec] sm:$0xf0]  ;;  %v5339_v7 = vld [vmem:[%s10245_s2 + $0x848] sm:$0xf] }
  0x50   :  { %1902 = vmatpush.bf16.msra.mxu0 %v4760_v60  ;;  %v6576_v60 = vld [vmem:[%s10245_s2 + $0x5ec] sm:$0xf0]  ;;  %v4644_v63 = vor.u32 %v6480_v54, %v4643_v52  ;;  %v4356_v52 = vor.u32 %v6408_v44, %v4355_v43 }
  0x51   :  { %1915 = vmatpush.bf16.msra.mxu1 %v4952_v61  ;;  %v5240_v61 = vor.u32 %v6626_v48, %v5237_v49  ;;  %v5028_v4 = vor.u32 %v6576_v60, %v5027_v59  ;;  %v4739_v48 = vld [vmem:[%s10245_s2 + $0x398] sm:$0xf]  ;;  %v6504_v49 = vld [vmem:[%s10245_s2 + $0x3ac] sm:$0xf0]  ;;  %v6450_v59 = vld [vmem:[%s10245_s2 + $0x1fc] sm:$0xf0] }
  0x52   :  { %1928 = vmatpush.bf16.msra.mxu2 %v5144_v62  ;;  %v4452_v62 = vor.u32 %v6432_v51, %v4451_v50  ;;  %v4931_v50 = vld [vmem:[%s10245_s2 + $0x518] sm:$0xf]  ;;  %v6552_v51 = vld [vmem:[%s10245_s2 + $0x52c] sm:$0xf0]  ;;  %v4740_v54 = vor.u32 %v6504_v49, %v4739_v48  ;;  %v4715_v60 = vld [vmem:[%s10245_s2 + $0x368] sm:$0xf] }
  0x53   :  { %1941 = vmatpush.bf16.msra.mxu3 %v5336_v2  ;;  %v6426_v2 = vld [vmem:[%s10245_s2 + $0x13c] sm:$0xf0] }
  0x54   :  { %1903 = vmatpush.bf16.msra.mxu0 %v4736_v10  ;;  %v5003_v10 = vld [vmem:[%s10245_s2 + $0x5a8] sm:$0xf]  ;;  %v6666_v49 = vld [vmem:[%s10245_s2 + $0x8bc] sm:$0xf0] }
  0x55   :  { %1916 = vmatpush.bf16.msra.mxu1 %v4928_v11  ;;  %v6570_v11 = vld [vmem:[%s10245_s2 + $0x5bc] sm:$0xf0] }
  0x56   :  { %1929 = vmatpush.bf16.msra.mxu2 %v5120_v12  ;;  %v4428_v12 = vor.u32 %v6426_v2, %v4427_v1  ;;  %v5004_v19 = vor.u32 %v6570_v11, %v5003_v10  ;;  %v4691_v10 = vld [vmem:[%s10245_s2 + $0x338] sm:$0xf]  ;;  %v6492_v11 = vld [vmem:[%s10245_s2 + $0x34c] sm:$0xf0] }
  0x57   :  { %1942 = vmatpush.bf16.msra.mxu3 %v5312_v17  ;;  %v6420_v17 = vld [vmem:[%s10245_s2 + $0x10c] sm:$0xf0] }
  0x58   :  { %1904 = vmatpush.bf16.msra.mxu0 %v4712_v23  ;;  %v4979_v23 = vld [vmem:[%s10245_s2 + $0x578] sm:$0xf] }
  0x59   :  { %1917 = vmatpush.bf16.msra.mxu1 %v4904_v24  ;;  %v6564_v24 = vld [vmem:[%s10245_s2 + $0x58c] sm:$0xf0] }
  0x5a   :  { %1930 = vmatpush.bf16.msra.mxu2 %v5096_v26  ;;  %v4404_v26 = vor.u32 %v6420_v17, %v4403_v16  ;;  %v4980_v33 = vor.u32 %v6564_v24, %v4979_v23  ;;  %v4283_v16 = vld [vmem:[%s10245_s2 + $0x8] sm:$0xf]  ;;  %v6390_v17 = vld [vmem:[%s10245_s2 + $0x1c] sm:$0xf0] }
  0x5b   :  { %1943 = vmatpush.bf16.msra.mxu3 %v5288_v30  ;;  %v6414_v30 = vld [vmem:[%s10245_s2 + $0xdc] sm:$0xf0] }
  0x5c   :  { %1905 = vmatpush.bf16.msra.mxu0 %v4688_v38  ;;  %v4955_v38 = vld [vmem:[%s10245_s2 + $0x548] sm:$0xf]  ;;  %v4380_v40 = vor.u32 %v6414_v30, %v4379_v29  ;;  %v6486_v24 = vld [vmem:[%s10245_s2 + $0x31c] sm:$0xf0]  ;;  %v6624_v29 = vld [vmem:[%s10245_s2 + $0x76c] sm:$0xf0] }
  0x5d   :  { %1918 = vmatpush.bf16.msra.mxu1 %v4880_v41  ;;  %v4572_v41 = vor.u32 %v6462_v34, %v4571_v31  ;;  %v5411_v30 = vld [vmem:[%s10245_s2 + $0x8d8] sm:$0xf]  ;;  %v4284_v31 = vor.u32 %v6390_v17, %v4283_v16  ;;  %v6429_v34 = vld [vmem:[%s10245_s2 + $0x15c] sm:$0xf]  ;;  %v4573_v16 = vld [vmem:[%s10245_s2 + $0x260] sm:$0xf0] }
  0x5e   :  { %1931 = vmatpush.bf16.msra.mxu2 %v5072_v42  ;;  %v4764_v42 = vor.u32 %v6510_v37, %v4763_v36  ;;  %v4453_v36 = vld [vmem:[%s10245_s2 + $0x170] sm:$0xf0]  ;;  %v4476_v37 = vor.u32 %v6438_v21, %v4475_v20  ;;  %v5123_v20 = vld [vmem:[%s10245_s2 + $0x698] sm:$0xf]  ;;  %v6600_v21 = vld [vmem:[%s10245_s2 + $0x6ac] sm:$0xf0] }
  0x5f   :  { %1944 = vmatpush.bf16.msra.mxu3 %v5264_v46  ;;  %v4956_v46 = vor.u32 %v6558_v39, %v4955_v38  ;;  %v4668_v38 = vor.u32 %v6486_v24, %v4667_v22  ;;  %v6477_v39 = vld [vmem:[%s10245_s2 + $0x2dc] sm:$0xf]  ;;  %v4456_v44 = vor.u32 %v6429_v34, %v4453_v36  ;;  %v5315_v22 = vld [vmem:[%s10245_s2 + $0x818] sm:$0xf]  ;;  %v6648_v24 = vld [vmem:[%s10245_s2 + $0x82c] sm:$0xf0] }
  0x60   :  { %1906 = vmatpush.bf16.msra.mxu0 %v4664_v53  ;;  %v4548_v53 = vor.u32 %v6456_v47, %v4547_v45  ;;  %v5195_v45 = vld [vmem:[%s10245_s2 + $0x728] sm:$0xf]  ;;  %v6594_v36 = vld [vmem:[%s10245_s2 + $0x67c] sm:$0xf0] }
  0x61   :  { %1919 = vmatpush.bf16.msra.mxu1 %v4856_v57  ;;  %v4523_v57 = vld [vmem:[%s10245_s2 + $0x1e8] sm:$0xf] }
  0x62   :  { %1932 = vmatpush.bf16.msra.mxu2 %v5048_v58  ;;  %v4932_v58 = vor.u32 %v6552_v51, %v4931_v50  ;;  %v4524_v1 = vor.u32 %v6450_v59, %v4523_v57  ;;  %v5387_v47 = vld [vmem:[%s10245_s2 + $0x8a8] sm:$0xf]  ;;  %v6423_v50 = vld [vmem:[%s10245_s2 + $0x12c] sm:$0xf]  ;;  %v4429_v51 = vld [vmem:[%s10245_s2 + $0x140] sm:$0xf0] }
  0x63   :  { %1945 = vmatpush.bf16.msra.mxu3 %v5240_v61  ;;  %1907 = vmatmul.bf16.vlgmr.msra.gmra.mxu0 %v7274_v8  ;;  %v6498_v61 = vld [vmem:[%s10245_s2 + $0x37c] sm:$0xf0]  ;;  %v5171_v57 = vld [vmem:[%s10245_s2 + $0x6f8] sm:$0xf]  ;;  %v5099_v34 = vld [vmem:[%s10245_s2 + $0x668] sm:$0xf] }
  0x64   :  { %1951 = vmatpush.bf16.msrb.mxu0 %v4452_v62  ;;  %1920 = vmatmul.bf16.vlgmr.msra.gmra.mxu1 %v7290_v15  ;;  %v4907_v62 = vld [vmem:[%s10245_s2 + $0x4e8] sm:$0xf]  ;;  %v4716_v2 = vor.u32 %v6498_v61, %v4715_v60  ;;  %v5363_v59 = vld [vmem:[%s10245_s2 + $0x878] sm:$0xf]  ;;  %v6660_v61 = vld [vmem:[%s10245_s2 + $0x88c] sm:$0xf0] }
  0x65   :  { %1964 = vmatpush.bf16.msrb.mxu1 %v4644_v63  ;;  %1933 = vmatmul.bf16.vlgmr.msra.gmra.mxu2 %v7451_v32  ;;  %v6546_v63 = vld [vmem:[%s10245_s2 + $0x4fc] sm:$0xf0] }
  0x66   :  { %1977 = vmatpush.bf16.msrb.mxu2 %v4836_v0  ;;  %1946 = vmatmul.bf16.vlgmr.msra.gmra.mxu3 %v7459_v35  ;;  %v4332_v0 = vor.u32 %v6402_v56, %v4331_v55  ;;  %v4908_v6 = vor.u32 %v6546_v63, %v4907_v62  ;;  %v5388_v55 = vor.u32 %v6666_v49, %v5387_v47  ;;  %v6417_v62 = vld [vmem:[%s10245_s2 + $0xfc] sm:$0xf]  ;;  %v4405_v63 = vld [vmem:[%s10245_s2 + $0x110] sm:$0xf0]  ;;  %v5075_v47 = vld [vmem:[%s10245_s2 + $0x638] sm:$0xf] }
  0x67   :  { %1990 = vmatpush.bf16.msrb.mxu3 %v5028_v4  ;;  %v6396_v4 = vld [vmem:[%s10245_s2 + $0x4c] sm:$0xf0]  ;;  %v4432_v56 = vor.u32 %v6423_v50, %v4429_v51  ;;  %v5267_v49 = vld [vmem:[%s10245_s2 + $0x7b8] sm:$0xf] }
  0x68   :  { %1952 = vmatpush.bf16.msrb.mxu0 %v4428_v12  ;;  %v4883_v12 = vld [vmem:[%s10245_s2 + $0x4b8] sm:$0xf]  ;;  %v6636_v51 = vld [vmem:[%s10245_s2 + $0x7cc] sm:$0xf0] }
  0x69   :  { %1965 = vmatpush.bf16.msrb.mxu1 %v4620_v13  ;;  %v6540_v13 = vld [vmem:[%s10245_s2 + $0x4cc] sm:$0xf0] }
  0x6a   :  { %1978 = vmatpush.bf16.msrb.mxu2 %v4812_v14  ;;  %v4308_v14 = vor.u32 %v6396_v4, %v4307_v3  ;;  %v4884_v23 = vor.u32 %v6540_v13, %v4883_v12  ;;  %v5364_v3 = vor.u32 %v6660_v61, %v5363_v59  ;;  %v4408_v4 = vor.u32 %v6417_v62, %v4405_v63  ;;  %v6411_v12 = vld [vmem:[%s10245_s2 + $0xcc] sm:$0xf]  ;;  %v4381_v13 = vld [vmem:[%s10245_s2 + $0xe0] sm:$0xf0]  ;;  %v5243_v61 = vld [vmem:[%s10245_s2 + $0x788] sm:$0xf] }
  0x6b   :  { %1991 = vmatpush.bf16.msrb.mxu3 %v5004_v19  ;;  %v4692_v19 = vor.u32 %v6492_v11, %v4691_v10  ;;  %v6654_v11 = vld [vmem:[%s10245_s2 + $0x85c] sm:$0xf0]  ;;  %v5268_v59 = vor.u32 %v6636_v51, %v5267_v49  ;;  %v6387_v63 = vld [vmem:[%s10245_s2 + $0xc] sm:$0xf] }
  0x6c   :  { %1953 = vmatpush.bf16.msrb.mxu0 %v4404_v26  ;;  %v4859_v26 = vld [vmem:[%s10245_s2 + $0x488] sm:$0xf]  ;;  %v6630_v62 = vld [vmem:[%s10245_s2 + $0x79c] sm:$0xf0]  ;;  %v6555_v51 = vld [vmem:[%s10245_s2 + $0x54c] sm:$0xf] }
  0x6d   :  { %1966 = vmatpush.bf16.msrb.mxu1 %v4596_v27  ;;  %v6534_v27 = vld [vmem:[%s10245_s2 + $0x49c] sm:$0xf0] }
  0x6e   :  { %1979 = vmatpush.bf16.msrb.mxu2 %v4788_v28  ;;  %v5219_v28 = vld [vmem:[%s10245_s2 + $0x758] sm:$0xf] }
  0x6f   :  { %1992 = vmatpush.bf16.msrb.mxu3 %v4980_v33  ;;  %v6672_v33 = vld [vmem:[%s10245_s2 + $0x8ec] sm:$0xf0] }
  0x70   :  { %1954 = vmatpush.bf16.msrb.mxu0 %v4380_v40  ;;  %v4645_v40 = vld [vmem:[%s10245_s2 + $0x2f0] sm:$0xf0]  ;;  %v5412_v43 = vor.u32 %v6672_v33, %v5411_v30  ;;  %v5124_v30 = vor.u32 %v6600_v21, %v5123_v20 }
  0x71   :  { %1967 = vmatpush.bf16.msrb.mxu1 %v4572_v41  ;;  %v4860_v41 = vor.u32 %v6534_v27, %v4859_v26  ;;  %v4648_v48 = vor.u32 %v6477_v39, %v4645_v40  ;;  %v6405_v26 = vld [vmem:[%s10245_s2 + $0x9c] sm:$0xf]  ;;  %v4357_v27 = vld [vmem:[%s10245_s2 + $0xb0] sm:$0xf0]  ;;  %v6642_v39 = vld [vmem:[%s10245_s2 + $0x7fc] sm:$0xf0] }
  0x72   :  { %1980 = vmatpush.bf16.msrb.mxu2 %v4764_v42  ;;  %v5220_v42 = vor.u32 %v6624_v29, %v5219_v28  ;;  %v6453_v28 = vld [vmem:[%s10245_s2 + $0x21c] sm:$0xf]  ;;  %v4549_v29 = vld [vmem:[%s10245_s2 + $0x230] sm:$0xf0]  ;;  %v4360_v33 = vor.u32 %v6405_v26, %v4357_v27  ;;  %v6399_v40 = vld [vmem:[%s10245_s2 + $0x6c] sm:$0xf] }
  0x73   :  { %1993 = vmatpush.bf16.msrb.mxu3 %v4956_v46  ;;  %v6618_v46 = vld [vmem:[%s10245_s2 + $0x73c] sm:$0xf0]  ;;  %v5005_v27 = vld [vmem:[%s10245_s2 + $0x5c0] sm:$0xf0] }
  0x74   :  { %1955 = vmatpush.bf16.msrb.mxu0 %v4356_v52  ;;  %v6471_v52 = vld [vmem:[%s10245_s2 + $0x2ac] sm:$0xf] }
  0x75   :  { %1968 = vmatpush.bf16.msrb.mxu1 %v4548_v53  ;;  %v4621_v53 = vld [vmem:[%s10245_s2 + $0x2c0] sm:$0xf0] }
  0x76   :  { %1981 = vmatpush.bf16.msrb.mxu2 %v4740_v54  ;;  %v5196_v54 = vor.u32 %v6618_v46, %v5195_v45  ;;  %v4624_v60 = vor.u32 %v6471_v52, %v4621_v53  ;;  %v6393_v52 = vld [vmem:[%s10245_s2 + $0x3c] sm:$0xf]  ;;  %v4309_v53 = vld [vmem:[%s10245_s2 + $0x50] sm:$0xf0] }
  0x77   :  { %1994 = vmatpush.bf16.msrb.mxu3 %v4932_v58  ;;  %v6612_v58 = vld [vmem:[%s10245_s2 + $0x70c] sm:$0xf0] }
  0x78   :  { %1956 = vmatpush.bf16.msrb.mxu0 %v4332_v0  ;;  %v6465_v0 = vld [vmem:[%s10245_s2 + $0x27c] sm:$0xf] }
  0x79   :  { %1969 = vmatpush.bf16.msrb.mxu1 %v4524_v1  ;;  %v4597_v1 = vld [vmem:[%s10245_s2 + $0x290] sm:$0xf0] }
  0x7a   :  { %1982 = vmatpush.bf16.msrb.mxu2 %v4716_v2  ;;  %v5172_v2 = vor.u32 %v6612_v58, %v5171_v57  ;;  %v4600_v10 = vor.u32 %v6465_v0, %v4597_v1  ;;  %v5051_v57 = vld [vmem:[%s10245_s2 + $0x608] sm:$0xf]  ;;  %v6582_v58 = vld [vmem:[%s10245_s2 + $0x61c] sm:$0xf0]  ;;  %v4285_v1 = vld [vmem:[%s10245_s2 + $0x20] sm:$0xf0] }
  0x7b   :  { %1995 = vmatpush.bf16.msrb.mxu3 %v4908_v6  ;;  %v6606_v6 = vld [vmem:[%s10245_s2 + $0x6dc] sm:$0xf0] }
  0x7c   :  { %1957 = vmatpush.bf16.msrb.mxu0 %v4308_v14  ;;  %v6459_v14 = vld [vmem:[%s10245_s2 + $0x24c] sm:$0xf]  ;;  %v5148_v17 = vor.u32 %v6606_v6, %v5147_v5  ;;  %v4837_v5 = vld [vmem:[%s10245_s2 + $0x470] sm:$0xf0]  ;;  %v6573_v6 = vld [vmem:[%s10245_s2 + $0x5dc] sm:$0xf] }
  0x7d   :  { %1970 = vmatpush.bf16.msrb.mxu1 %v4500_v18  ;;  %v5340_v18 = vor.u32 %v6654_v11, %v5339_v7  ;;  %v5052_v7 = vor.u32 %v6582_v58, %v5051_v57  ;;  %v6621_v11 = vld [vmem:[%s10245_s2 + $0x75c] sm:$0xf]  ;;  %v6651_v57 = vld [vmem:[%s10245_s2 + $0x84c] sm:$0xf]  ;;  %v5341_v58 = vld [vmem:[%s10245_s2 + $0x860] sm:$0xf0] }
  0x7e   :  { %1983 = vmatpush.bf16.msrb.mxu2 %v4692_v19  ;;  %v4384_v19 = vor.u32 %v6411_v12, %v4381_v13  ;;  %v5221_v12 = vld [vmem:[%s10245_s2 + $0x770] sm:$0xf0]  ;;  %v5244_v13 = vor.u32 %v6630_v62, %v5243_v61 }
  0x7f   :  { %1996 = vmatpush.bf16.msrb.mxu3 %v4884_v23  ;;  %v4576_v23 = vor.u32 %v6459_v14, %v4573_v16  ;;  %v4288_v14 = vor.u32 %v6387_v63, %v4285_v1  ;;  %v6669_v16 = vld [vmem:[%s10245_s2 + $0x8dc] sm:$0xf]  ;;  %v5224_v21 = vor.u32 %v6621_v11, %v5221_v12  ;;  %v4741_v63 = vld [vmem:[%s10245_s2 + $0x3b0] sm:$0xf0] }
  0x80   :  { %1958 = vmatpush.bf16.msrb.mxu0 %v4284_v31  ;;  %v5316_v31 = vor.u32 %v6648_v24, %v5315_v22  ;;  %v6519_v22 = vld [vmem:[%s10245_s2 + $0x42c] sm:$0xf] }
  0x81   :  { %1971 = vmatpush.bf16.msrb.mxu1 %v4476_v37  ;;  %v5291_v37 = vld [vmem:[%s10245_s2 + $0x7e8] sm:$0xf]  ;;  %v6567_v24 = vld [vmem:[%s10245_s2 + $0x5ac] sm:$0xf] }
  0x82   :  { %1984 = vmatpush.bf16.msrb.mxu2 %v4668_v38  ;;  %v4552_v38 = vor.u32 %v6453_v28, %v4549_v29  ;;  %v5292_v45 = vor.u32 %v6642_v39, %v5291_v37  ;;  %v6615_v28 = vld [vmem:[%s10245_s2 + $0x72c] sm:$0xf]  ;;  %v5197_v29 = vld [vmem:[%s10245_s2 + $0x740] sm:$0xf0]  ;;  %v6513_v37 = vld [vmem:[%s10245_s2 + $0x3fc] sm:$0xf] }
  0x83   :  { %1997 = vmatpush.bf16.msrb.mxu3 %v4860_v41  ;;  %1959 = vmatmul.bf16.vlgmr.msrb.gmra.mxu0 %v7276_v9  ;;  %v4333_v41 = vld [vmem:[%s10245_s2 + $0x80] sm:$0xf0]  ;;  %v6561_v39 = vld [vmem:[%s10245_s2 + $0x57c] sm:$0xf] }
  0x84   :  { %2003 = vmatpush.bf16.msra.mxu0 %v5220_v42  ;;  %1972 = vmatmul.bf16.vlgmr.msrb.gmra.mxu1 %v7313_v25  ;;  %v6447_v42 = vld [vmem:[%s10245_s2 + $0x1ec] sm:$0xf]  ;;  %v4336_v46 = vor.u32 %v6399_v40, %v4333_v41  ;;  %v4981_v41 = vld [vmem:[%s10245_s2 + $0x590] sm:$0xf0] }
  0x85   :  { %2016 = vmatpush.bf16.msra.mxu1 %v5412_v43  ;;  %1985 = vmatmul.bf16.vlgmr.msrb.gmra.mxu2 %v7274_v8  ;;  %v4525_v43 = vld [vmem:[%s10245_s2 + $0x200] sm:$0xf0] }
  0x86   :  { %2029 = vmatpush.bf16.msra.mxu2 %v4456_v44  ;;  %1998 = vmatmul.bf16.vlgmr.msrb.gmra.mxu3 %v7290_v15  ;;  %v5100_v44 = vor.u32 %v6594_v36, %v5099_v34  ;;  %v4528_v50 = vor.u32 %v6447_v42, %v4525_v43  ;;  %v5008_v34 = vor.u32 %v6567_v24, %v5005_v27  ;;  %v6609_v42 = vld [vmem:[%s10245_s2 + $0x6fc] sm:$0xf]  ;;  %v5173_v43 = vld [vmem:[%s10245_s2 + $0x710] sm:$0xf0]  ;;  %v5293_v24 = vld [vmem:[%s10245_s2 + $0x800] sm:$0xf0] }
  0x87   :  { %2042 = vmatpush.bf16.msra.mxu3 %v4648_v48  ;;  %v6588_v48 = vld [vmem:[%s10245_s2 + $0x64c] sm:$0xf0]  ;;  %v5200_v36 = vor.u32 %v6615_v28, %v5197_v29  ;;  %v5176_v49 = vor.u32 %v6609_v42, %v5173_v43  ;;  %v5269_v42 = vld [vmem:[%s10245_s2 + $0x7d0] sm:$0xf0] }
  0x88   :  { %2004 = vmatpush.bf16.msra.mxu0 %v5196_v54  ;;  %v6441_v54 = vld [vmem:[%s10245_s2 + $0x1bc] sm:$0xf] }
  0x89   :  { %2017 = vmatpush.bf16.msra.mxu1 %v5388_v55  ;;  %v4501_v55 = vld [vmem:[%s10245_s2 + $0x1d0] sm:$0xf0] }
  0x8a   :  { %2030 = vmatpush.bf16.msra.mxu2 %v4432_v56  ;;  %v5076_v56 = vor.u32 %v6588_v48, %v5075_v47  ;;  %v4504_v0 = vor.u32 %v6441_v54, %v4501_v55  ;;  %v6507_v47 = vld [vmem:[%s10245_s2 + $0x3cc] sm:$0xf]  ;;  %v4984_v48 = vor.u32 %v6561_v39, %v4981_v41  ;;  %v5149_v55 = vld [vmem:[%s10245_s2 + $0x6e0] sm:$0xf0]  ;;  %v5077_v39 = vld [vmem:[%s10245_s2 + $0x650] sm:$0xf0] }
  0x8b   :  { %2043 = vmatpush.bf16.msra.mxu3 %v4624_v60  ;;  %v4312_v60 = vor.u32 %v6393_v52, %v4309_v53  ;;  %v4957_v52 = vld [vmem:[%s10245_s2 + $0x560] sm:$0xf0]  ;;  %v6603_v54 = vld [vmem:[%s10245_s2 + $0x6cc] sm:$0xf]  ;;  %v6633_v41 = vld [vmem:[%s10245_s2 + $0x7bc] sm:$0xf] }
  0x8c   :  { %2005 = vmatpush.bf16.msra.mxu0 %v5172_v2  ;;  %v6435_v2 = vld [vmem:[%s10245_s2 + $0x18c] sm:$0xf]  ;;  %v4960_v61 = vor.u32 %v6555_v51, %v4957_v52  ;;  %v5152_v62 = vor.u32 %v6603_v54, %v5149_v55  ;;  %v4861_v52 = vld [vmem:[%s10245_s2 + $0x4a0] sm:$0xf0]  ;;  %v5272_v55 = vor.u32 %v6633_v41, %v5269_v42 }
  0x8d   :  { %2018 = vmatpush.bf16.msra.mxu1 %v5364_v3  ;;  %v4477_v3 = vld [vmem:[%s10245_s2 + $0x1a0] sm:$0xf0]  ;;  %v6531_v51 = vld [vmem:[%s10245_s2 + $0x48c] sm:$0xf] }
  0x8e   :  { %2031 = vmatpush.bf16.msra.mxu2 %v4408_v4  ;;  %v6525_v4 = vld [vmem:[%s10245_s2 + $0x45c] sm:$0xf] }
  0x8f   :  { %2044 = vmatpush.bf16.msra.mxu3 %v4600_v10  ;;  %v5029_v10 = vld [vmem:[%s10245_s2 + $0x5f0] sm:$0xf0] }
  0x90   :  { %2006 = vmatpush.bf16.msra.mxu0 %v5148_v17  ;;  %v5413_v17 = vld [vmem:[%s10245_s2 + $0x8f0] sm:$0xf0]  ;;  %v5032_v20 = vor.u32 %v6573_v6, %v5029_v10  ;;  %v6645_v6 = vld [vmem:[%s10245_s2 + $0x81c] sm:$0xf] }
  0x91   :  { %2019 = vmatpush.bf16.msra.mxu1 %v5340_v18  ;;  %v4480_v18 = vor.u32 %v6435_v2, %v4477_v3  ;;  %v5416_v26 = vor.u32 %v6669_v16, %v5413_v17  ;;  %v5344_v2 = vor.u32 %v6651_v57, %v5341_v58  ;;  %v4933_v3 = vld [vmem:[%s10245_s2 + $0x530] sm:$0xf0]  ;;  %v4717_v16 = vld [vmem:[%s10245_s2 + $0x380] sm:$0xf0]  ;;  %v6543_v17 = vld [vmem:[%s10245_s2 + $0x4ec] sm:$0xf] }
  0x92   :  { %2032 = vmatpush.bf16.msra.mxu2 %v4384_v19  ;;  %v4840_v19 = vor.u32 %v6525_v4, %v4837_v5  ;;  %v6597_v4 = vld [vmem:[%s10245_s2 + $0x69c] sm:$0xf]  ;;  %v5125_v5 = vld [vmem:[%s10245_s2 + $0x6b0] sm:$0xf0]  ;;  %v5053_v57 = vld [vmem:[%s10245_s2 + $0x620] sm:$0xf0] }
  0x93   :  { %2045 = vmatpush.bf16.msra.mxu3 %v4576_v23  ;;  %v4813_v23 = vld [vmem:[%s10245_s2 + $0x440] sm:$0xf0]  ;;  %v6627_v58 = vld [vmem:[%s10245_s2 + $0x78c] sm:$0xf] }
  0x94   :  { %2007 = vmatpush.bf16.msra.mxu0 %v5124_v30  ;;  %v6663_v30 = vld [vmem:[%s10245_s2 + $0x8ac] sm:$0xf] }
  0x95   :  { %2020 = vmatpush.bf16.msra.mxu1 %v5316_v31  ;;  %v5389_v31 = vld [vmem:[%s10245_s2 + $0x8c0] sm:$0xf0] }
  0x96   :  { %2033 = vmatpush.bf16.msra.mxu2 %v4360_v33  ;;  %v4816_v33 = vor.u32 %v6519_v22, %v4813_v23  ;;  %v5392_v40 = vor.u32 %v6663_v30, %v5389_v31  ;;  %v5101_v22 = vld [vmem:[%s10245_s2 + $0x680] sm:$0xf0]  ;;  %v6639_v23 = vld [vmem:[%s10245_s2 + $0x7ec] sm:$0xf]  ;;  %v6489_v30 = vld [vmem:[%s10245_s2 + $0x33c] sm:$0xf] }
  0x97   :  { %2046 = vmatpush.bf16.msra.mxu3 %v4552_v38  ;;  %v4789_v38 = vld [vmem:[%s10245_s2 + $0x410] sm:$0xf0] }
  0x98   :  { %2008 = vmatpush.bf16.msra.mxu0 %v5100_v44  ;;  %v6657_v44 = vld [vmem:[%s10245_s2 + $0x87c] sm:$0xf]  ;;  %v4693_v31 = vld [vmem:[%s10245_s2 + $0x350] sm:$0xf0] }
  0x99   :  { %2021 = vmatpush.bf16.msra.mxu1 %v5292_v45  ;;  %v5365_v45 = vld [vmem:[%s10245_s2 + $0x890] sm:$0xf0] }
  0x9a   :  { %2034 = vmatpush.bf16.msra.mxu2 %v4336_v46  ;;  %v4792_v46 = vor.u32 %v6513_v37, %v4789_v38  ;;  %v5368_v53 = vor.u32 %v6657_v44, %v5365_v45  ;;  %v4885_v37 = vld [vmem:[%s10245_s2 + $0x4d0] sm:$0xf0]  ;;  %v6585_v38 = vld [vmem:[%s10245_s2 + $0x63c] sm:$0xf]  ;;  %v4696_v45 = vor.u32 %v6489_v30, %v4693_v31  ;;  %v4411_v30 = vld [vmem:[%s10245_s2 + $0x100] sm:$0xf] }
  0x9b   :  { %2047 = vmatpush.bf16.msra.mxu3 %v4528_v50  ;;  %v4765_v50 = vld [vmem:[%s10245_s2 + $0x3e0] sm:$0xf0]  ;;  %v6421_v31 = vld [vmem:[%s10245_s2 + $0x114] sm:$0xf0] }
  0x9c   :  { %2009 = vmatpush.bf16.msra.mxu0 %v5076_v56  ;;  %v8098_v56 = vld [vmem:[%s10247_s3] sm:$0x3f]  ;;  %v4412_v41 = vor.u32 %v6421_v31, %v4411_v30 }
  0x9d   :  { %2022 = vmatpush.bf16.msra.mxu1 %v5268_v59  ;;  %v4768_v59 = vor.u32 %v6507_v47, %v4765_v50  ;;  %v343_v1 = vperm.slane %v8098_v56, 0  ;;  %v4669_v47 = vld [vmem:[%s10245_s2 + $0x320] sm:$0xf0]  ;;  %v5080_v50 = vor.u32 %v6585_v38, %v5077_v39  ;;  %v6517_v38 = vld [vmem:[%s10245_s2 + $0x414] sm:$0xf0] }
  0x9e   :  { %2035 = vmatpush.bf16.msra.mxu2 %v4312_v60  ;;  %v6501_v60 = vld [vmem:[%s10245_s2 + $0x39c] sm:$0xf]  ;;  %v4987_v39 = vld [vmem:[%s10245_s2 + $0x580] sm:$0xf] }
  0x9f   :  { %2048 = vmatpush.bf16.msra.mxu3 %v4504_v0  ;;  %v6549_v0 = vld [vmem:[%s10245_s2 + $0x51c] sm:$0xf]  ;;  %v4744_v10 = vor.u32 %v6501_v60, %v4741_v63  ;;  %v4459_v60 = vld [vmem:[%s10245_s2 + $0x160] sm:$0xf] }
  0xa0   :  { %2010 = vmatpush.bf16.msra.mxu0 %v5052_v7  ;;  %v5317_v7 = vld [vmem:[%s10245_s2 + $0x830] sm:$0xf0]  ;;  %v1804_v11 = vpop.f32.mrf.mxu0  ;;  %v4936_v12 = vor.u32 %v6549_v0, %v4933_v3  ;;  %v6481_v0 = vld [vmem:[%s10245_s2 + $0x2f4] sm:$0xf0]  ;;  %v4315_v31 = vld [vmem:[%s10245_s2 + $0x40] sm:$0xf] }
  0xa1   :  { %2023 = vmatpush.bf16.msra.mxu1 %v5244_v13  ;;  %v5128_v13 = vor.u32 %v6597_v4, %v5125_v5  ;;  %v4864_v4 = vor.u32 %v6531_v51, %v4861_v52  ;;  %v4963_v51 = vld [vmem:[%s10245_s2 + $0x550] sm:$0xf]  ;;  %v6559_v52 = vld [vmem:[%s10245_s2 + $0x564] sm:$0xf0] }
  0xa2   :  { %2036 = vmatpush.bf16.msra.mxu2 %v4288_v14  ;;  %v6495_v14 = vld [vmem:[%s10245_s2 + $0x36c] sm:$0xf] }
  0xa3   :  { %2049 = vmatpush.bf16.msra.mxu3 %v4480_v18  ;;  %2011 = vmatmul.bf16.vlgmr.msra.gmra.mxu0 %v7451_v32  ;;  %v1805_v18 = vadd.f32 %v1804_v11, %v343_v1  ;;  %v4843_v1 = vld [vmem:[%s10245_s2 + $0x460] sm:$0xf] }
  0xa4   :  { %2055 = vmatpush.bf16.msrb.mxu0 %v4840_v19  ;;  %2024 = vmatmul.bf16.vlgmr.msra.gmra.mxu1 %v7459_v35  ;;  %v5320_v19 = vor.u32 %v6645_v6, %v5317_v7  ;;  %v1817_v27 = vpop.f32.mrf.mxu1  ;;  %v5035_v6 = vld [vmem:[%s10245_s2 + $0x5e0] sm:$0xf]  ;;  %v6577_v7 = vld [vmem:[%s10245_s2 + $0x5f4] sm:$0xf0] }
  0xa5   :  { %2068 = vmatpush.bf16.msrb.mxu1 %v5032_v20  ;;  %2037 = vmatmul.bf16.vlgmr.msra.gmra.mxu2 %v7276_v9  ;;  %v4909_v20 = vld [vmem:[%s10245_s2 + $0x500] sm:$0xf0] }
  0xa6   :  { %2081 = vmatpush.bf16.msrb.mxu2 %v5224_v21  ;;  %2050 = vmatmul.bf16.vlgmr.msra.gmra.mxu3 %v7313_v25  ;;  %v6591_v21 = vld [vmem:[%s10245_s2 + $0x66c] sm:$0xf]  ;;  %v4912_v28 = vor.u32 %v6543_v17, %v4909_v20  ;;  %v6427_v17 = vld [vmem:[%s10245_s2 + $0x144] sm:$0xf0]  ;;  %v5036_v20 = vor.u32 %v6577_v7, %v5035_v6  ;;  %v344_v6 = vperm.slane %v8098_v56, 1 }
  0xa7   :  { %2094 = vmatpush.bf16.msrb.mxu3 %v5416_v26  ;;  %v4720_v26 = vor.u32 %v6495_v14, %v4717_v16  ;;  %v5104_v29 = vor.u32 %v6591_v21, %v5101_v22  ;;  %v4435_v16 = vld [vmem:[%s10245_s2 + $0x130] sm:$0xf]  ;;  %v6475_v21 = vld [vmem:[%s10245_s2 + $0x2c4] sm:$0xf0] }
  0xa8   :  { %2056 = vmatpush.bf16.msrb.mxu0 %v4816_v33  ;;  %v6537_v33 = vld [vmem:[%s10245_s2 + $0x4bc] sm:$0xf]  ;;  %v4819_v22 = vld [vmem:[%s10245_s2 + $0x430] sm:$0xf] }
  0xa9   :  { %2069 = vmatpush.bf16.msrb.mxu1 %v5008_v34  ;;  %v1818_v34 = vadd.f32 %v1817_v27, %v1805_v18  ;;  %v1843_v44 = vpop.f32.mrf.mxu3  ;;  %v4627_v18 = vld [vmem:[%s10245_s2 + $0x2b0] sm:$0xf]  ;;  %v4436_v27 = vor.u32 %v6427_v17, %v4435_v16  ;;  %v6451_v17 = vld [vmem:[%s10245_s2 + $0x204] sm:$0xf0] }
  0xaa   :  { %2082 = vmatpush.bf16.msrb.mxu2 %v5200_v36  ;;  %v5296_v36 = vor.u32 %v6639_v23, %v5293_v24  ;;  %v6523_v23 = vld [vmem:[%s10245_s2 + $0x444] sm:$0xf0]  ;;  %v5011_v24 = vld [vmem:[%s10245_s2 + $0x5b0] sm:$0xf] }
  0xab   :  { %2095 = vmatpush.bf16.msrb.mxu3 %v5392_v40  ;;  %v1830_v40 = vpop.f32.mrf.mxu2 }
  0xac   :  { %2057 = vmatpush.bf16.msrb.mxu0 %v4792_v46  ;;  %v1831_v43 = vadd.f32 %v1830_v40, %v1818_v34  ;;  %v6483_v46 = vld [vmem:[%s10245_s2 + $0x30c] sm:$0xf]  ;;  %v1819_v3 = vpop.f32.mrf.mxu1  ;;  %v6565_v40 = vld [vmem:[%s10245_s2 + $0x594] sm:$0xf0] }
  0xad   :  { %2070 = vmatpush.bf16.msrb.mxu1 %v4984_v48  ;;  %v1806_v48 = vpop.f32.mrf.mxu0  ;;  %v4672_v63 = vor.u32 %v6483_v46, %v4669_v47  ;;  %v4579_v46 = vld [vmem:[%s10245_s2 + $0x250] sm:$0xf]  ;;  %v4988_v47 = vor.u32 %v6565_v40, %v4987_v39  ;;  %v4699_v39 = vld [vmem:[%s10245_s2 + $0x340] sm:$0xf]  ;;  %v6493_v40 = vld [vmem:[%s10245_s2 + $0x354] sm:$0xf0] }
  0xae   :  { %2083 = vmatpush.bf16.msrb.mxu2 %v5176_v49  ;;  %v4888_v49 = vor.u32 %v6537_v33, %v4885_v37  ;;  %v8194_v54 = vadd.f32 %v1843_v44, %v1831_v43  ;;  %v4603_v33 = vld [vmem:[%s10245_s2 + $0x280] sm:$0xf]  ;;  %v4387_v44 = vld [vmem:[%s10245_s2 + $0xd0] sm:$0xf]  ;;  %v6463_v48 = vld [vmem:[%s10245_s2 + $0x264] sm:$0xf0] }
  0xaf   :  { %2096 = vmatpush.bf16.msrb.mxu3 %v5368_v53  ;;  %v6579_v53 = vld [vmem:[%s10245_s2 + $0x60c] sm:$0xf]  ;;  %v4795_v37 = vld [vmem:[%s10245_s2 + $0x400] sm:$0xf] }
  0xb0   :  { %2058 = vmatpush.bf16.msrb.mxu0 %v4768_v59  ;;  %v5245_v59 = vld [vmem:[%s10245_s2 + $0x7a0] sm:$0xf0]  ;;  %v5056_v5 = vor.u32 %v6579_v53, %v5053_v57  ;;  %v4796_v43 = vor.u32 %v6517_v38, %v4795_v37  ;;  %v6445_v38 = vld [vmem:[%s10245_s2 + $0x1d4] sm:$0xf0] }
  0xb1   :  { %2071 = vmatpush.bf16.msrb.mxu1 %v4960_v61  ;;  %v6433_v61 = vld [vmem:[%s10245_s2 + $0x174] sm:$0xf0] }
  0xb2   :  { %2084 = vmatpush.bf16.msrb.mxu2 %v5152_v62  ;;  %v4651_v62 = vld [vmem:[%s10245_s2 + $0x2e0] sm:$0xf]  ;;  %v4460_v11 = vor.u32 %v6433_v61, %v4459_v60 }
  0xb3   :  { %2097 = vmatpush.bf16.msrb.mxu3 %v5344_v2  ;;  %v6529_v2 = vld [vmem:[%s10245_s2 + $0x474] sm:$0xf0]  ;;  %v4363_v61 = vld [vmem:[%s10245_s2 + $0xa0] sm:$0xf] }
  0xb4   :  { %2059 = vmatpush.bf16.msrb.mxu0 %v4744_v10  ;;  %v5248_v10 = vor.u32 %v6627_v58, %v5245_v59  ;;  %v4844_v14 = vor.u32 %v6529_v2, %v4843_v1  ;;  %v4580_v59 = vor.u32 %v6463_v48, %v4579_v46  ;;  %v4747_v1 = vld [vmem:[%s10245_s2 + $0x3a0] sm:$0xf]  ;;  %v6505_v2 = vld [vmem:[%s10245_s2 + $0x3b4] sm:$0xf0]  ;;  %v4483_v48 = vld [vmem:[%s10245_s2 + $0x190] sm:$0xf] }
  0xb5   :  { %2072 = vmatpush.bf16.msrb.mxu1 %v4936_v12  ;;  %v1832_v12 = vpop.f32.mrf.mxu2 }
  0xb6   :  { %2085 = vmatpush.bf16.msrb.mxu2 %v5128_v13  ;;  %v4652_v13 = vor.u32 %v6481_v0, %v4651_v62  ;;  %v6409_v62 = vld [vmem:[%s10245_s2 + $0xb4] sm:$0xf0]  ;;  %v4964_v0 = vor.u32 %v6559_v52, %v4963_v51  ;;  %v4339_v12 = vld [vmem:[%s10245_s2 + $0x70] sm:$0xf]  ;;  %v6487_v52 = vld [vmem:[%s10245_s2 + $0x324] sm:$0xf0] }
  0xb7   :  { %2098 = vmatpush.bf16.msrb.mxu3 %v5320_v19  ;;  %v1845_v19 = vpop.f32.mrf.mxu3  ;;  %v4364_v7 = vor.u32 %v6409_v62, %v4363_v61 }
  0xb8   :  { %2060 = vmatpush.bf16.msrb.mxu0 %v4720_v26  ;;  %v6571_v26 = vld [vmem:[%s10245_s2 + $0x5c4] sm:$0xf0] }
  0xb9   :  { %2073 = vmatpush.bf16.msrb.mxu1 %v4912_v28  ;;  %v4628_v28 = vor.u32 %v6475_v21, %v4627_v18  ;;  %v5012_v34 = vor.u32 %v6571_v26, %v5011_v24  ;;  %v4723_v18 = vld [vmem:[%s10245_s2 + $0x370] sm:$0xf]  ;;  %v6499_v19 = vld [vmem:[%s10245_s2 + $0x384] sm:$0xf0] }
  0xba   :  { %2086 = vmatpush.bf16.msrb.mxu2 %v5104_v29  ;;  %v4820_v29 = vor.u32 %v6523_v23, %v4819_v22  ;;  %v4915_v21 = vld [vmem:[%s10245_s2 + $0x4f0] sm:$0xf]  ;;  %v6547_v22 = vld [vmem:[%s10245_s2 + $0x504] sm:$0xf0]  ;;  %v4724_v30 = vor.u32 %v6499_v19, %v4723_v18  ;;  %v6424_v18 = vld [vmem:[%s10245_s2 + $0x134] sm:$0xf] }
  0xbb   :  { %2099 = vmatpush.bf16.msrb.mxu3 %v5296_v36  ;;  %v6469_v36 = vld [vmem:[%s10245_s2 + $0x294] sm:$0xf0]  ;;  %v4916_v37 = vor.u32 %v6547_v22, %v4915_v21  ;;  %v4437_v19 = vld [vmem:[%s10245_s2 + $0x148] sm:$0xf0] }
  0xbc   :  { %2061 = vmatpush.bf16.msrb.mxu0 %v4696_v45  ;;  %v4604_v42 = vor.u32 %v6469_v36, %v4603_v33  ;;  %v6415_v45 = vld [vmem:[%s10245_s2 + $0xe4] sm:$0xf0]  ;;  %v6397_v33 = vld [vmem:[%s10245_s2 + $0x54] sm:$0xf0]  ;;  %v4629_v21 = vld [vmem:[%s10245_s2 + $0x2c8] sm:$0xf0] }
  0xbd   :  { %2074 = vmatpush.bf16.msrb.mxu1 %v4888_v49  ;;  %v4771_v49 = vld [vmem:[%s10245_s2 + $0x3d0] sm:$0xf] }
  0xbe   :  { %2087 = vmatpush.bf16.msrb.mxu2 %v5080_v50  ;;  %v6511_v50 = vld [vmem:[%s10245_s2 + $0x3e4] sm:$0xf0] }
  0xbf   :  { %2100 = vmatpush.bf16.msrb.mxu3 %v5272_v55  ;;  %v4388_v55 = vor.u32 %v6415_v45, %v4387_v44  ;;  %v4772_v60 = vor.u32 %v6511_v50, %v4771_v49  ;;  %v4291_v44 = vld [vmem:[%s10245_s2 + $0x10] sm:$0xf]  ;;  %v6391_v45 = vld [vmem:[%s10245_s2 + $0x24] sm:$0xf0] }
  0xc0   :  { %2062 = vmatpush.bf16.msrb.mxu0 %v4672_v63  ;;  %v1856_v53 = vpop.f32.mrf.mxu0  ;;  %v4555_v63 = vld [vmem:[%s10245_s2 + $0x220] sm:$0xf]  ;;  %v6439_v49 = vld [vmem:[%s10245_s2 + $0x1a4] sm:$0xf0]  ;;  %v4675_v50 = vld [vmem:[%s10245_s2 + $0x310] sm:$0xf]  ;;  %v4292_v62 = vor.u32 %v6391_v45, %v4291_v44 }
  0xc1   :  { %2075 = vmatpush.bf16.msrb.mxu1 %v4864_v4  ;;  %v1857_v57 = vadd.f32 %v1856_v53, %v8194_v54  ;;  %v1869_v58 = vpop.f32.mrf.mxu1  ;;  %v6457_v54 = vld [vmem:[%s10245_s2 + $0x234] sm:$0xf0]  ;;  %v4939_v4 = vld [vmem:[%s10245_s2 + $0x520] sm:$0xf]  ;;  %v4867_v53 = vld [vmem:[%s10245_s2 + $0x490] sm:$0xf] }
  0xc2   :  { %2088 = vmatpush.bf16.msrb.mxu2 %v5056_v5  ;;  %v6553_v5 = vld [vmem:[%s10245_s2 + $0x534] sm:$0xf0]  ;;  %v6655_v45 = vld [vmem:[%s10245_s2 + $0x864] sm:$0xf0] }
  0xc3   :  { %2101 = vmatpush.bf16.msrb.mxu3 %v5248_v10  ;;  %2063 = vmatmul.bf16.vlgmr.msrb.gmra.mxu0 %v7274_v8  ;;  %v8324_v3 = vadd.f32 %v1869_v58, %v1857_v57  ;;  %v4556_v10 = vor.u32 %v6457_v54, %v4555_v63  ;;  %v4940_v16 = vor.u32 %v6553_v5, %v4939_v4  ;;  %v5227_v58 = vld [vmem:[%s10245_s2 + $0x760] sm:$0xf]  ;;  %v6673_v63 = vld [vmem:[%s10245_s2 + $0x8f4] sm:$0xf0]  ;;  %v4461_v54 = vld [vmem:[%s10245_s2 + $0x178] sm:$0xf0] }
  0xc4   :  { %2107 = vmatpush.bf16.msra.mxu0 %v4460_v11  ;;  %2076 = vmatmul.bf16.vlgmr.msrb.gmra.mxu1 %v7290_v15  ;;  %v4748_v11 = vor.u32 %v6505_v2, %v4747_v1  ;;  %v4484_v1 = vor.u32 %v6439_v49, %v4483_v48  ;;  %v4676_v2 = vor.u32 %v6487_v52, %v4675_v50  ;;  %v6478_v4 = vld [vmem:[%s10245_s2 + $0x2e4] sm:$0xf]  ;;  %v4653_v5 = vld [vmem:[%s10245_s2 + $0x2f8] sm:$0xf0]  ;;  %v6460_v48 = vld [vmem:[%s10245_s2 + $0x254] sm:$0xf] }
  0xc5   :  { %2120 = vmatpush.bf16.msra.mxu1 %v4652_v13  ;;  %2089 = vmatmul.bf16.vlgmr.msrb.gmra.mxu2 %v7451_v32  ;;  %v6403_v13 = vld [vmem:[%s10245_s2 + $0x84] sm:$0xf0]  ;;  %v4581_v49 = vld [vmem:[%s10245_s2 + $0x268] sm:$0xf0] }
  0xc6   :  { %2133 = vmatpush.bf16.msra.mxu2 %v4844_v14  ;;  %2102 = vmatmul.bf16.vlgmr.msrb.gmra.mxu3 %v7459_v35  ;;  %v4531_v14 = vld [vmem:[%s10245_s2 + $0x1f0] sm:$0xf] }
  0xc7   :  { %2146 = vmatpush.bf16.msra.mxu3 %v5036_v20 }
  0xc8   :  { %2108 = vmatpush.bf16.msra.mxu0 %v4436_v27  ;;  %v1882_v20 = vpop.f32.mrf.mxu2  ;;  %v1858_v26 = vpop.f32.mrf.mxu0  ;;  %v4340_v27 = vor.u32 %v6403_v13, %v4339_v12  ;;  %v5203_v12 = vld [vmem:[%s10245_s2 + $0x730] sm:$0xf]  ;;  %v6619_v13 = vld [vmem:[%s10245_s2 + $0x744] sm:$0xf0] }
  0xc9   :  { %2121 = vmatpush.bf16.msra.mxu1 %v4628_v28  ;;  %v1883_v23 = vadd.f32 %v1882_v20, %v344_v6  ;;  %v1895_v24 = vpop.f32.mrf.mxu3  ;;  %v1871_v28 = vpop.f32.mrf.mxu1  ;;  %v6472_v20 = vld [vmem:[%s10245_s2 + $0x2b4] sm:$0xf]  ;;  %v5204_v22 = vor.u32 %v6619_v13, %v5203_v12  ;;  %v5179_v26 = vld [vmem:[%s10245_s2 + $0x700] sm:$0xf]  ;;  %v6643_v13 = vld [vmem:[%s10245_s2 + $0x804] sm:$0xf0] }
  0xca   :  { %2134 = vmatpush.bf16.msra.mxu2 %v4820_v29  ;;  %v4532_v29 = vor.u32 %v6451_v17, %v4531_v14  ;;  %v5395_v14 = vld [vmem:[%s10245_s2 + $0x8b0] sm:$0xf]  ;;  %v6667_v17 = vld [vmem:[%s10245_s2 + $0x8c4] sm:$0xf0]  ;;  %v5371_v28 = vld [vmem:[%s10245_s2 + $0x880] sm:$0xf] }
  0xcb   :  { %2147 = vmatpush.bf16.msra.mxu3 %v5012_v34  ;;  %v4507_v34 = vld [vmem:[%s10245_s2 + $0x1c0] sm:$0xf]  ;;  %v8366_v36 = vadd.f32 %v1895_v24, %v1883_v23  ;;  %v5396_v23 = vor.u32 %v6667_v17, %v5395_v14  ;;  %v4440_v24 = vor.u32 %v6424_v18, %v4437_v19  ;;  %v6400_v14 = vld [vmem:[%s10245_s2 + $0x74] sm:$0xf] }
  0xcc   :  { %2109 = vmatpush.bf16.msra.mxu0 %v4412_v41  ;;  %v4891_v41 = vld [vmem:[%s10245_s2 + $0x4c0] sm:$0xf]  ;;  %v4508_v46 = vor.u32 %v6445_v38, %v4507_v34  ;;  %v6466_v34 = vld [vmem:[%s10245_s2 + $0x284] sm:$0xf]  ;;  %v6448_v19 = vld [vmem:[%s10245_s2 + $0x1f4] sm:$0xf] }
  0xcd   :  { %2122 = vmatpush.bf16.msra.mxu1 %v4604_v42  ;;  %v6541_v42 = vld [vmem:[%s10245_s2 + $0x4d4] sm:$0xf0] }
  0xce   :  { %2135 = vmatpush.bf16.msra.mxu2 %v4796_v43  ;;  %v4316_v43 = vor.u32 %v6397_v33, %v4315_v31  ;;  %v4892_v51 = vor.u32 %v6541_v42, %v4891_v41  ;;  %v6418_v31 = vld [vmem:[%s10245_s2 + $0x104] sm:$0xf]  ;;  %v4413_v33 = vld [vmem:[%s10245_s2 + $0x118] sm:$0xf0]  ;;  %v5155_v41 = vld [vmem:[%s10245_s2 + $0x6d0] sm:$0xf] }
  0xcf   :  { %2148 = vmatpush.bf16.msra.mxu3 %v4988_v47  ;;  %v4700_v47 = vor.u32 %v6493_v40, %v4699_v39  ;;  %v4416_v40 = vor.u32 %v6418_v31, %v4413_v33  ;;  %v6607_v42 = vld [vmem:[%s10245_s2 + $0x6e4] sm:$0xf0]  ;;  %v6637_v33 = vld [vmem:[%s10245_s2 + $0x7d4] sm:$0xf0] }
  0xd0   :  { %2110 = vmatpush.bf16.msra.mxu0 %v4388_v55  ;;  %v6535_v55 = vld [vmem:[%s10245_s2 + $0x4a4] sm:$0xf0]  ;;  %v1884_v57 = vpop.f32.mrf.mxu2  ;;  %v5156_v50 = vor.u32 %v6607_v42, %v5155_v41  ;;  %v5059_v41 = vld [vmem:[%s10245_s2 + $0x610] sm:$0xf] }
  0xd1   :  { %2123 = vmatpush.bf16.msra.mxu1 %v4580_v59  ;;  %v6625_v59 = vld [vmem:[%s10245_s2 + $0x774] sm:$0xf0]  ;;  %v1897_v61 = vpop.f32.mrf.mxu3  ;;  %v4868_v6 = vor.u32 %v6535_v55, %v4867_v53  ;;  %v5131_v55 = vld [vmem:[%s10245_s2 + $0x6a0] sm:$0xf]  ;;  %v6583_v42 = vld [vmem:[%s10245_s2 + $0x624] sm:$0xf0] }
  0xd2   :  { %2136 = vmatpush.bf16.msra.mxu2 %v4772_v60  ;;  %v5419_v60 = vld [vmem:[%s10245_s2 + $0x8e0] sm:$0xf]  ;;  %v6601_v57 = vld [vmem:[%s10245_s2 + $0x6b4] sm:$0xf0]  ;;  %v4584_v61 = vor.u32 %v6460_v48, %v4581_v49 }
  0xd3   :  { %2149 = vmatpush.bf16.msra.mxu3 %v4964_v0  ;;  %v6430_v0 = vld [vmem:[%s10245_s2 + $0x164] sm:$0xf] }
  0xd4   :  { %2111 = vmatpush.bf16.msra.mxu0 %v4364_v7  ;;  %v5228_v7 = vor.u32 %v6625_v59, %v5227_v58  ;;  %v5323_v58 = vld [vmem:[%s10245_s2 + $0x820] sm:$0xf] }
  0xd5   :  { %2124 = vmatpush.bf16.msra.mxu1 %v4556_v10  ;;  %v5420_v10 = vor.u32 %v6673_v63, %v5419_v60  ;;  %v6406_v63 = vld [vmem:[%s10245_s2 + $0xa4] sm:$0xf] }
  0xd6   :  { %2137 = vmatpush.bf16.msra.mxu2 %v4748_v11  ;;  %v4464_v11 = vor.u32 %v6430_v0, %v4461_v54  ;;  %v4365_v0 = vld [vmem:[%s10245_s2 + $0xb8] sm:$0xf0]  ;;  %v6454_v54 = vld [vmem:[%s10245_s2 + $0x224] sm:$0xf] }
  0xd7   :  { %2150 = vmatpush.bf16.msra.mxu3 %v4940_v16  ;;  %v4656_v16 = vor.u32 %v6478_v4, %v4653_v5  ;;  %v4368_v5 = vor.u32 %v6406_v63, %v4365_v0 }
  0xd8   :  { %2112 = vmatpush.bf16.msra.mxu0 %v4340_v27  ;;  %v6613_v27 = vld [vmem:[%s10245_s2 + $0x714] sm:$0xf0] }
  0xd9   :  { %2125 = vmatpush.bf16.msra.mxu1 %v4532_v29  ;;  %v4632_v29 = vor.u32 %v6472_v20, %v4629_v21  ;;  %v5180_v38 = vor.u32 %v6613_v27, %v5179_v26  ;;  %v4533_v20 = vld [vmem:[%s10245_s2 + $0x208] sm:$0xf0]  ;;  %v5083_v27 = vld [vmem:[%s10245_s2 + $0x640] sm:$0xf] }
  0xda   :  { %2138 = vmatpush.bf16.msra.mxu2 %v4724_v30  ;;  %v6661_v30 = vld [vmem:[%s10245_s2 + $0x894] sm:$0xf0]  ;;  %v4536_v31 = vor.u32 %v6448_v19, %v4533_v20 }
  0xdb   :  { %2151 = vmatpush.bf16.msra.mxu3 %v4916_v37  ;;  %v4605_v37 = vld [vmem:[%s10245_s2 + $0x298] sm:$0xf0]  ;;  %v5372_v39 = vor.u32 %v6661_v30, %v5371_v28  ;;  %v6589_v28 = vld [vmem:[%s10245_s2 + $0x654] sm:$0xf0] }
  0xdc   :  { %2113 = vmatpush.bf16.msra.mxu0 %v4316_v43  ;;  %v5347_v43 = vld [vmem:[%s10245_s2 + $0x850] sm:$0xf]  ;;  %v4608_v44 = vor.u32 %v6466_v34, %v4605_v37  ;;  %v6394_v34 = vld [vmem:[%s10245_s2 + $0x44] sm:$0xf]  ;;  %v4317_v37 = vld [vmem:[%s10245_s2 + $0x58] sm:$0xf0] }
  0xdd   :  { %2126 = vmatpush.bf16.msra.mxu1 %v4508_v46  ;;  %v6412_v46 = vld [vmem:[%s10245_s2 + $0xd4] sm:$0xf]  ;;  %v5348_v52 = vor.u32 %v6655_v45, %v5347_v43  ;;  %v5251_v45 = vld [vmem:[%s10245_s2 + $0x790] sm:$0xf] }
  0xde   :  { %2139 = vmatpush.bf16.msra.mxu2 %v4700_v47  ;;  %v4389_v47 = vld [vmem:[%s10245_s2 + $0xe8] sm:$0xf0] }
  0xdf   :  { %2152 = vmatpush.bf16.msra.mxu3 %v4892_v51  ;;  %v4392_v53 = vor.u32 %v6412_v46, %v4389_v47  ;;  %v6631_v46 = vld [vmem:[%s10245_s2 + $0x7a4] sm:$0xf0]  ;;  %v6388_v47 = vld [vmem:[%s10245_s2 + $0x14] sm:$0xf] }
  0xe0   :  { %2114 = vmatpush.bf16.msra.mxu0 %v4292_v62  ;;  %v1908_v51 = vpop.f32.mrf.mxu0  ;;  %v6649_v62 = vld [vmem:[%s10245_s2 + $0x834] sm:$0xf0]  ;;  %v5252_v63 = vor.u32 %v6631_v46, %v5251_v45 }
  0xe1   :  { %2127 = vmatpush.bf16.msra.mxu1 %v4484_v1  ;;  %v1909_v59 = vadd.f32 %v1908_v51, %v8366_v36  ;;  %v1921_v60 = vpop.f32.mrf.mxu1  ;;  %v4557_v36 = vld [vmem:[%s10245_s2 + $0x238] sm:$0xf0]  ;;  %v5324_v4 = vor.u32 %v6649_v62, %v5323_v58  ;;  %v6436_v51 = vld [vmem:[%s10245_s2 + $0x194] sm:$0xf]  ;;  %v6574_v58 = vld [vmem:[%s10245_s2 + $0x5e4] sm:$0xf] }
  0xe2   :  { %2140 = vmatpush.bf16.msra.mxu2 %v4676_v2  ;;  %v5132_v2 = vor.u32 %v6601_v57, %v5131_v55  ;;  %v4560_v12 = vor.u32 %v6454_v54, %v4557_v36  ;;  %v6526_v55 = vld [vmem:[%s10245_s2 + $0x464] sm:$0xf]  ;;  %v4845_v57 = vld [vmem:[%s10245_s2 + $0x478] sm:$0xf0] }
  0xe3   :  { %2153 = vmatpush.bf16.msra.mxu3 %v4868_v6  ;;  %2115 = vmatmul.bf16.vlgmr.msra.gmra.mxu0 %v7276_v9  ;;  %v1922_v1 = vadd.f32 %v1921_v60, %v1909_v59  ;;  %v5107_v6 = vld [vmem:[%s10245_s2 + $0x670] sm:$0xf]  ;;  %v5060_v59 = vor.u32 %v6583_v42, %v5059_v41  ;;  %v5037_v60 = vld [vmem:[%s10245_s2 + $0x5f8] sm:$0xf0]  ;;  %v6670_v54 = vld [vmem:[%s10245_s2 + $0x8e4] sm:$0xf] }
  0xe4   :  { %2159 = vmatpush.bf16.msrb.mxu0 %v5228_v7  ;;  %2128 = vmatmul.bf16.vlgmr.msra.gmra.mxu1 %v7313_v25  ;;  %v6595_v7 = vld [vmem:[%s10245_s2 + $0x684] sm:$0xf0]  ;;  %v5229_v62 = vld [vmem:[%s10245_s2 + $0x778] sm:$0xf0]  ;;  %v6604_v41 = vld [vmem:[%s10245_s2 + $0x6d4] sm:$0xf] }
  0xe5   :  { %2172 = vmatpush.bf16.msrb.mxu1 %v5420_v10  ;;  %2141 = vmatmul.bf16.vlgmr.msra.gmra.mxu2 %v7274_v8  ;;  %v5299_v10 = vld [vmem:[%s10245_s2 + $0x7f0] sm:$0xf]  ;;  %v5108_v21 = vor.u32 %v6595_v7, %v5107_v6  ;;  %v5421_v36 = vld [vmem:[%s10245_s2 + $0x8f8] sm:$0xf0]  ;;  %v6520_v6 = vld [vmem:[%s10245_s2 + $0x434] sm:$0xf] }
  0xe6   :  { %2185 = vmatpush.bf16.msrb.mxu2 %v4464_v11  ;;  %2154 = vmatmul.bf16.vlgmr.msra.gmra.mxu3 %v7290_v15  ;;  %v4821_v7 = vld [vmem:[%s10245_s2 + $0x448] sm:$0xf0] }
  0xe7   :  { %2198 = vmatpush.bf16.msrb.mxu3 %v4656_v16  ;;  %v4341_v16 = vld [vmem:[%s10245_s2 + $0x88] sm:$0xf0] }
  0xe8   :  { %2160 = vmatpush.bf16.msrb.mxu0 %v5204_v22  ;;  %v1934_v11 = vpop.f32.mrf.mxu2  ;;  %v4344_v26 = vor.u32 %v6400_v14, %v4341_v16  ;;  %v5205_v14 = vld [vmem:[%s10245_s2 + $0x748] sm:$0xf0]  ;;  %v6664_v16 = vld [vmem:[%s10245_s2 + $0x8b4] sm:$0xf] }
  0xe9   :  { %2173 = vmatpush.bf16.msrb.mxu1 %v5396_v23  ;;  %v1935_v17 = vadd.f32 %v1934_v11, %v1922_v1  ;;  %v1947_v18 = vpop.f32.mrf.mxu3  ;;  %v1910_v23 = vpop.f32.mrf.mxu0  ;;  %v5424_v11 = vor.u32 %v6670_v54, %v5421_v36  ;;  %v5157_v42 = vld [vmem:[%s10245_s2 + $0x6e8] sm:$0xf0]  ;;  %v6544_v36 = vld [vmem:[%s10245_s2 + $0x4f4] sm:$0xf] }
  0xea   :  { %2186 = vmatpush.bf16.msrb.mxu2 %v4440_v24  ;;  %v5300_v24 = vor.u32 %v6643_v13, %v5299_v10  ;;  %v1923_v30 = vpop.f32.mrf.mxu1  ;;  %v6568_v10 = vld [vmem:[%s10245_s2 + $0x5b4] sm:$0xf]  ;;  %v4797_v23 = vld [vmem:[%s10245_s2 + $0x418] sm:$0xf0]  ;;  %v4725_v54 = vld [vmem:[%s10245_s2 + $0x388] sm:$0xf0] }
  0xeb   :  { %2199 = vmatpush.bf16.msrb.mxu3 %v4632_v29  ;;  %v8556_v22 = vadd.f32 %v1947_v18, %v1935_v17  ;;  %v5275_v29 = vld [vmem:[%s10245_s2 + $0x7c0] sm:$0xf]  ;;  %v6616_v13 = vld [vmem:[%s10245_s2 + $0x734] sm:$0xf]  ;;  %v5397_v17 = vld [vmem:[%s10245_s2 + $0x8c8] sm:$0xf0]  ;;  %v4824_v18 = vor.u32 %v6520_v6, %v4821_v7 }
  0xec   :  { %2161 = vmatpush.bf16.msrb.mxu0 %v5180_v38  ;;  %v6442_v38 = vld [vmem:[%s10245_s2 + $0x1c4] sm:$0xf]  ;;  %v5276_v43 = vor.u32 %v6637_v33, %v5275_v29  ;;  %v5208_v20 = vor.u32 %v6616_v13, %v5205_v14  ;;  %v5181_v29 = vld [vmem:[%s10245_s2 + $0x718] sm:$0xf0]  ;;  %v6640_v7 = vld [vmem:[%s10245_s2 + $0x7f4] sm:$0xf] }
  0xed   :  { %2174 = vmatpush.bf16.msrb.mxu1 %v5372_v39  ;;  %v4509_v39 = vld [vmem:[%s10245_s2 + $0x1d8] sm:$0xf0]  ;;  %v6658_v30 = vld [vmem:[%s10245_s2 + $0x884] sm:$0xf] }
  0xee   :  { %2187 = vmatpush.bf16.msrb.mxu2 %v4416_v40  ;;  %v5084_v40 = vor.u32 %v6589_v28, %v5083_v27  ;;  %v4512_v49 = vor.u32 %v6442_v38, %v4509_v39  ;;  %v4989_v27 = vld [vmem:[%s10245_s2 + $0x598] sm:$0xf0]  ;;  %v6610_v28 = vld [vmem:[%s10245_s2 + $0x704] sm:$0xf]  ;;  %v4773_v38 = vld [vmem:[%s10245_s2 + $0x3e8] sm:$0xf0] }
  0xef   :  { %2200 = vmatpush.bf16.msrb.mxu3 %v4608_v44  ;;  %v4320_v44 = vor.u32 %v6394_v34, %v4317_v37  ;;  %v5184_v37 = vor.u32 %v6610_v28, %v5181_v29  ;;  %v6556_v39 = vld [vmem:[%s10245_s2 + $0x554] sm:$0xf]  ;;  %v5277_v28 = vld [vmem:[%s10245_s2 + $0x7d8] sm:$0xf0] }
  0xf0   :  { %2162 = vmatpush.bf16.msrb.mxu0 %v5156_v50  ;;  %v1936_v48 = vpop.f32.mrf.mxu2  ;;  %v4293_v50 = vld [vmem:[%s10245_s2 + $0x28] sm:$0xf0] }
  0xf1   :  { %2175 = vmatpush.bf16.msrb.mxu1 %v5348_v52  ;;  %v4485_v52 = vld [vmem:[%s10245_s2 + $0x1a8] sm:$0xf0]  ;;  %v4296_v0 = vor.u32 %v6388_v47, %v4293_v50  ;;  %v6502_v50 = vld [vmem:[%s10245_s2 + $0x3a4] sm:$0xf] }
  0xf2   :  { %2188 = vmatpush.bf16.msrb.mxu2 %v4392_v53  ;;  %v1949_v53 = vpop.f32.mrf.mxu3  ;;  %v4488_v1 = vor.u32 %v6436_v51, %v4485_v52  ;;  %v4749_v51 = vld [vmem:[%s10245_s2 + $0x3b8] sm:$0xf0]  ;;  %v6550_v52 = vld [vmem:[%s10245_s2 + $0x524] sm:$0xf] }
  0xf3   :  { %2201 = vmatpush.bf16.msrb.mxu3 %v4584_v61  ;;  %v6622_v61 = vld [vmem:[%s10245_s2 + $0x764] sm:$0xf] }
  0xf4   :  { %2163 = vmatpush.bf16.msrb.mxu0 %v5132_v2  ;;  %v4848_v2 = vor.u32 %v6526_v55, %v4845_v57  ;;  %v4941_v55 = vld [vmem:[%s10245_s2 + $0x538] sm:$0xf0]  ;;  %v6598_v57 = vld [vmem:[%s10245_s2 + $0x6a4] sm:$0xf] }
  0xf5   :  { %2176 = vmatpush.bf16.msrb.mxu1 %v5324_v4  ;;  %v5040_v4 = vor.u32 %v6574_v58, %v5037_v60  ;;  %v5133_v58 = vld [vmem:[%s10245_s2 + $0x6b8] sm:$0xf0] }
  0xf6   :  { %2189 = vmatpush.bf16.msrb.mxu2 %v4368_v5  ;;  %v5232_v5 = vor.u32 %v6622_v61, %v5229_v62  ;;  %v5325_v60 = vld [vmem:[%s10245_s2 + $0x838] sm:$0xf0]  ;;  %v4752_v61 = vor.u32 %v6502_v50, %v4749_v51  ;;  %v4944_v62 = vor.u32 %v6550_v52, %v4941_v55  ;;  %v6736_v50 = vld [vmem:[%s10248_s4 + $0x1ec] sm:$0xf0]  ;;  %v5795_v51 = vld [vmem:[%s10248_s4 + $0x2e0] sm:$0xf] }
  0xf7   :  { %2202 = vmatpush.bf16.msrb.mxu3 %v4560_v12  ;;  %v5013_v12 = vld [vmem:[%s10245_s2 + $0x5c8] sm:$0xf0]  ;;  %v6768_v52 = vld [vmem:[%s10248_s4 + $0x2ec] sm:$0xf0] }
  0xf8   :  { %2164 = vmatpush.bf16.msrb.mxu0 %v5108_v21  ;;  %v5016_v19 = vor.u32 %v6568_v10, %v5013_v12  ;;  %v6514_v21 = vld [vmem:[%s10245_s2 + $0x404] sm:$0xf]  ;;  %v5301_v10 = vld [vmem:[%s10245_s2 + $0x808] sm:$0xf0] }
  0xf9   :  { %2177 = vmatpush.bf16.msrb.mxu1 %v5300_v24  ;;  %v6562_v24 = vld [vmem:[%s10245_s2 + $0x584] sm:$0xf]  ;;  %v4800_v33 = vor.u32 %v6514_v21, %v4797_v23  ;;  %v5304_v21 = vor.u32 %v6640_v7, %v5301_v10  ;;  %v4893_v23 = vld [vmem:[%s10245_s2 + $0x4d8] sm:$0xf0]  ;;  %v5507_v7 = vld [vmem:[%s10248_s4 + $0xa0] sm:$0xf] }
  0xfa   :  { %2190 = vmatpush.bf16.msrb.mxu2 %v4344_v26  ;;  %v5400_v26 = vor.u32 %v6664_v16, %v5397_v17  ;;  %v4992_v34 = vor.u32 %v6562_v24, %v4989_v27  ;;  %v6586_v24 = vld [vmem:[%s10245_s2 + $0x644] sm:$0xf]  ;;  %v6696_v10 = vld [vmem:[%s10248_s4 + $0xac] sm:$0xf0] }
  0xfb   :  { %2203 = vmatpush.bf16.msrb.mxu3 %v4536_v31  ;;  %v5373_v31 = vld [vmem:[%s10245_s2 + $0x898] sm:$0xf0]  ;;  %v6634_v27 = vld [vmem:[%s10245_s2 + $0x7c4] sm:$0xf] }
  0xfc   :  { %2165 = vmatpush.bf16.msrb.mxu0 %v5084_v40  ;;  %v5376_v40 = vor.u32 %v6658_v30, %v5373_v31  ;;  %v6484_v30 = vld [vmem:[%s10245_s2 + $0x314] sm:$0xf]  ;;  %v4677_v31 = vld [vmem:[%s10245_s2 + $0x328] sm:$0xf0] }
  0xfd   :  { %2178 = vmatpush.bf16.msrb.mxu1 %v5276_v43  ;;  %v6652_v43 = vld [vmem:[%s10245_s2 + $0x854] sm:$0xf] }
  0xfe   :  { %2191 = vmatpush.bf16.msrb.mxu2 %v4320_v44  ;;  %v5349_v44 = vld [vmem:[%s10245_s2 + $0x868] sm:$0xf0] }
  0xff   :  { %2204 = vmatpush.bf16.msrb.mxu3 %v4512_v49  ;;  %v5160_v49 = vor.u32 %v6604_v41, %v5157_v42  ;;  %v5352_v53 = vor.u32 %v6652_v43, %v5349_v44  ;;  %v6628_v41 = vld [vmem:[%s10245_s2 + $0x794] sm:$0xf]  ;;  %v5253_v42 = vld [vmem:[%s10245_s2 + $0x7a8] sm:$0xf0]  ;;  %v5539_v44 = vld [vmem:[%s10248_s4 + $0xe0] sm:$0xf] }
 0x100   :  { %2166 = vmatpush.bf16.msrb.mxu0 %v5060_v59  ;;  %v8706_v45 = vpop.f32.mrf.mxu0  ;;  %v6646_v59 = vld [vmem:[%s10245_s2 + $0x824] sm:$0xf] }
 0x101   :  { %2179 = vmatpush.bf16.msrb.mxu1 %v5252_v63  ;;  %v8708_v47 = vpop.f32.mrf.mxu1  ;;  %v5136_v63 = vor.u32 %v6598_v57, %v5133_v58  ;;  %v5256_v58 = vor.u32 %v6628_v41, %v5253_v42  ;;  %v5875_v41 = vld [vmem:[%s10248_s4 + $0x380] sm:$0xf]  ;;  %v6788_v42 = vld [vmem:[%s10248_s4 + $0x38c] sm:$0xf0] }
 0x102   :  { %2192 = vmatpush.bf16.msrb.mxu2 %v4296_v0  ;;  %v6496_v0 = vld [vmem:[%s10245_s2 + $0x374] sm:$0xf] }
 0x103   :  { %2205 = vmatpush.bf16.msrb.mxu3 %v4488_v1  ;;  %2167 = vmatmul.bf16.vlgmr.msrb.gmra.mxu0 %v7451_v32  ;;  %v5328_v1 = vor.u32 %v6646_v59, %v5325_v60  ;;  %v4728_v13 = vor.u32 %v6496_v0, %v4725_v54  ;;  %v5523_v60 = vld [vmem:[%s10248_s4 + $0xc0] sm:$0xf]  ;;  %v6800_v54 = vld [vmem:[%s10248_s4 + $0x3ec] sm:$0xf0] }
 0x104   :  { %2211 = vmatpush.bf16.msra.mxu0 %v4848_v2  ;;  %2180 = vmatmul.bf16.vlgmr.msrb.gmra.mxu1 %v7459_v35  ;;  %v4917_v2 = vld [vmem:[%s10245_s2 + $0x508] sm:$0xf0]  ;;  %v5651_v0 = vld [vmem:[%s10248_s4 + $0x1c0] sm:$0xf] }
 0x105   :  { %2224 = vmatpush.bf16.msra.mxu1 %v5040_v4  ;;  %2193 = vmatmul.bf16.vlgmr.msrb.gmra.mxu2 %v7276_v9  ;;  %v6508_v9 = vld [vmem:[%s10245_s2 + $0x3d4] sm:$0xf]  ;;  %v4920_v16 = vor.u32 %v6544_v36, %v4917_v2  ;;  %v6732_v36 = vld [vmem:[%s10248_s4 + $0x1cc] sm:$0xf0] }
 0x106   :  { %2237 = vmatpush.bf16.msra.mxu2 %v5232_v5  ;;  %2206 = vmatmul.bf16.vlgmr.msrb.gmra.mxu3 %v7313_v25  ;;  %v4965_v25 = vld [vmem:[%s10245_s2 + $0x568] sm:$0xf0]  ;;  %v4776_v46 = vor.u32 %v6508_v9, %v4773_v38  ;;  %v6592_v4 = vld [vmem:[%s10245_s2 + $0x674] sm:$0xf]  ;;  %v6764_v2 = vld [vmem:[%s10248_s4 + $0x2cc] sm:$0xf0] }
 0x107   :  { %2250 = vmatpush.bf16.msra.mxu3 %v5424_v11  ;;  %v4968_v48 = vor.u32 %v6556_v39, %v4965_v25  ;;  %v5109_v5 = vld [vmem:[%s10245_s2 + $0x688] sm:$0xf0]  ;;  %v6580_v38 = vld [vmem:[%s10245_s2 + $0x614] sm:$0xf]  ;;  %v345_v39 = vperm.slane %v8098_v56, 2 }
 0x108   :  { %2212 = vmatpush.bf16.msra.mxu0 %v4824_v18  ;;  %v8752_v6 = vpop.f32.mrf.mxu2  ;;  %v1962_v11 = vpop.f32.mrf.mxu0  ;;  %v5112_v17 = vor.u32 %v6592_v4, %v5109_v5  ;;  %v6490_v18 = vld [vmem:[%s10245_s2 + $0x344] sm:$0xf]  ;;  %v4869_v9 = vld [vmem:[%s10245_s2 + $0x4a8] sm:$0xf0]  ;;  %v6704_v56 = vld [vmem:[%s10248_s4 + $0xec] sm:$0xf0] }
 0x109   :  { %2225 = vmatpush.bf16.msra.mxu1 %v5016_v19  ;;  %v8760_v12 = vpop.f32.mrf.mxu3  ;;  %v1975_v14 = vpop.f32.mrf.mxu1  ;;  %v4701_v19 = vld [vmem:[%s10245_s2 + $0x358] sm:$0xf0]  ;;  %v5061_v25 = vld [vmem:[%s10245_s2 + $0x628] sm:$0xf0]  ;;  %v1961_v57 = vadd.f32 %v8706_v45, %v345_v39  ;;  %v5540_v59 = vor.u32 %v6704_v56, %v5539_v44  ;;  %v5923_v45 = vld [vmem:[%s10248_s4 + $0x3e0] sm:$0xf] }
 0x10a   :  { %2238 = vmatpush.bf16.msra.mxu2 %v5208_v20  ;;  %v6538_v20 = vld [vmem:[%s10245_s2 + $0x4c4] sm:$0xf]  ;;  %v4704_v29 = vor.u32 %v6490_v18, %v4701_v19  ;;  %v5064_v55 = vor.u32 %v6580_v38, %v5061_v25  ;;  %v5924_v11 = vor.u32 %v6800_v54, %v5923_v45  ;;  %v6728_v18 = vld [vmem:[%s10248_s4 + $0x1ac] sm:$0xf0]  ;;  %v5763_v19 = vld [vmem:[%s10248_s4 + $0x2a0] sm:$0xf] }
 0x10b   :  { %2251 = vmatpush.bf16.msra.mxu3 %v5400_v26  ;;  %v5085_v26 = vld [vmem:[%s10245_s2 + $0x658] sm:$0xf0]  ;;  %v1974_v4 = vadd.f32 %v8708_v47, %v1961_v57  ;;  %v5635_v47 = vld [vmem:[%s10248_s4 + $0x1a0] sm:$0xf]  ;;  %v6752_v56 = vld [vmem:[%s10248_s4 + $0x26c] sm:$0xf0] }
 0x10c   :  { %2213 = vmatpush.bf16.msra.mxu0 %v4800_v33  ;;  %v6532_v33 = vld [vmem:[%s10245_s2 + $0x494] sm:$0xf]  ;;  %v5731_v44 = vld [vmem:[%s10248_s4 + $0x260] sm:$0xf] }
 0x10d   :  { %2226 = vmatpush.bf16.msra.mxu1 %v4992_v34  ;;  %v4896_v34 = vor.u32 %v6538_v20, %v4893_v23  ;;  %v6760_v20 = vld [vmem:[%s10248_s4 + $0x2ac] sm:$0xf0]  ;;  %v5859_v57 = vld [vmem:[%s10248_s4 + $0x360] sm:$0xf] }
 0x10e   :  { %2239 = vmatpush.bf16.msra.mxu2 %v5184_v37  ;;  %v5088_v37 = vor.u32 %v6586_v24, %v5085_v26  ;;  %v6692_v23 = vld [vmem:[%s10248_s4 + $0x8c] sm:$0xf0]  ;;  %v5636_v26 = vor.u32 %v6728_v18, %v5635_v47  ;;  %v5699_v47 = vld [vmem:[%s10248_s4 + $0x220] sm:$0xf] }
 0x10f   :  { %2252 = vmatpush.bf16.msra.mxu3 %v5376_v40  ;;  %v5280_v40 = vor.u32 %v6634_v27, %v5277_v28  ;;  %v6792_v27 = vld [vmem:[%s10248_s4 + $0x3ac] sm:$0xf0]  ;;  %v5427_v18 = vld [vmem:[%s10248_s4] sm:$0xf] }
 0x110   :  { %2214 = vmatpush.bf16.msra.mxu0 %v4776_v46  ;;  %v1988_v43 = vpop.f32.mrf.mxu2  ;;  %v5667_v46 = vld [vmem:[%s10248_s4 + $0x1e0] sm:$0xf]  ;;  %v6724_v28 = vld [vmem:[%s10248_s4 + $0x18c] sm:$0xf0] }
 0x111   :  { %2227 = vmatpush.bf16.msra.mxu1 %v4968_v48  ;;  %v2001_v48 = vpop.f32.mrf.mxu3  ;;  %v6720_v43 = vld [vmem:[%s10248_s4 + $0x16c] sm:$0xf0] }
 0x112   :  { %2240 = vmatpush.bf16.msra.mxu2 %v5160_v49  ;;  %v4680_v49 = vor.u32 %v6484_v30, %v4677_v31  ;;  %v6756_v30 = vld [vmem:[%s10248_s4 + $0x28c] sm:$0xf0] }
 0x113   :  { %2253 = vmatpush.bf16.msra.mxu3 %v5352_v53  ;;  %v4872_v53 = vor.u32 %v6532_v33, %v4869_v9  ;;  %v6688_v9 = vld [vmem:[%s10248_s4 + $0x6c] sm:$0xf0] }
 0x114   :  { %2215 = vmatpush.bf16.msra.mxu0 %v4752_v61  ;;  %v6700_v61 = vld [vmem:[%s10248_s4 + $0xcc] sm:$0xf0] }
 0x115   :  { %2228 = vmatpush.bf16.msra.mxu1 %v4944_v62  ;;  %v5668_v62 = vor.u32 %v6736_v50, %v5667_v46  ;;  %v5524_v5 = vor.u32 %v6700_v61, %v5523_v60  ;;  %v6684_v50 = vld [vmem:[%s10248_s4 + $0x4c] sm:$0xf0]  ;;  %v5715_v60 = vld [vmem:[%s10248_s4 + $0x240] sm:$0xf] }
 0x116   :  { %2241 = vmatpush.bf16.msra.mxu2 %v5136_v63  ;;  %v5796_v63 = vor.u32 %v6768_v52, %v5795_v51  ;;  %v5876_v51 = vor.u32 %v6788_v42, %v5875_v41  ;;  %v6748_v61 = vld [vmem:[%s10248_s4 + $0x24c] sm:$0xf0] }
 0x117   :  { %2254 = vmatpush.bf16.msra.mxu3 %v5328_v1  ;;  %v5779_v1 = vld [vmem:[%s10248_s4 + $0x2c0] sm:$0xf]  ;;  %v6772_v41 = vld [vmem:[%s10248_s4 + $0x30c] sm:$0xf0] }
 0x118   :  { %2216 = vmatpush.bf16.msra.mxu0 %v4728_v13  ;;  %v5652_v13 = vor.u32 %v6732_v36, %v5651_v0  ;;  %v5780_v14 = vor.u32 %v6764_v2, %v5779_v1  ;;  %v5443_v36 = vld [vmem:[%s10248_s4 + $0x20] sm:$0xf]  ;;  %v6680_v1 = vld [vmem:[%s10248_s4 + $0x2c] sm:$0xf0] }
 0x119   :  { %2229 = vmatpush.bf16.msra.mxu1 %v4920_v16  ;;  %v5907_v16 = vld [vmem:[%s10248_s4 + $0x3c0] sm:$0xf] }
 0x11a   :  { %2242 = vmatpush.bf16.msra.mxu2 %v5112_v17  ;;  %v6796_v17 = vld [vmem:[%s10248_s4 + $0x3cc] sm:$0xf0] }
 0x11b   :  { %2255 = vmatpush.bf16.msra.mxu3 %v5304_v21  ;;  %v5491_v21 = vld [vmem:[%s10248_s4 + $0x80] sm:$0xf]  ;;  %v5908_v24 = vor.u32 %v6796_v17, %v5907_v16  ;;  %v6744_v16 = vld [vmem:[%s10248_s4 + $0x22c] sm:$0xf0]  ;;  %v5444_v17 = vor.u32 %v6680_v1, %v5443_v36  ;;  %v6690_v1 = vld [vmem:[%s10248_s4 + $0x84] sm:$0xf] }
 0x11c   :  { %2217 = vmatpush.bf16.msra.mxu0 %v4704_v29  ;;  %v5747_v29 = vld [vmem:[%s10248_s4 + $0x280] sm:$0xf] }
 0x11d   :  { %2230 = vmatpush.bf16.msra.mxu1 %v4896_v34  ;;  %v5492_v34 = vor.u32 %v6692_v23, %v5491_v21  ;;  %v5748_v25 = vor.u32 %v6756_v30, %v5747_v29  ;;  %v6708_v21 = vld [vmem:[%s10248_s4 + $0x10c] sm:$0xf0]  ;;  %v5827_v23 = vld [vmem:[%s10248_s4 + $0x320] sm:$0xf] }
 0x11e   :  { %2243 = vmatpush.bf16.msra.mxu2 %v5088_v37  ;;  %v5475_v37 = vld [vmem:[%s10248_s4 + $0x60] sm:$0xf]  ;;  %v6832_v29 = vld [vmem:[%s10248_s4 + $0x4ec] sm:$0xf0] }
 0x11f   :  { %2256 = vmatpush.bf16.msra.mxu3 %v5280_v40  ;;  %v5476_v48 = vor.u32 %v6688_v9, %v5475_v37  ;;  %v9026_v9 = vld [vmem:[%s10247_s3] sm:$0x3f] }
 0x120   :  { %2218 = vmatpush.bf16.msra.mxu0 %v4680_v49  ;;  %v2012_v33 = vpop.f32.mrf.mxu0  ;;  %v5459_v49 = vld [vmem:[%s10248_s4 + $0x40] sm:$0xf] }
 0x121   :  { %2231 = vmatpush.bf16.msra.mxu1 %v4872_v53  ;;  %v2025_v38 = vpop.f32.mrf.mxu1  ;;  %v5732_v53 = vor.u32 %v6752_v56, %v5731_v44  ;;  %v5460_v54 = vor.u32 %v6684_v50, %v5459_v49  ;;  %v5525_v44 = vld [vmem:[%s10248_s4 + $0xd0] sm:$0xf0]  ;;  %v6734_v56 = vld [vmem:[%s10248_s4 + $0x1e4] sm:$0xf]  ;;  %v6035_v49 = vld [vmem:[%s10248_s4 + $0x4c0] sm:$0xf] }
 0x122   :  { %2244 = vmatpush.bf16.msra.mxu2 %v5064_v55  ;;  %v5587_v55 = vld [vmem:[%s10248_s4 + $0x140] sm:$0xf]  ;;  %v6828_v50 = vld [vmem:[%s10248_s4 + $0x4cc] sm:$0xf0] }
 0x123   :  { %2257 = vmatpush.bf16.msra.mxu3 %v5256_v58  ;;  %2219 = vmatmul.bf16.vlgmr.msra.gmra.mxu0 %v7274_v8  ;;  %v1987_v8 = vadd.f32 %v8752_v6, %v1974_v4  ;;  %v5891_v6 = vld [vmem:[%s10248_s4 + $0x3a0] sm:$0xf]  ;;  %v6784_v58 = vld [vmem:[%s10248_s4 + $0x36c] sm:$0xf0] }
 0x124   :  { %3437 = vmatpush.bf16.msrb.mxu0 %v5540_v59  ;;  %2232 = vmatmul.bf16.vlgmr.msra.gmra.mxu1 %v7290_v15  ;;  %v5508_v15 = vor.u32 %v6696_v10, %v5507_v7  ;;  %v5892_v39 = vor.u32 %v6792_v27, %v5891_v6  ;;  %v6716_v59 = vld [vmem:[%s10248_s4 + $0x14c] sm:$0xf0]  ;;  %v5860_v2 = vor.u32 %v6784_v58, %v5859_v57  ;;  %v5571_v10 = vld [vmem:[%s10248_s4 + $0x120] sm:$0xf]  ;;  %v5541_v6 = vld [vmem:[%s10248_s4 + $0xf0] sm:$0xf0] }
 0x125   :  { %3450 = vmatpush.bf16.msrb.mxu1 %v5668_v62  ;;  %2245 = vmatmul.bf16.vlgmr.msra.gmra.mxu2 %v7451_v32  ;;  %v5764_v32 = vor.u32 %v6760_v20, %v5763_v19  ;;  %v2000_v31 = vadd.f32 %v8760_v12, %v1987_v8  ;;  %v5603_v12 = vld [vmem:[%s10248_s4 + $0x160] sm:$0xf]  ;;  %v5716_v7 = vor.u32 %v6748_v61, %v5715_v60  ;;  %v6676_v19 = vld [vmem:[%s10248_s4 + $0xc] sm:$0xf0]  ;;  %v6694_v57 = vld [vmem:[%s10248_s4 + $0xa4] sm:$0xf] }
 0x126   :  { %3463 = vmatpush.bf16.msrb.mxu2 %v5796_v63  ;;  %2258 = vmatmul.bf16.vlgmr.msra.gmra.mxu3 %v7459_v35  ;;  %v5619_v35 = vld [vmem:[%s10248_s4 + $0x180] sm:$0xf]  ;;  %v5604_v52 = vor.u32 %v6720_v43, %v5603_v12  ;;  %v5428_v30 = vor.u32 %v6676_v19, %v5427_v18  ;;  %v5509_v60 = vld [vmem:[%s10248_s4 + $0xb0] sm:$0xf0]  ;;  %v6730_v61 = vld [vmem:[%s10248_s4 + $0x1c4] sm:$0xf] }
 0x127   :  { %3476 = vmatpush.bf16.msrb.mxu3 %v5924_v11  ;;  %v5620_v40 = vor.u32 %v6724_v28, %v5619_v35  ;;  %v2013_v46 = vadd.f32 %v2012_v33, %v2000_v31  ;;  %v5843_v11 = vld [vmem:[%s10248_s4 + $0x340] sm:$0xf]  ;;  %v5512_v36 = vor.u32 %v6694_v57, %v5509_v60  ;;  %v6830_v57 = vld [vmem:[%s10248_s4 + $0x4e4] sm:$0xf] }
 0x128   :  { %3438 = vmatpush.bf16.msrb.mxu0 %v5524_v5  ;;  %v8957_v62 = vpop.f32.mrf.mxu2  ;;  %v2014_v45 = vpop.f32.mrf.mxu0  ;;  %v5588_v5 = vor.u32 %v6716_v59, %v5587_v55  ;;  %v5555_v20 = vld [vmem:[%s10248_s4 + $0x100] sm:$0xf] }
 0x129   :  { %3451 = vmatpush.bf16.msrb.mxu1 %v5652_v13  ;;  %v2026_v63 = vadd.f32 %v2025_v38, %v2013_v46  ;;  %v8959_v0 = vpop.f32.mrf.mxu3  ;;  %v2027_v4 = vpop.f32.mrf.mxu1  ;;  %v6780_v13 = vld [vmem:[%s10248_s4 + $0x34c] sm:$0xf0]  ;;  %v6051_v28 = vld [vmem:[%s10248_s4 + $0x4e0] sm:$0xf]  ;;  %v346_v38 = vperm.slane %v9026_v9, 3  ;;  %v6036_v45 = vor.u32 %v6828_v50, %v6035_v49 }
 0x12a   :  { %3464 = vmatpush.bf16.msrb.mxu2 %v5780_v14  ;;  %v6712_v14 = vld [vmem:[%s10248_s4 + $0x12c] sm:$0xf0]  ;;  %v5844_v8 = vor.u32 %v6780_v13, %v5843_v11  ;;  %v5811_v12 = vld [vmem:[%s10248_s4 + $0x300] sm:$0xf]  ;;  %v6052_v42 = vor.u32 %v6832_v29, %v6051_v28  ;;  %v5669_v46 = vld [vmem:[%s10248_s4 + $0x1f0] sm:$0xf0] }
 0x12b   :  { %3477 = vmatpush.bf16.msrb.mxu3 %v5908_v24  ;;  %6917 = vtanh.f32 %v2026_v63  ;;  %v6776_v24 = vld [vmem:[%s10248_s4 + $0x32c] sm:$0xf0]  ;;  %v5672_v58 = vor.u32 %v6734_v56, %v5669_v46  ;;  %v2039_v59 = vadd.f32 %v8957_v62, %v346_v38  ;;  %v5653_v63 = vld [vmem:[%s10248_s4 + $0x1d0] sm:$0xf0]  ;;  %v6019_v62 = vld [vmem:[%s10248_s4 + $0x4a0] sm:$0xf] }
 0x12c   :  { %3439 = vmatpush.bf16.msrb.mxu0 %v5508_v15  ;;  %6919 = vtanh.f32 %v8324_v3  ;;  %v5572_v3 = vor.u32 %v6712_v14, %v5571_v10  ;;  %v5700_v15 = vor.u32 %v6744_v16, %v5699_v47  ;;  %v5828_v31 = vor.u32 %v6776_v24, %v5827_v23  ;;  %v5637_v10 = vld [vmem:[%s10248_s4 + $0x1b0] sm:$0xf0]  ;;  %v6003_v13 = vld [vmem:[%s10248_s4 + $0x480] sm:$0xf]  ;;  %v6686_v16 = vld [vmem:[%s10248_s4 + $0x64] sm:$0xf] }
 0x12d   :  { %3452 = vmatpush.bf16.msrb.mxu1 %v5636_v26  ;;  %6921 = vtanh.f32 %v8556_v22  ;;  %v5683_v22 = vld [vmem:[%s10248_s4 + $0x200] sm:$0xf]  ;;  %v6740_v26 = vld [vmem:[%s10248_s4 + $0x20c] sm:$0xf0]  ;;  %v2052_v4 = vadd.f32 %v8959_v0, %v2039_v59  ;;  %v5605_v28 = vld [vmem:[%s10248_s4 + $0x170] sm:$0xf0] }
 0x12e   :  { %3465 = vmatpush.bf16.msrb.mxu2 %v5764_v32  ;;  %v6702_v32 = vld [vmem:[%s10248_s4 + $0xe4] sm:$0xf]  ;;  %v5684_v37 = vor.u32 %v6740_v26, %v5683_v22  ;;  %v6820_v0 = vld [vmem:[%s10248_s4 + $0x48c] sm:$0xf0]  ;;  %v5955_v56 = vld [vmem:[%s10248_s4 + $0x420] sm:$0xf] }
 0x12f   :  { %3478 = vmatpush.bf16.msrb.mxu3 %v5892_v39  ;;  %v6816_v23 = vld [vmem:[%s10248_s4 + $0x46c] sm:$0xf0]  ;;  %v6682_v26 = vld [vmem:[%s10248_s4 + $0x44] sm:$0xf]  ;;  %v5573_v59 = vld [vmem:[%s10248_s4 + $0x130] sm:$0xf0] }
 0x130   :  { %3440 = vmatpush.bf16.msrb.mxu0 %v5492_v34  ;;  %v2040_v35 = vpop.f32.mrf.mxu2  ;;  %v5556_v34 = vor.u32 %v6708_v21, %v5555_v20  ;;  %v5477_v20 = vld [vmem:[%s10248_s4 + $0x70] sm:$0xf0]  ;;  %v5987_v21 = vld [vmem:[%s10248_s4 + $0x460] sm:$0xf]  ;;  %v6808_v46 = vld [vmem:[%s10248_s4 + $0x42c] sm:$0xf0] }
 0x131   :  { %3453 = vmatpush.bf16.msrb.mxu1 %v5620_v40  ;;  %v2053_v27 = vpop.f32.mrf.mxu3  ;;  %v6918_v33 = vpop.eup %6917  ;;  %v5544_v40 = vor.u32 %v6702_v32, %v5541_v6  ;;  %v5480_v22 = vor.u32 %v6686_v16, %v5477_v20  ;;  %v5461_v6 = vld [vmem:[%s10248_s4 + $0x50] sm:$0xf0]  ;;  %v5988_v29 = vor.u32 %v6816_v23, %v5987_v21  ;;  %v6674_v50 = vld [vmem:[%s10248_s4 + $0x4] sm:$0xf]  ;;  %v6864_v16 = vld [vmem:[%s10248_s4 + $0x5ec] sm:$0xf0] }
 0x132   :  { %3466 = vmatpush.bf16.msrb.mxu2 %v5748_v25  ;;  %v6920_v39 = vpop.eup %6919  ;;  %v6698_v25 = vld [vmem:[%s10248_s4 + $0xc4] sm:$0xf]  ;;  %v5464_v38 = vor.u32 %v6682_v26, %v5461_v6  ;;  %v6163_v26 = vld [vmem:[%s10248_s4 + $0x5c0] sm:$0xf] }
 0x133   :  { %3479 = vmatpush.bf16.msrb.mxu3 %v5876_v51  ;;  %v6922_v43 = vpop.eup %6921  ;;  %v9055_v51 = vpack.c.bf16 %v6920_v39, %v6920_v39  ;;  %v5528_v55 = vor.u32 %v6698_v25, %v5525_v44  ;;  %v6718_v27 = vld [vmem:[%s10248_s4 + $0x164] sm:$0xf] }
 0x134   :  { %3441 = vmatpush.bf16.msrb.mxu0 %v5476_v48  ;;  %v9047_v48 = vpack.c.bf16 %v6918_v33, %v6918_v33  ;;  %v5971_v33 = vld [vmem:[%s10248_s4 + $0x440] sm:$0xf]  ;;  %v6678_v39 = vld [vmem:[%s10248_s4 + $0x24] sm:$0xf] }
 0x135   :  { %3454 = vmatpush.bf16.msrb.mxu1 %v5604_v52  ;;  %v5812_v52 = vor.u32 %v6772_v41, %v5811_v12  ;;  %v5445_v12 = vld [vmem:[%s10248_s4 + $0x30] sm:$0xf0]  ;;  %v6714_v41 = vld [vmem:[%s10248_s4 + $0x144] sm:$0xf] }
 0x136   :  { %3467 = vmatpush.bf16.msrb.mxu2 %v5732_v53  ;;  %v9057_v53 = vpack.c.bf16 %v6922_v43, %v6922_v43  ;;  %v5448_v49 = vor.u32 %v6678_v39, %v5445_v12  ;;  %v6862_v20 = vld [vmem:[%s10248_s4 + $0x5e4] sm:$0xf]  ;;  %v6856_v39 = vld [vmem:[%s10248_s4 + $0x5ac] sm:$0xf0] }
 0x137   :  { %3480 = vmatpush.bf16.msrb.mxu3 %v5860_v2  ;;  %v5656_v2 = vor.u32 %v6730_v61, %v5653_v63  ;;  %v5956_v61 = vor.u32 %v6808_v46, %v5955_v56  ;;  %v6053_v63 = vld [vmem:[%s10248_s4 + $0x4f0] sm:$0xf0]  ;;  %v6814_v46 = vld [vmem:[%s10248_s4 + $0x464] sm:$0xf] }
 0x138   :  { %3442 = vmatpush.bf16.msrb.mxu0 %v5460_v54  ;;  %v6824_v54 = vld [vmem:[%s10248_s4 + $0x4ac] sm:$0xf0] }
 0x139   :  { %3455 = vmatpush.bf16.msrb.mxu1 %v5588_v5  ;;  %v5493_v5 = vld [vmem:[%s10248_s4 + $0x90] sm:$0xf0]  ;;  %v6020_v11 = vor.u32 %v6824_v54, %v6019_v62  ;;  %v5939_v62 = vld [vmem:[%s10248_s4 + $0x400] sm:$0xf]  ;;  %v6804_v54 = vld [vmem:[%s10248_s4 + $0x40c] sm:$0xf0] }
 0x13a   :  { %3468 = vmatpush.bf16.msrb.mxu2 %v5716_v7  ;;  %v6726_v7 = vld [vmem:[%s10248_s4 + $0x1a4] sm:$0xf]  ;;  %v5496_v14 = vor.u32 %v6690_v1, %v5493_v5  ;;  %v5797_v1 = vld [vmem:[%s10248_s4 + $0x2f0] sm:$0xf0] }
 0x13b   :  { %3481 = vmatpush.bf16.msrb.mxu3 %v5844_v8  ;;  %v6722_v8 = vld [vmem:[%s10248_s4 + $0x184] sm:$0xf] }
 0x13c   :  { %3443 = vmatpush.bf16.msrb.mxu0 %v5444_v17  ;;  %v5640_v17 = vor.u32 %v6726_v7, %v5637_v10  ;;  %v6826_v5 = vld [vmem:[%s10248_s4 + $0x4c4] sm:$0xf] }
 0x13d   :  { %3456 = vmatpush.bf16.msrb.mxu1 %v5572_v3  ;;  %v5621_v3 = vld [vmem:[%s10248_s4 + $0x190] sm:$0xf0]  ;;  %v6706_v10 = vld [vmem:[%s10248_s4 + $0x104] sm:$0xf] }
 0x13e   :  { %3469 = vmatpush.bf16.msrb.mxu2 %v5700_v15  ;;  %v6004_v15 = vor.u32 %v6820_v0, %v6003_v13  ;;  %v5624_v32 = vor.u32 %v6722_v8, %v5621_v3  ;;  %v6056_v13 = vor.u32 %v6830_v57, %v6053_v63  ;;  %v5557_v0 = vld [vmem:[%s10248_s4 + $0x110] sm:$0xf0]  ;;  %v6762_v3 = vld [vmem:[%s10248_s4 + $0x2c4] sm:$0xf] }
 0x13f   :  { %3482 = vmatpush.bf16.msrb.mxu3 %v5828_v31  ;;  %v6181_v8 = vld [vmem:[%s10248_s4 + $0x5f0] sm:$0xf0]  ;;  %v5560_v21 = vor.u32 %v6706_v10, %v5557_v0 }
 0x140   :  { %3444 = vmatpush.bf16.msrb.mxu0 %v5428_v30  ;;  %v2064_v47 = vpop.f32.mrf.mxu0  ;;  %v5989_v57 = vld [vmem:[%s10248_s4 + $0x470] sm:$0xf0] }
 0x141   :  { %3457 = vmatpush.bf16.msrb.mxu1 %v5556_v34  ;;  %v2065_v18 = vadd.f32 %v2064_v47, %v2052_v4  ;;  %v2077_v19 = vpop.f32.mrf.mxu1  ;;  %v6812_v34 = vld [vmem:[%s10248_s4 + $0x44c] sm:$0xf0]  ;;  %v6179_v47 = vld [vmem:[%s10248_s4 + $0x5e0] sm:$0xf]  ;;  %v6133_v63 = vld [vmem:[%s10248_s4 + $0x590] sm:$0xf0] }
 0x142   :  { %3470 = vmatpush.bf16.msrb.mxu2 %v5684_v37  ;;  %v5972_v44 = vor.u32 %v6812_v34, %v5971_v33  ;;  %v6818_v34 = vld [vmem:[%s10248_s4 + $0x484] sm:$0xf]  ;;  %v6117_v0 = vld [vmem:[%s10248_s4 + $0x570] sm:$0xf0] }
 0x143   :  { %3445 = vmatmul.bf16.vlgmr.msrb.gmra.mxu0 %v9055_v51  ;;  %3483 = vmatpush.bf16.msrb.mxu3 %v5812_v52  ;;  %v2078_v24 = vadd.f32 %v2077_v19, %v2065_v18  ;;  %v5429_v52 = vld [vmem:[%s10248_s4 + $0x10] sm:$0xf0]  ;;  %v6180_v19 = vor.u32 %v6864_v16, %v6179_v47 }
 0x144   :  { %3489 = vmatpush.bf16.msra.mxu0 %v6052_v42  ;;  %3458 = vmatmul.bf16.vlgmr.msrb.gmra.mxu1 %v9057_v53  ;;  %v5589_v42 = vld [vmem:[%s10248_s4 + $0x150] sm:$0xf0]  ;;  %v5432_v4 = vor.u32 %v6674_v50, %v5429_v52  ;;  %v6131_v52 = vld [vmem:[%s10248_s4 + $0x580] sm:$0xf] }
 0x145   :  { %3471 = vmatmul.bf16.vlgmr.msrb.gmra.mxu2 %v9047_v48  ;;  %3502 = vmatpush.bf16.msra.mxu1 %v6180_v19  ;;  %v5717_v47 = vld [vmem:[%s10248_s4 + $0x250] sm:$0xf0] }
 0x146   :  { %3515 = vmatpush.bf16.msra.mxu2 %v5544_v40  ;;  %v5608_v40 = vor.u32 %v6718_v27, %v5605_v28  ;;  %v6858_v28 = vld [vmem:[%s10248_s4 + $0x5c4] sm:$0xf] }
 0x147   :  { %3528 = vmatpush.bf16.msra.mxu3 %v5672_v58  ;;  %v6710_v58 = vld [vmem:[%s10248_s4 + $0x124] sm:$0xf] }
 0x148   :  { %3490 = vmatpush.bf16.msra.mxu0 %v6036_v45  ;;  %v2090_v35 = vpop.f32.mrf.mxu2  ;;  %v2066_v25 = vpop.f32.mrf.mxu0  ;;  %v5576_v7 = vor.u32 %v6710_v58, %v5573_v59 }
 0x149   :  { %v2091_v30 = vadd.f32 %v2090_v35, %v2078_v24  ;;  %v2103_v31 = vpop.f32.mrf.mxu3  ;;  %v2079_v43 = vpop.f32.mrf.mxu1  ;;  %v6822_v24 = vld [vmem:[%s10248_s4 + $0x4a4] sm:$0xf]  ;;  %v6021_v35 = vld [vmem:[%s10248_s4 + $0x4b0] sm:$0xf0] }
 0x14a   :  { %3516 = vmatpush.bf16.msra.mxu2 %v5528_v55  ;;  %v5592_v55 = vor.u32 %v6714_v41, %v5589_v42  ;;  %v6024_v33 = vor.u32 %v6822_v24, %v6021_v35  ;;  %v6854_v41 = vld [vmem:[%s10248_s4 + $0x5a4] sm:$0xf]  ;;  %v6149_v42 = vld [vmem:[%s10248_s4 + $0x5b0] sm:$0xf0] }
 0x14b   :  { %3529 = vmatpush.bf16.msra.mxu3 %v5656_v2  ;;  %v2104_v37 = vadd.f32 %v2103_v31, %v2091_v30  ;;  %v6758_v30 = vld [vmem:[%s10248_s4 + $0x2a4] sm:$0xf]  ;;  %v5765_v31 = vld [vmem:[%s10248_s4 + $0x2b0] sm:$0xf0]  ;;  %v6152_v50 = vor.u32 %v6854_v41, %v6149_v42 }
 0x14c   :  { %3491 = vmatpush.bf16.msra.mxu0 %v6020_v11  ;;  %v5768_v25 = vor.u32 %v6758_v30, %v5765_v31  ;;  %v6754_v43 = vld [vmem:[%s10248_s4 + $0x284] sm:$0xf]  ;;  %v5941_v30 = vld [vmem:[%s10248_s4 + $0x410] sm:$0xf0] }
 0x14d   :  { %6923 = vtanh.f32 %v2104_v37  ;;  %v6742_v35 = vld [vmem:[%s10248_s4 + $0x224] sm:$0xf]  ;;  %v5685_v42 = vld [vmem:[%s10248_s4 + $0x210] sm:$0xf0] }
 0x14e   :  { %3517 = vmatpush.bf16.msra.mxu2 %v5512_v36  ;;  %v6766_v36 = vld [vmem:[%s10248_s4 + $0x2e4] sm:$0xf] }
 0x14f   :  { %3530 = vmatpush.bf16.msra.mxu3 %v5640_v17  ;;  %v6037_v17 = vld [vmem:[%s10248_s4 + $0x4d0] sm:$0xf0]  ;;  %v5800_v18 = vor.u32 %v6766_v36, %v5797_v1  ;;  %v6810_v36 = vld [vmem:[%s10248_s4 + $0x444] sm:$0xf] }
 0x150   :  { %3492 = vmatpush.bf16.msra.mxu0 %v6004_v15  ;;  %v2092_v60 = vpop.f32.mrf.mxu2  ;;  %v5781_v15 = vld [vmem:[%s10248_s4 + $0x2d0] sm:$0xf0]  ;;  %v6040_v23 = vor.u32 %v6826_v5, %v6037_v17  ;;  %v6738_v41 = vld [vmem:[%s10248_s4 + $0x204] sm:$0xf] }
 0x151   :  { %v2105_v45 = vpop.f32.mrf.mxu3  ;;  %v5784_v6 = vor.u32 %v6762_v3, %v5781_v15  ;;  %v5973_v5 = vld [vmem:[%s10248_s4 + $0x450] sm:$0xf0]  ;;  %v6099_v3 = vld [vmem:[%s10248_s4 + $0x540] sm:$0xf]  ;;  %v6844_v15 = vld [vmem:[%s10248_s4 + $0x54c] sm:$0xf0] }
 0x152   :  { %3518 = vmatpush.bf16.msra.mxu2 %v5496_v14  ;;  %v5940_v14 = vor.u32 %v6804_v54, %v5939_v62  ;;  %v6750_v45 = vld [vmem:[%s10248_s4 + $0x264] sm:$0xf]  ;;  %v5733_v62 = vld [vmem:[%s10248_s4 + $0x270] sm:$0xf0]  ;;  %v5992_v54 = vor.u32 %v6814_v46, %v5989_v57  ;;  %v5976_v17 = vor.u32 %v6810_v36, %v5973_v5  ;;  %v5787_v46 = vld [vmem:[%s10248_s4 + $0x2c8] sm:$0xf] }
 0x153   :  { %3531 = vmatpush.bf16.msra.mxu3 %v5624_v32  ;;  %v6924_v2 = vpop.eup %6923  ;;  %v6860_v32 = vld [vmem:[%s10248_s4 + $0x5cc] sm:$0xf0]  ;;  %v6067_v57 = vld [vmem:[%s10248_s4 + $0x500] sm:$0xf]  ;;  %v5931_v36 = vld [vmem:[%s10248_s4 + $0x3e8] sm:$0xf] }
 0x154   :  { %3493 = vmatpush.bf16.msra.mxu0 %v5988_v29  ;;  %v9190_v11 = vpack.c.bf16 %v6924_v2, %v6924_v2  ;;  %v6164_v27 = vor.u32 %v6860_v32, %v6163_v26  ;;  %v6165_v29 = vld [vmem:[%s10248_s4 + $0x5d0] sm:$0xf0]  ;;  %v6115_v2 = vld [vmem:[%s10248_s4 + $0x560] sm:$0xf]  ;;  %v6842_v26 = vld [vmem:[%s10248_s4 + $0x544] sm:$0xf] }
 0x155   :  { %v6168_v37 = vor.u32 %v6858_v28, %v6165_v29  ;;  %v6101_v32 = vld [vmem:[%s10248_s4 + $0x550] sm:$0xf0]  ;;  %v6802_v28 = vld [vmem:[%s10248_s4 + $0x404] sm:$0xf] }
 0x156   :  { %3519 = vmatpush.bf16.msra.mxu2 %v5480_v22  ;;  %3484 = vmatmul.bf16.vlgmr.msrb.gmra.mxu3 %v9190_v11  ;;  %v6184_v22 = vor.u32 %v6862_v20, %v6181_v8  ;;  %v6104_v31 = vor.u32 %v6842_v26, %v6101_v32 }
 0x157   :  { %3532 = vmatpush.bf16.msra.mxu3 %v5608_v40  ;;  %v6005_v40 = vld [vmem:[%s10248_s4 + $0x490] sm:$0xf0]  ;;  %3503 = vmatpush.bf16.msra.mxu1 %v6164_v27  ;;  %v347_v27 = vperm.slane %v9026_v9, 4 }
 0x158   :  { %3494 = vmatpush.bf16.msra.mxu0 %v5972_v44  ;;  %v5749_v44 = vld [vmem:[%s10248_s4 + $0x290] sm:$0xf0]  ;;  %v6008_v56 = vor.u32 %v6818_v34, %v6005_v40  ;;  %v6840_v34 = vld [vmem:[%s10248_s4 + $0x52c] sm:$0xf0]  ;;  %v6838_v40 = vld [vmem:[%s10248_s4 + $0x524] sm:$0xf] }
 0x159   :  { %v5752_v59 = vor.u32 %v6754_v43, %v5749_v44 }
 0x15a   :  { %3520 = vmatpush.bf16.msra.mxu2 %v5464_v38  ;;  %v6147_v38 = vld [vmem:[%s10248_s4 + $0x5a0] sm:$0xf] }
 0x15b   :  { %3533 = vmatpush.bf16.msra.mxu3 %v5592_v55  ;;  %v6148_v12 = vor.u32 %v6856_v39, %v6147_v38  ;;  %v6852_v55 = vld [vmem:[%s10248_s4 + $0x58c] sm:$0xf0] }
 0x15c   :  { %3495 = vmatpush.bf16.msra.mxu0 %v5956_v61  ;;  %v6132_v60 = vor.u32 %v6852_v55, %v6131_v52  ;;  %v6850_v61 = vld [vmem:[%s10248_s4 + $0x584] sm:$0xf] }
 0x15d   :  { %3504 = vmatpush.bf16.msra.mxu1 %v6148_v12  ;;  %v6136_v1 = vor.u32 %v6850_v61, %v6133_v63  ;;  %v6769_v12 = vld [vmem:[%s10248_s4 + $0x2f4] sm:$0xf0]  ;;  %v6834_v61 = vld [vmem:[%s10248_s4 + $0x504] sm:$0xf]  ;;  %v6069_v63 = vld [vmem:[%s10248_s4 + $0x510] sm:$0xf0] }
 0x15e   :  { %3521 = vmatpush.bf16.msra.mxu2 %v5448_v49  ;;  %v6072_v5 = vor.u32 %v6834_v61, %v6069_v63  ;;  %v6745_v63 = vld [vmem:[%s10248_s4 + $0x234] sm:$0xf0] }
 0x15f   :  { %3534 = vmatpush.bf16.msra.mxu3 %v5576_v7  ;;  %v5736_v7 = vor.u32 %v6750_v45, %v5733_v62  ;;  %v6798_v45 = vld [vmem:[%s10248_s4 + $0x3e4] sm:$0xf] }
 0x160   :  { %3496 = vmatpush.bf16.msra.mxu0 %v5940_v14  ;;  %v9269_v49 = vpop.f32.mrf.mxu0  ;;  %v6746_v14 = vld [vmem:[%s10248_s4 + $0x244] sm:$0xf] }
 0x161   :  { %v9280_v58 = vpop.f32.mrf.mxu1  ;;  %3505 = vmatpush.bf16.msra.mxu1 %v6132_v60  ;;  %v5720_v24 = vor.u32 %v6746_v14, %v5717_v47  ;;  %v2117_v43 = vadd.f32 %v9269_v49, %v347_v27  ;;  %v6836_v49 = vld [vmem:[%s10248_s4 + $0x50c] sm:$0xf0]  ;;  %v5688_v60 = vor.u32 %v6738_v41, %v5685_v42  ;;  %v6761_v14 = vld [vmem:[%s10248_s4 + $0x2b4] sm:$0xf0]  ;;  %v5915_v47 = vld [vmem:[%s10248_s4 + $0x3c8] sm:$0xf] }
 0x162   :  { %3522 = vmatpush.bf16.msra.mxu2 %v5432_v4  ;;  %v6848_v4 = vld [vmem:[%s10248_s4 + $0x56c] sm:$0xf0]  ;;  %v6068_v62 = vor.u32 %v6836_v49, %v6067_v57  ;;  %v6782_v41 = vld [vmem:[%s10248_s4 + $0x364] sm:$0xf]  ;;  %v5861_v42 = vld [vmem:[%s10248_s4 + $0x370] sm:$0xf0] }
 0x163   :  { %3535 = vmatpush.bf16.msra.mxu3 %v5560_v21  ;;  %v6116_v10 = vor.u32 %v6848_v4, %v6115_v2  ;;  %v5957_v21 = vld [vmem:[%s10248_s4 + $0x430] sm:$0xf0]  ;;  %v2130_v2 = vadd.f32 %v9280_v58, %v2117_v43  ;;  %v6749_v43 = vld [vmem:[%s10248_s4 + $0x254] sm:$0xf0]  ;;  %v6778_v49 = vld [vmem:[%s10248_s4 + $0x344] sm:$0xf] }
 0x164   :  { %3541 = vmatpush.bf16.msrb.mxu0 %v5800_v18  ;;  %v6806_v18 = vld [vmem:[%s10248_s4 + $0x424] sm:$0xf]  ;;  %v5909_v58 = vld [vmem:[%s10248_s4 + $0x3d0] sm:$0xf0] }
 0x165   :  { %3523 = vmatmul.bf16.vlgmr.msra.gmra.mxu2 %v9055_v51  ;;  %3506 = vmatpush.bf16.msra.mxu1 %v6116_v10  ;;  %v5960_v29 = vor.u32 %v6806_v18, %v5957_v21  ;;  %v5771_v10 = vld [vmem:[%s10248_s4 + $0x2a8] sm:$0xf]  ;;  %v6790_v21 = vld [vmem:[%s10248_s4 + $0x3a4] sm:$0xf] }
 0x166   :  { %3567 = vmatpush.bf16.msrb.mxu2 %v6056_v13  ;;  %v6846_v13 = vld [vmem:[%s10248_s4 + $0x564] sm:$0xf]  ;;  %3536 = vmatmul.bf16.vlgmr.msra.gmra.mxu3 %v9057_v53 }
 0x167   :  { %3580 = vmatpush.bf16.msrb.mxu3 %v6184_v22  ;;  %v6120_v8 = vor.u32 %v6846_v13, %v6117_v0  ;;  %v6100_v22 = vor.u32 %v6844_v15, %v6099_v3  ;;  %v6794_v0 = vld [vmem:[%s10248_s4 + $0x3c4] sm:$0xf]  ;;  %v5755_v3 = vld [vmem:[%s10248_s4 + $0x288] sm:$0xf] }
 0x168   :  { %3542 = vmatpush.bf16.msrb.mxu0 %v5784_v6  ;;  %v9319_v16 = vpop.f32.mrf.mxu2  ;;  %v2118_v19 = vpop.f32.mrf.mxu0  ;;  %v5701_v6 = vld [vmem:[%s10248_s4 + $0x230] sm:$0xf0] }
 0x169   :  { %v9324_v20 = vpop.f32.mrf.mxu3  ;;  %v5704_v38 = vor.u32 %v6742_v35, %v5701_v6  ;;  %3507 = vmatpush.bf16.msra.mxu1 %v6100_v22  ;;  %v2143_v18 = vadd.f32 %v9319_v16, %v2130_v2  ;;  %v5912_v19 = vor.u32 %v6794_v0, %v5909_v58  ;;  %v6757_v16 = vld [vmem:[%s10248_s4 + $0x294] sm:$0xf0]  ;;  %v5739_v6 = vld [vmem:[%s10248_s4 + $0x268] sm:$0xf]  ;;  %v6774_v0 = vld [vmem:[%s10248_s4 + $0x324] sm:$0xf] }
 0x16a   :  { %3568 = vmatpush.bf16.msrb.mxu2 %v6040_v23  ;;  %v2131_v23 = vpop.f32.mrf.mxu1  ;;  %v6793_v22 = vld [vmem:[%s10248_s4 + $0x3b4] sm:$0xf0]  ;;  %v5756_v35 = vor.u32 %v6757_v16, %v5755_v3  ;;  %v5829_v58 = vld [vmem:[%s10248_s4 + $0x330] sm:$0xf0] }
 0x16b   :  { %3581 = vmatpush.bf16.msrb.mxu3 %v6168_v37  ;;  %v5803_v37 = vld [vmem:[%s10248_s4 + $0x2e8] sm:$0xf]  ;;  %v5893_v23 = vld [vmem:[%s10248_s4 + $0x3b0] sm:$0xf0]  ;;  %v2156_v26 = vadd.f32 %v9324_v20, %v2143_v18  ;;  %v6753_v20 = vld [vmem:[%s10248_s4 + $0x274] sm:$0xf0]  ;;  %v5832_v3 = vor.u32 %v6774_v0, %v5829_v58 }
 0x16c   :  { %3543 = vmatpush.bf16.msrb.mxu0 %v5768_v25  ;;  %v6085_v25 = vld [vmem:[%s10248_s4 + $0x530] sm:$0xf0]  ;;  %v5896_v32 = vor.u32 %v6790_v21, %v5893_v23  ;;  %v6781_v2 = vld [vmem:[%s10248_s4 + $0x354] sm:$0xf0]  ;;  %v6703_v18 = vld [vmem:[%s10248_s4 + $0xec] sm:$0xf] }
 0x16d   :  { %v6088_v55 = vor.u32 %v6838_v40, %v6085_v25  ;;  %v5740_v40 = vor.u32 %v6753_v20, %v5739_v6  ;;  %v5723_v25 = vld [vmem:[%s10248_s4 + $0x248] sm:$0xf]  ;;  %v6777_v21 = vld [vmem:[%s10248_s4 + $0x334] sm:$0xf0] }
 0x16e   :  { %3569 = vmatpush.bf16.msrb.mxu2 %v6024_v33  ;;  %v6083_v33 = vld [vmem:[%s10248_s4 + $0x520] sm:$0xf]  ;;  %v5515_v6 = vld [vmem:[%s10248_s4 + $0xa8] sm:$0xf]  ;;  %v6677_v58 = vld [vmem:[%s10248_s4 + $0x14] sm:$0xf0] }
 0x16f   :  { %3582 = vmatpush.bf16.msrb.mxu3 %v6152_v50  ;;  %v6084_v39 = vor.u32 %v6840_v34, %v6083_v33  ;;  %v6765_v50 = vld [vmem:[%s10248_s4 + $0x2d4] sm:$0xf0]  ;;  %v5435_v0 = vld [vmem:[%s10248_s4 + $0x8] sm:$0xf] }
 0x170   :  { %3544 = vmatpush.bf16.msrb.mxu0 %v5752_v59  ;;  %v2144_v44 = vpop.f32.mrf.mxu2  ;;  %v5804_v59 = vor.u32 %v6769_v12, %v5803_v37  ;;  %v6789_v33 = vld [vmem:[%s10248_s4 + $0x394] sm:$0xf0] }
 0x171   :  { %v2157_v52 = vpop.f32.mrf.mxu3  ;;  %3508 = vmatpush.bf16.msra.mxu1 %v6084_v39  ;;  %v5867_v44 = vld [vmem:[%s10248_s4 + $0x368] sm:$0xf] }
 0x172   :  { %3570 = vmatpush.bf16.msrb.mxu2 %v6008_v56  ;;  %v5944_v56 = vor.u32 %v6802_v28, %v5941_v30  ;;  %v6786_v28 = vld [vmem:[%s10248_s4 + $0x384] sm:$0xf] }
 0x173   :  { %3583 = vmatpush.bf16.msrb.mxu3 %v6136_v1  ;;  %v6801_v1 = vld [vmem:[%s10248_s4 + $0x3f4] sm:$0xf0] }
 0x174   :  { %3545 = vmatpush.bf16.msrb.mxu0 %v5736_v7  ;;  %v5788_v7 = vor.u32 %v6765_v50, %v5787_v46  ;;  %v5932_v13 = vor.u32 %v6801_v1, %v5931_v36  ;;  %v5864_v46 = vor.u32 %v6782_v41, %v5861_v42  ;;  %v5724_v50 = vor.u32 %v6749_v43, %v5723_v25  ;;  %v5851_v1 = vld [vmem:[%s10248_s4 + $0x348] sm:$0xf]  ;;  %v6695_v25 = vld [vmem:[%s10248_s4 + $0xac] sm:$0xf] }
 0x175   :  { %3509 = vmatpush.bf16.msra.mxu1 %v6068_v62  ;;  %v6705_v62 = vld [vmem:[%s10248_s4 + $0xf4] sm:$0xf0]  ;;  %v348_v41 = vperm.slane %v9026_v9, 5  ;;  %v5501_v9 = vld [vmem:[%s10248_s4 + $0x98] sm:$0xf0] }
 0x176   :  { %3571 = vmatpush.bf16.msrb.mxu2 %v5992_v54  ;;  %v5925_v54 = vld [vmem:[%s10248_s4 + $0x3f0] sm:$0xf0] }
 0x177   :  { %3584 = vmatpush.bf16.msrb.mxu3 %v6120_v8  ;;  %v5928_v4 = vor.u32 %v6798_v45, %v5925_v54  ;;  %v5772_v8 = vor.u32 %v6761_v14, %v5771_v10  ;;  %v5547_v45 = vld [vmem:[%s10248_s4 + $0xe8] sm:$0xf] }
 0x178   :  { %3546 = vmatpush.bf16.msrb.mxu0 %v5720_v24  ;;  %v5899_v24 = vld [vmem:[%s10248_s4 + $0x3a8] sm:$0xf]  ;;  %v5548_v10 = vor.u32 %v6705_v62, %v5547_v45 }
 0x179   :  { %3554 = vmatpush.bf16.msrb.mxu1 %v5928_v4  ;;  %v5900_v27 = vor.u32 %v6793_v22, %v5899_v24  ;;  %v5691_v4 = vld [vmem:[%s10248_s4 + $0x208] sm:$0xf]  ;;  %v6770_v22 = vld [vmem:[%s10248_s4 + $0x304] sm:$0xf] }
 0x17a   :  { %3572 = vmatpush.bf16.msrb.mxu2 %v5976_v17  ;;  %v6797_v17 = vld [vmem:[%s10248_s4 + $0x3d4] sm:$0xf0] }
 0x17b   :  { %3585 = vmatpush.bf16.msrb.mxu3 %v6104_v31  ;;  %v5916_v15 = vor.u32 %v6797_v17, %v5915_v47  ;;  %v5883_v31 = vld [vmem:[%s10248_s4 + $0x388] sm:$0xf]  ;;  %v6701_v17 = vld [vmem:[%s10248_s4 + $0xd4] sm:$0xf0] }
 0x17c   :  { %3547 = vmatpush.bf16.msrb.mxu0 %v5704_v38  ;;  %v5884_v12 = vor.u32 %v6789_v33, %v5883_v31  ;;  %v5531_v47 = vld [vmem:[%s10248_s4 + $0xc8] sm:$0xf]  ;;  %v6773_v33 = vld [vmem:[%s10248_s4 + $0x314] sm:$0xf0] }
 0x17d   :  { %3555 = vmatpush.bf16.msrb.mxu1 %v5912_v19  ;;  %v5852_v19 = vor.u32 %v6781_v2, %v5851_v1  ;;  %v5532_v16 = vor.u32 %v6701_v17, %v5531_v47  ;;  %v5819_v31 = vld [vmem:[%s10248_s4 + $0x308] sm:$0xf]  ;;  %v6679_v47 = vld [vmem:[%s10248_s4 + $0x2c] sm:$0xf] }
 0x17e   :  { %3573 = vmatpush.bf16.msrb.mxu2 %v5960_v29  ;;  %v5877_v29 = vld [vmem:[%s10248_s4 + $0x390] sm:$0xf0]  ;;  %v5451_v2 = vld [vmem:[%s10248_s4 + $0x28] sm:$0xf] }
 0x17f   :  { %3586 = vmatpush.bf16.msrb.mxu3 %v6088_v55  ;;  %v5880_v38 = vor.u32 %v6786_v28, %v5877_v29  ;;  %v5707_v55 = vld [vmem:[%s10248_s4 + $0x228] sm:$0xf]  ;;  %v6699_v28 = vld [vmem:[%s10248_s4 + $0xcc] sm:$0xf] }
 0x180   :  { %3548 = vmatpush.bf16.msrb.mxu0 %v5688_v60  ;;  %v2168_v30 = vpop.f32.mrf.mxu0 }
 0x181   :  { %v2169_v34 = vadd.f32 %v2168_v30, %v2156_v26  ;;  %v2181_v37 = vpop.f32.mrf.mxu1  ;;  %3556 = vmatpush.bf16.msrb.mxu1 %v5896_v32  ;;  %v5813_v26 = vld [vmem:[%s10248_s4 + $0x310] sm:$0xf0]  ;;  %v5533_v30 = vld [vmem:[%s10248_s4 + $0xd8] sm:$0xf0] }
 0x182   :  { %3574 = vmatpush.bf16.msrb.mxu2 %v5944_v56  ;;  %v6785_v56 = vld [vmem:[%s10248_s4 + $0x374] sm:$0xf0]  ;;  %v5816_v20 = vor.u32 %v6770_v22, %v5813_v26 }
 0x183   :  { %3587 = vmatpush.bf16.msrb.mxu3 %v6072_v5  ;;  %v2182_v39 = vadd.f32 %v2181_v37, %v2169_v34  ;;  %v5868_v57 = vor.u32 %v6785_v56, %v5867_v44  ;;  %v5536_v37 = vor.u32 %v6699_v28, %v5533_v30  ;;  %v5483_v44 = vld [vmem:[%s10248_s4 + $0x68] sm:$0xf]  ;;  %v6689_v56 = vld [vmem:[%s10248_s4 + $0x74] sm:$0xf0]  ;;  %v6831_v28 = vld [vmem:[%s10248_s4 + $0x4ec] sm:$0xf] }
 0x185   :  { %6925 = vtanh.f32 %v2182_v39  ;;  %3557 = vmatpush.bf16.msrb.mxu1 %v5880_v38  ;;  %v5499_v38 = vld [vmem:[%s10248_s4 + $0x88] sm:$0xf]  ;;  %v6693_v39 = vld [vmem:[%s10248_s4 + $0x94] sm:$0xf0] }
 0x186   :  { %3619 = vmatpush.bf16.msra.mxu2 %v5804_v59  ;;  %v5845_v59 = vld [vmem:[%s10248_s4 + $0x350] sm:$0xf0]  ;;  %v5500_v42 = vor.u32 %v6693_v39, %v5499_v38  ;;  %v6737_v38 = vld [vmem:[%s10248_s4 + $0x1f4] sm:$0xf0]  ;;  %v6735_v39 = vld [vmem:[%s10248_s4 + $0x1ec] sm:$0xf] }
 0x187   :  { %3632 = vmatpush.bf16.msra.mxu3 %v5932_v13  ;;  %v5848_v36 = vor.u32 %v6778_v49, %v5845_v59  ;;  %v6741_v13 = vld [vmem:[%s10248_s4 + $0x214] sm:$0xf0]  ;;  %v5467_v49 = vld [vmem:[%s10248_s4 + $0x48] sm:$0xf] }
 0x188   :  { %v9484_v52 = vpop.f32.mrf.mxu2  ;;  %v2170_v60 = vpop.f32.mrf.mxu0  ;;  %v5692_v23 = vor.u32 %v6741_v13, %v5691_v4  ;;  %v6685_v59 = vld [vmem:[%s10248_s4 + $0x54] sm:$0xf0] }
 0x189   :  { %v9495_v61 = vpop.f32.mrf.mxu3  ;;  %v2183_v54 = vpop.f32.mrf.mxu1  ;;  %3558 = vmatpush.bf16.msrb.mxu1 %v5864_v46  ;;  %v6691_v46 = vld [vmem:[%s10248_s4 + $0x8c] sm:$0xf]  ;;  %v6681_v4 = vld [vmem:[%s10248_s4 + $0x34] sm:$0xf0] }
 0x18a   :  { %3620 = vmatpush.bf16.msra.mxu2 %v5788_v7  ;;  %v5708_v7 = vor.u32 %v6745_v63, %v5707_v55  ;;  %v5484_v55 = vor.u32 %v6689_v56, %v5483_v44  ;;  %v6687_v60 = vld [vmem:[%s10248_s4 + $0x6c] sm:$0xf]  ;;  %v5468_v54 = vor.u32 %v6685_v59, %v5467_v49  ;;  %v5661_v59 = vld [vmem:[%s10248_s4 + $0x1d8] sm:$0xf0] }
 0x18b   :  { %3633 = vmatpush.bf16.msra.mxu3 %v5916_v15  ;;  %v6926_v5 = vpop.eup %6925  ;;  %v5835_v15 = vld [vmem:[%s10248_s4 + $0x328] sm:$0xf] }
 0x18c   :  { %v9524_v14 = vpack.c.bf16 %v6926_v5, %v6926_v5  ;;  %v5836_v29 = vor.u32 %v6777_v21, %v5835_v15  ;;  %v5469_v5 = vld [vmem:[%s10248_s4 + $0x58] sm:$0xf0] }
 0x18d   :  { %3559 = vmatpush.bf16.msrb.mxu1 %v5848_v36 }
 0x18e   :  { %3621 = vmatpush.bf16.msra.mxu2 %v5772_v8  ;;  %v5549_v8 = vld [vmem:[%s10248_s4 + $0xf8] sm:$0xf0]  ;;  %3497 = vmatmul.bf16.vlgmr.msra.gmra.mxu0 %v9524_v14 }
 0x18f   :  { %3634 = vmatpush.bf16.msra.mxu3 %v5900_v27  ;;  %3575 = vmatmul.bf16.vlgmr.msrb.gmra.mxu2 %v9524_v14  ;;  %v5552_v32 = vor.u32 %v6703_v18, %v5549_v8  ;;  %v6697_v27 = vld [vmem:[%s10248_s4 + $0xb4] sm:$0xf0]  ;;  %v6059_v8 = vld [vmem:[%s10248_s4 + $0x4e8] sm:$0xf] }
 0x190   :  { %3593 = vmatpush.bf16.msra.mxu0 %v5548_v10  ;;  %v2196_v24 = vpop.f32.mrf.mxu2  ;;  %v5516_v34 = vor.u32 %v6697_v27, %v5515_v6  ;;  %v6043_v6 = vld [vmem:[%s10248_s4 + $0x4c8] sm:$0xf]  ;;  %v6829_v27 = vld [vmem:[%s10248_s4 + $0x4d4] sm:$0xf0] }
 0x191   :  { %3560 = vmatpush.bf16.msrb.mxu1 %v5832_v3  ;;  %v6833_v3 = vld [vmem:[%s10248_s4 + $0x4f4] sm:$0xf0] }
 0x192   :  { %3622 = vmatpush.bf16.msra.mxu2 %v5756_v35  ;;  %v2209_v35 = vpop.f32.mrf.mxu3  ;;  %v6060_v26 = vor.u32 %v6833_v3, %v6059_v8  ;;  %v6725_v8 = vld [vmem:[%s10248_s4 + $0x194] sm:$0xf0]  ;;  %v6723_v3 = vld [vmem:[%s10248_s4 + $0x18c] sm:$0xf] }
 0x193   :  { %3635 = vmatpush.bf16.msra.mxu3 %v5884_v12  ;;  %v5517_v12 = vld [vmem:[%s10248_s4 + $0xb8] sm:$0xf0] }
 0x194   :  { %3594 = vmatpush.bf16.msra.mxu0 %v5532_v16  ;;  %v5520_v43 = vor.u32 %v6695_v25, %v5517_v12  ;;  %v5436_v16 = vor.u32 %v6677_v58, %v5435_v0  ;;  %v5437_v35 = vld [vmem:[%s10248_s4 + $0x18] sm:$0xf0]  ;;  %v6027_v25 = vld [vmem:[%s10248_s4 + $0x4a8] sm:$0xf]  ;;  %v6825_v12 = vld [vmem:[%s10248_s4 + $0x4b4] sm:$0xf0] }
 0x195   :  { %3561 = vmatpush.bf16.msrb.mxu1 %v5816_v20  ;;  %v6044_v20 = vor.u32 %v6829_v27, %v6043_v6  ;;  %v6013_v0 = vld [vmem:[%s10248_s4 + $0x498] sm:$0xf0] }
 0x196   :  { %3623 = vmatpush.bf16.msra.mxu2 %v5740_v40  ;;  %v5820_v40 = vor.u32 %v6773_v33, %v5819_v31 }
 0x197   :  { %3636 = vmatpush.bf16.msra.mxu3 %v5868_v57  ;;  %v5504_v57 = vor.u32 %v6691_v46, %v5501_v9  ;;  %v6028_v9 = vor.u32 %v6825_v12, %v6027_v25  ;;  %v5595_v12 = vld [vmem:[%s10248_s4 + $0x148] sm:$0xf] }
 0x198   :  { %3595 = vmatpush.bf16.msra.mxu0 %v5516_v34 }
 0x19a   :  { %3624 = vmatpush.bf16.msra.mxu2 %v5724_v50  ;;  %v2195_v50 = vadd.f32 %v9484_v52, %v348_v41  ;;  %v5485_v52 = vld [vmem:[%s10248_s4 + $0x78] sm:$0xf0]  ;;  %v6827_v41 = vld [vmem:[%s10248_s4 + $0x4cc] sm:$0xf] }
 0x19b   :  { %3637 = vmatpush.bf16.msra.mxu3 %v5852_v19  ;;  %v5488_v1 = vor.u32 %v6687_v60, %v5485_v52  ;;  %v5453_v19 = vld [vmem:[%s10248_s4 + $0x38] sm:$0xf0]  ;;  %v6011_v60 = vld [vmem:[%s10248_s4 + $0x488] sm:$0xf]  ;;  %v6821_v52 = vld [vmem:[%s10248_s4 + $0x494] sm:$0xf0] }
 0x19c   :  { %3596 = vmatpush.bf16.msra.mxu0 %v5500_v42  ;;  %v2208_v63 = vadd.f32 %v9495_v61, %v2195_v50  ;;  %v6683_v61 = vld [vmem:[%s10248_s4 + $0x4c] sm:$0xf]  ;;  %v5456_v22 = vor.u32 %v6679_v47, %v5453_v19  ;;  %v6045_v42 = vld [vmem:[%s10248_s4 + $0x4d8] sm:$0xf0]  ;;  %v5659_v50 = vld [vmem:[%s10248_s4 + $0x1c8] sm:$0xf] }
 0x19d   :  { %v5472_v13 = vor.u32 %v6683_v61, %v5469_v5  ;;  %v6048_v49 = vor.u32 %v6827_v41, %v6045_v42  ;;  %v5645_v5 = vld [vmem:[%s10248_s4 + $0x1b8] sm:$0xf0]  ;;  %v5627_v19 = vld [vmem:[%s10248_s4 + $0x188] sm:$0xf] }
 0x19e   :  { %3625 = vmatpush.bf16.msra.mxu2 %v5708_v7  ;;  %3549 = vmatmul.bf16.vlgmr.msrb.gmra.mxu0 %v9047_v48  ;;  %v5452_v7 = vor.u32 %v6681_v4, %v5451_v2  ;;  %v6729_v2 = vld [vmem:[%s10248_s4 + $0x1b4] sm:$0xf0]  ;;  %v6727_v4 = vld [vmem:[%s10248_s4 + $0x1ac] sm:$0xf]  ;;  %v5628_v6 = vor.u32 %v6725_v8, %v5627_v19  ;;  %v5563_v19 = vld [vmem:[%s10248_s4 + $0x108] sm:$0xf] }
 0x19f   :  { %3638 = vmatpush.bf16.msra.mxu3 %v5836_v29  ;;  %v6061_v29 = vld [vmem:[%s10248_s4 + $0x4f8] sm:$0xf0]  ;;  %v6709_v8 = vld [vmem:[%s10248_s4 + $0x114] sm:$0xf0] }
 0x1a0   :  { %v2220_v45 = vpop.f32.mrf.mxu0  ;;  %3597 = vmatpush.bf16.msra.mxu0 %v5484_v55  ;;  %v6064_v34 = vor.u32 %v6831_v28, %v6061_v29  ;;  %v6733_v55 = vld [vmem:[%s10248_s4 + $0x1d4] sm:$0xf0]  ;;  %v5611_v29 = vld [vmem:[%s10248_s4 + $0x168] sm:$0xf] }
 0x1a1   :  { %v2233_v62 = vpop.f32.mrf.mxu1  ;;  %v2221_v36 = vadd.f32 %v2220_v45, %v2208_v63  ;;  %v6823_v63 = vld [vmem:[%s10248_s4 + $0x4ac] sm:$0xf]  ;;  %v6029_v45 = vld [vmem:[%s10248_s4 + $0x4b8] sm:$0xf0] }
 0x1a2   :  { %3626 = vmatpush.bf16.msra.mxu2 %v5692_v23  ;;  %v6032_v61 = vor.u32 %v6823_v63, %v6029_v45  ;;  %v6767_v63 = vld [vmem:[%s10248_s4 + $0x2ec] sm:$0xf]  ;;  %v5805_v45 = vld [vmem:[%s10248_s4 + $0x2f8] sm:$0xf0] }
 0x1a3   :  { %3639 = vmatpush.bf16.msra.mxu3 %v5820_v40  ;;  %v2234_v10 = vadd.f32 %v2233_v62, %v2221_v36  ;;  %v5677_v40 = vld [vmem:[%s10248_s4 + $0x1f8] sm:$0xf0]  ;;  %v5660_v62 = vor.u32 %v6733_v55, %v5659_v50  ;;  %v5947_v55 = vld [vmem:[%s10248_s4 + $0x408] sm:$0xf] }
 0x1a4   :  { %3598 = vmatpush.bf16.msra.mxu0 %v5468_v54  ;;  %v5680_v46 = vor.u32 %v6735_v39, %v5677_v40  ;;  %v5643_v54 = vld [vmem:[%s10248_s4 + $0x1a8] sm:$0xf]  ;;  %v6811_v39 = vld [vmem:[%s10248_s4 + $0x44c] sm:$0xf]  ;;  %v5981_v40 = vld [vmem:[%s10248_s4 + $0x458] sm:$0xf0] }
 0x1a5   :  { %3627 = vmatmul.bf16.vlgmr.msra.gmra.mxu2 %v9047_v48  ;;  %v5644_v58 = vor.u32 %v6729_v2, %v5643_v54  ;;  %v5984_v50 = vor.u32 %v6811_v39, %v5981_v40  ;;  %v5579_v2 = vld [vmem:[%s10248_s4 + $0x128] sm:$0xf]  ;;  %v5757_v39 = vld [vmem:[%s10248_s4 + $0x298] sm:$0xf0] }
 0x1a6   :  { %3671 = vmatpush.bf16.msrb.mxu2 %v5552_v32  ;;  %v6675_v32 = vld [vmem:[%s10248_s4 + $0xc] sm:$0xf] }
 0x1a7   :  { %v5440_v30 = vor.u32 %v6675_v32, %v5437_v35 }
 0x1a8   :  { %v2246_v17 = vpop.f32.mrf.mxu2  ;;  %v2222_v21 = vpop.f32.mrf.mxu0  ;;  %3599 = vmatpush.bf16.msra.mxu0 %v5452_v7  ;;  %v5995_v7 = vld [vmem:[%s10248_s4 + $0x468] sm:$0xf] }
 0x1a9   :  { %v2259_v18 = vpop.f32.mrf.mxu3  ;;  %v2247_v15 = vadd.f32 %v2246_v17, %v2234_v10  ;;  %v2235_v23 = vpop.f32.mrf.mxu1  ;;  %v6817_v10 = vld [vmem:[%s10248_s4 + $0x474] sm:$0xf0]  ;;  %v5648_v17 = vor.u32 %v6727_v4, %v5645_v5  ;;  %v5629_v21 = vld [vmem:[%s10248_s4 + $0x198] sm:$0xf0]  ;;  %v5808_v5 = vor.u32 %v6767_v63, %v5805_v45 }
 0x1aa   :  { %3672 = vmatpush.bf16.msrb.mxu2 %v5536_v37  ;;  %v5675_v37 = vld [vmem:[%s10248_s4 + $0x1e8] sm:$0xf]  ;;  %v5632_v27 = vor.u32 %v6723_v3, %v5629_v21  ;;  %v6713_v4 = vld [vmem:[%s10248_s4 + $0x134] sm:$0xf0]  ;;  %v6707_v3 = vld [vmem:[%s10248_s4 + $0x10c] sm:$0xf] }
 0x1ab   :  { %v2260_v24 = vadd.f32 %v2259_v18, %v2247_v15  ;;  %v5676_v44 = vor.u32 %v6737_v38, %v5675_v37  ;;  %v5996_v18 = vor.u32 %v6817_v10, %v5995_v7  ;;  %v5979_v23 = vld [vmem:[%s10248_s4 + $0x448] sm:$0xf]  ;;  %v6809_v38 = vld [vmem:[%s10248_s4 + $0x434] sm:$0xf0]  ;;  %v6711_v7 = vld [vmem:[%s10248_s4 + $0x12c] sm:$0xf] }
 0x1ac   :  { %3600 = vmatpush.bf16.msra.mxu0 %v5436_v16  ;;  %v6813_v16 = vld [vmem:[%s10248_s4 + $0x454] sm:$0xf0]  ;;  %v5963_v37 = vld [vmem:[%s10248_s4 + $0x428] sm:$0xf]  ;;  %v5581_v10 = vld [vmem:[%s10248_s4 + $0x138] sm:$0xf0] }
 0x1ad   :  { %6927 = vtanh.f32 %v2260_v24  ;;  %v5980_v28 = vor.u32 %v6813_v16, %v5979_v23  ;;  %v5964_v42 = vor.u32 %v6809_v38, %v5963_v37  ;;  %v5565_v16 = vld [vmem:[%s10248_s4 + $0x118] sm:$0xf0]  ;;  %v6755_v38 = vld [vmem:[%s10248_s4 + $0x28c] sm:$0xf] }
 0x1ae   :  { %3673 = vmatpush.bf16.msrb.mxu2 %v5520_v43  ;;  %v6173_v37 = vld [vmem:[%s10248_s4 + $0x5d8] sm:$0xf0] }
 0x1af   :  { %3601 = vmatmul.bf16.vlgmr.msra.gmra.mxu0 %v9055_v51  ;;  %v5725_v63 = vld [vmem:[%s10248_s4 + $0x258] sm:$0xf0] }
 0x1b0   :  { %3645 = vmatpush.bf16.msrb.mxu0 %v6060_v26  ;;  %v2248_v31 = vpop.f32.mrf.mxu2  ;;  %v5997_v26 = vld [vmem:[%s10248_s4 + $0x478] sm:$0xf0] }
 0x1b1   :  { %v2261_v33 = vpop.f32.mrf.mxu3 }
 0x1b2   :  { %3674 = vmatpush.bf16.msrb.mxu2 %v5504_v57  ;;  %v6731_v57 = vld [vmem:[%s10248_s4 + $0x1cc] sm:$0xf] }
 0x1b3   :  { %v6928_v43 = vpop.eup %6927  ;;  %v5664_v36 = vor.u32 %v6731_v57, %v5661_v59  ;;  %v6805_v57 = vld [vmem:[%s10248_s4 + $0x414] sm:$0xf0] }
 0x1b4   :  { %3646 = vmatpush.bf16.msrb.mxu0 %v6044_v20  ;;  %v9684_v56 = vpack.c.bf16 %v6928_v43, %v6928_v43  ;;  %v6719_v20 = vld [vmem:[%s10248_s4 + $0x16c] sm:$0xf]  ;;  %v6717_v43 = vld [vmem:[%s10248_s4 + $0x154] sm:$0xf0] }
 0x1b5   :  { %v5596_v54 = vor.u32 %v6717_v43, %v5595_v12  ;;  %v6155_v12 = vld [vmem:[%s10248_s4 + $0x5a8] sm:$0xf]  ;;  %v6855_v43 = vld [vmem:[%s10248_s4 + $0x5ac] sm:$0xf] }
 0x1b6   :  { %3675 = vmatpush.bf16.msrb.mxu2 %v5488_v1  ;;  %3510 = vmatmul.bf16.vlgmr.msra.gmra.mxu1 %v9684_v56  ;;  %v6012_v1 = vor.u32 %v6821_v52, %v6011_v60  ;;  %v5965_v52 = vld [vmem:[%s10248_s4 + $0x438] sm:$0xf0] }
 0x1b7   :  { %3588 = vmatmul.bf16.vlgmr.msrb.gmra.mxu3 %v9684_v56  ;;  %3606 = vmatpush.bf16.msra.mxu1 %v5676_v44  ;;  %v6715_v44 = vld [vmem:[%s10248_s4 + $0x14c] sm:$0xf] }
 0x1b8   :  { %3684 = vmatpush.bf16.msrb.mxu3 %v5680_v46  ;;  %3647 = vmatpush.bf16.msrb.mxu0 %v6028_v9  ;;  %v5597_v46 = vld [vmem:[%s10248_s4 + $0x158] sm:$0xf0] }
 0x1ba   :  { %3676 = vmatpush.bf16.msrb.mxu2 %v5472_v13  ;;  %v6819_v13 = vld [vmem:[%s10248_s4 + $0x48c] sm:$0xf] }
 0x1bb   :  { %3607 = vmatpush.bf16.msra.mxu1 %v5660_v62  ;;  %v6016_v15 = vor.u32 %v6819_v13, %v6013_v0  ;;  %v6803_v13 = vld [vmem:[%s10248_s4 + $0x40c] sm:$0xf]  ;;  %v5949_v0 = vld [vmem:[%s10248_s4 + $0x418] sm:$0xf0] }
 0x1bc   :  { %3685 = vmatpush.bf16.msrb.mxu3 %v5664_v36  ;;  %3648 = vmatpush.bf16.msrb.mxu0 %v6012_v1  ;;  %v5600_v36 = vor.u32 %v6715_v44, %v5597_v46  ;;  %v5948_v1 = vor.u32 %v6805_v57, %v5947_v55  ;;  %v5952_v21 = vor.u32 %v6803_v13, %v5949_v0  ;;  %v6751_v44 = vld [vmem:[%s10248_s4 + $0x26c] sm:$0xf]  ;;  %v5741_v46 = vld [vmem:[%s10248_s4 + $0x278] sm:$0xf0]  ;;  %v6139_v55 = vld [vmem:[%s10248_s4 + $0x588] sm:$0xf] }
 0x1bd   :  { %v5744_v57 = vor.u32 %v6751_v44, %v5741_v46 }
 0x1be   :  { %3677 = vmatpush.bf16.msrb.mxu2 %v5456_v22  ;;  %v6815_v22 = vld [vmem:[%s10248_s4 + $0x46c] sm:$0xf] }
 0x1bf   :  { %3608 = vmatpush.bf16.msra.mxu1 %v5644_v58  ;;  %v6000_v33 = vor.u32 %v6815_v22, %v5997_v26  ;;  %v6763_v58 = vld [vmem:[%s10248_s4 + $0x2cc] sm:$0xf]  ;;  %v6865_v22 = vld [vmem:[%s10248_s4 + $0x5f4] sm:$0xf0] }
 0x1c0   :  { %v3446_v24 = vpop.f32.mrf.mxu0  ;;  %3686 = vmatpush.bf16.msrb.mxu3 %v5648_v17  ;;  %3649 = vmatpush.bf16.msrb.mxu0 %v5996_v18  ;;  %v5580_v17 = vor.u32 %v6713_v4, %v5579_v2  ;;  %v5584_v18 = vor.u32 %v6711_v7, %v5581_v10  ;;  %v6863_v26 = vld [vmem:[%s10248_s4 + $0x5ec] sm:$0xf]  ;;  %v5709_v10 = vld [vmem:[%s10248_s4 + $0x238] sm:$0xf0] }
 0x1c1   :  { %v3459_v35 = vpop.f32.mrf.mxu1  ;;  %v6847_v4 = vld [vmem:[%s10248_s4 + $0x56c] sm:$0xf] }
 0x1c2   :  { %3678 = vmatpush.bf16.msrb.mxu2 %v5440_v30  ;;  %v6721_v30 = vld [vmem:[%s10248_s4 + $0x174] sm:$0xf0]  ;;  %v6743_v7 = vld [vmem:[%s10248_s4 + $0x22c] sm:$0xf] }
 0x1c3   :  { %3609 = vmatpush.bf16.msra.mxu1 %v5628_v6  ;;  %v5612_v25 = vor.u32 %v6721_v30, %v5611_v29  ;;  %v6759_v6 = vld [vmem:[%s10248_s4 + $0x2ac] sm:$0xf] }
 0x1c4   :  { %3687 = vmatpush.bf16.msrb.mxu3 %v5632_v27  ;;  %3650 = vmatpush.bf16.msrb.mxu0 %v5980_v28  ;;  %v5773_v27 = vld [vmem:[%s10248_s4 + $0x2b8] sm:$0xf0]  ;;  %v5568_v28 = vor.u32 %v6707_v3, %v5565_v16  ;;  %v6841_v16 = vld [vmem:[%s10248_s4 + $0x534] sm:$0xf0] }
 0x1c5   :  { %3679 = vmatmul.bf16.vlgmr.msrb.gmra.mxu2 %v9055_v51  ;;  %v9725_v51 = vld [vmem:[%s10249_s5] sm:$0xf]  ;;  %v5693_v3 = vld [vmem:[%s10248_s4 + $0x218] sm:$0xf0] }
 0x1c6   :  { %3723 = vmatpush.bf16.msra.mxu2 %v6064_v34  ;;  %v2469_v47 = vperm.slane %v9725_v51, 0  ;;  %v5613_v34 = vld [vmem:[%s10248_s4 + $0x178] sm:$0xf0]  ;;  %3562 = vmatmul.bf16.vlgmr.msrb.gmra.mxu1 %v9190_v11 }
 0x1c7   :  { %v5616_v41 = vor.u32 %v6719_v20, %v5613_v34  ;;  %3640 = vmatmul.bf16.vlgmr.msra.gmra.mxu3 %v9190_v11  ;;  %3610 = vmatpush.bf16.msra.mxu1 %v5612_v25  ;;  %v6171_v20 = vld [vmem:[%s10248_s4 + $0x5c8] sm:$0xf]  ;;  %v6859_v34 = vld [vmem:[%s10248_s4 + $0x5cc] sm:$0xf] }
 0x1c8   :  { %v3447_v32 = vadd.f32 %v3446_v24, %v2469_v47  ;;  %v3472_v9 = vpop.f32.mrf.mxu2  ;;  %v3448_v60 = vpop.f32.mrf.mxu0  ;;  %3651 = vmatpush.bf16.msrb.mxu0 %v5964_v42  ;;  %v5789_v47 = vld [vmem:[%s10248_s4 + $0x2d8] sm:$0xf0]  ;;  %v6187_v24 = vld [vmem:[%s10248_s4 + $0x5e8] sm:$0xf]  ;;  %v6176_v25 = vor.u32 %v6859_v34, %v6173_v37  ;;  %v5760_v42 = vor.u32 %v6755_v38, %v5757_v39  ;;  %v6799_v34 = vld [vmem:[%s10248_s4 + $0x3ec] sm:$0xf] }
 0x1c9   :  { %v3461_v62 = vpop.f32.mrf.mxu1  ;;  %3688 = vmatpush.bf16.msrb.mxu3 %v5616_v41  ;;  %v5792_v23 = vor.u32 %v6763_v58, %v5789_v47  ;;  %v6188_v29 = vor.u32 %v6865_v22, %v6187_v24  ;;  %v6857_v41 = vld [vmem:[%s10248_s4 + $0x5b4] sm:$0xf0]  ;;  %v6141_v60 = vld [vmem:[%s10248_s4 + $0x598] sm:$0xf0]  ;;  %v6107_v58 = vld [vmem:[%s10248_s4 + $0x548] sm:$0xf] }
 0x1ca   :  { %3724 = vmatpush.bf16.msra.mxu2 %v6048_v49  ;;  %v3460_v31 = vadd.f32 %v3459_v35, %v3447_v32  ;;  %v6807_v49 = vld [vmem:[%s10248_s4 + $0x42c] sm:$0xf]  ;;  %v6189_v32 = vld [vmem:[%s10248_s4 + $0x5f8] sm:$0xf0]  ;;  %v5564_v35 = vor.u32 %v6709_v8, %v5563_v19  ;;  %v3758_v38 = vld [vmem:[%s10250_s6 + $0x20] sm:$0xff] }
 0x1cb   :  { %3611 = vmatpush.bf16.msra.mxu1 %v5596_v54  ;;  %v6192_v30 = vor.u32 %v6863_v26, %v6189_v32  ;;  %v6123_v54 = vld [vmem:[%s10248_s4 + $0x568] sm:$0xf]  ;;  %v6109_v19 = vld [vmem:[%s10248_s4 + $0x558] sm:$0xf0]  ;;  %v6739_v8 = vld [vmem:[%s10248_s4 + $0x20c] sm:$0xf] }
 0x1cc   :  { %v9812_v59 = vadd.f32 %v3472_v9, %v3460_v31  ;;  %3652 = vmatpush.bf16.msrb.mxu0 %v5948_v1  ;;  %v6861_v31 = vld [vmem:[%s10248_s4 + $0x5d4] sm:$0xf0]  ;;  %v6156_v9 = vor.u32 %v6857_v41, %v6155_v12  ;;  %v5696_v24 = vor.u32 %v6739_v8, %v5693_v3  ;;  %v6839_v26 = vld [vmem:[%s10248_s4 + $0x52c] sm:$0xf]  ;;  %v6093_v32 = vld [vmem:[%s10248_s4 + $0x538] sm:$0xf0] }
 0x1cd   :  { %3689 = vmatpush.bf16.msrb.mxu3 %v5600_v36  ;;  %v6172_v40 = vor.u32 %v6861_v31, %v6171_v20  ;;  %v6849_v36 = vld [vmem:[%s10248_s4 + $0x574] sm:$0xf0]  ;;  %v6835_v20 = vld [vmem:[%s10248_s4 + $0x50c] sm:$0xf]  ;;  %v5933_v37 = vld [vmem:[%s10248_s4 + $0x3f8] sm:$0xf0] }
 0x1ce   :  { %3725 = vmatpush.bf16.msra.mxu2 %v6032_v61  ;;  %v5968_v61 = vor.u32 %v6807_v49, %v5965_v52  ;;  %v6851_v49 = vld [vmem:[%s10248_s4 + $0x58c] sm:$0xf]  ;;  %v6124_v13 = vor.u32 %v6849_v36, %v6123_v54  ;;  %v5936_v12 = vor.u32 %v6799_v34, %v5933_v37  ;;  %v3757_v41 = vld [vmem:[%s10250_s6 + $0x18] sm:$0xff]  ;;  %v6872_v36 = vld [vmem:[%s10251_s8 + $0x30] sm:$0xff] }
 0x1cf   :  { %3612 = vmatpush.bf16.msra.mxu1 %v5580_v17  ;;  %3653 = vmatmul.bf16.vlgmr.msrb.gmra.mxu0 %v9524_v14  ;;  %v6747_v52 = vld [vmem:[%s10248_s4 + $0x24c] sm:$0xf]  ;;  %v6144_v62 = vor.u32 %v6851_v49, %v6141_v60  ;;  %v5712_v17 = vor.u32 %v6743_v7, %v5709_v10  ;;  %v5869_v54 = vld [vmem:[%s10248_s4 + $0x378] sm:$0xf0] }
 0x1d0   :  { %3697 = vmatpush.bf16.msra.mxu0 %v5808_v5  ;;  %v5728_v1 = vor.u32 %v6747_v52, %v5725_v63  ;;  %v6787_v60 = vld [vmem:[%s10248_s4 + $0x38c] sm:$0xf]  ;;  %v5885_v52 = vld [vmem:[%s10248_s4 + $0x398] sm:$0xf0] }
 0x1d1   :  { %3690 = vmatpush.bf16.msrb.mxu3 %v5584_v18  ;;  %v6843_v18 = vld [vmem:[%s10248_s4 + $0x54c] sm:$0xf]  ;;  %v6873_v63 = vld [vmem:[%s10251_s8 + $0x38] sm:$0xff] }
 0x1d2   :  { %3726 = vmatpush.bf16.msra.mxu2 %v6016_v15  ;;  %v3474_v15 = vpop.f32.mrf.mxu2  ;;  %v6775_v10 = vld [vmem:[%s10248_s4 + $0x32c] sm:$0xf]  ;;  %v6881_v8 = vld [vmem:[%s10251_s8 + $0x78] sm:$0xff] }
 0x1d3   :  { %3613 = vmatpush.bf16.msra.mxu1 %v5564_v35  ;;  %v2470_v35 = vperm.slane %v9725_v51, 1 }
 0x1d4   :  { %3698 = vmatpush.bf16.msra.mxu0 %v5792_v23  ;;  %v6091_v23 = vld [vmem:[%s10248_s4 + $0x528] sm:$0xf] }
 0x1d5   :  { %3691 = vmatpush.bf16.msrb.mxu3 %v5568_v28  ;;  %v6096_v28 = vor.u32 %v6839_v26, %v6093_v32  ;;  %v6877_v32 = vld [vmem:[%s10251_s8 + $0x58] sm:$0xff] }
 0x1d6   :  { %3727 = vmatpush.bf16.msra.mxu2 %v6000_v33  ;;  %v5776_v33 = vor.u32 %v6759_v6, %v5773_v27  ;;  %3614 = vmatmul.bf16.vlgmr.msra.gmra.mxu1 %v9057_v53  ;;  %v6092_v6 = vor.u32 %v6841_v16, %v6091_v23  ;;  %v3759_v27 = vld [vmem:[%s10250_s6 + $0x28] sm:$0xff] }
 0x1d7   :  { %3658 = vmatpush.bf16.msrb.mxu1 %v6188_v29  ;;  %v6075_v29 = vld [vmem:[%s10248_s4 + $0x508] sm:$0xf] }
 0x1d8   :  { %3699 = vmatpush.bf16.msra.mxu0 %v5776_v33  ;;  %3692 = vmatmul.bf16.vlgmr.msrb.gmra.mxu3 %v9057_v53  ;;  %v6853_v53 = vld [vmem:[%s10248_s4 + $0x594] sm:$0xf0]  ;;  %v6077_v33 = vld [vmem:[%s10248_s4 + $0x518] sm:$0xf0] }
 0x1d9   :  { %3736 = vmatpush.bf16.msra.mxu3 %v6192_v30  ;;  %v6140_v45 = vor.u32 %v6853_v53, %v6139_v55  ;;  %v3485_v2 = vpop.f32.mrf.mxu3  ;;  %v6837_v30 = vld [vmem:[%s10248_s4 + $0x514] sm:$0xf0]  ;;  %v5901_v55 = vld [vmem:[%s10248_s4 + $0x3b8] sm:$0xf0]  ;;  %v3754_v53 = vld [vmem:[%s10250_s6] sm:$0xff] }
 0x1da   :  { %3728 = vmatpush.bf16.msra.mxu2 %v5984_v50  ;;  %v9950_v5 = vadd.f32 %v3485_v2, %v9812_v59  ;;  %v6845_v59 = vld [vmem:[%s10248_s4 + $0x554] sm:$0xf0]  ;;  %v6076_v39 = vor.u32 %v6837_v30, %v6075_v29  ;;  %v6779_v2 = vld [vmem:[%s10248_s4 + $0x34c] sm:$0xf]  ;;  %v6874_v30 = vld [vmem:[%s10251_s8 + $0x40] sm:$0xff] }
 0x1db   :  { %3659 = vmatpush.bf16.msrb.mxu1 %v6172_v40  ;;  %v6108_v15 = vor.u32 %v6845_v59, %v6107_v58  ;;  %v6771_v59 = vld [vmem:[%s10248_s4 + $0x30c] sm:$0xf] }
 0x1dc   :  { %3700 = vmatpush.bf16.msra.mxu0 %v5760_v42  ;;  %v6875_v29 = vld [vmem:[%s10251_s8 + $0x48] sm:$0xff] }
 0x1dd   :  { %3737 = vmatpush.bf16.msra.mxu3 %v6176_v25  ;;  %v6080_v25 = vor.u32 %v6835_v20, %v6077_v33 }
 0x1de   :  { %3729 = vmatpush.bf16.msra.mxu2 %v5968_v61  ;;  %v6125_v61 = vld [vmem:[%s10248_s4 + $0x578] sm:$0xf0] }
 0x1df   :  { %3660 = vmatpush.bf16.msrb.mxu1 %v6156_v9  ;;  %v6128_v0 = vor.u32 %v6847_v4, %v6125_v61  ;;  %v3755_v9 = vld [vmem:[%s10250_s6 + $0x8] sm:$0xff]  ;;  %v5853_v4 = vld [vmem:[%s10248_s4 + $0x358] sm:$0xf0] }
 0x1e0   :  { %3701 = vmatpush.bf16.msra.mxu0 %v5744_v57  ;;  %v6871_v61 = vld [vmem:[%s10251_s8 + $0x28] sm:$0xff]  ;;  %v5856_v7 = vor.u32 %v6779_v2, %v5853_v4  ;;  %v6900_v4 = vld [vmem:[%s10251_s8 + $0x110] sm:$0xff] }
 0x1e1   :  { %v3487_v22 = vpop.f32.mrf.mxu3 }
 0x1e2   :  { %3730 = vmatpush.bf16.msra.mxu2 %v5952_v21  ;;  %v6112_v21 = vor.u32 %v6843_v18, %v6109_v19  ;;  %v6868_v19 = vld [vmem:[%s10251_s8 + $0x10] sm:$0xff]  ;;  %v6878_v22 = vld [vmem:[%s10251_s8 + $0x60] sm:$0xff] }
 0x1e3   :  { %3661 = vmatpush.bf16.msrb.mxu1 %v6140_v45  ;;  %v3753_v45 = vld [vmem:[%s10252_s1] sm:$0xff] }
 0x1e4   :  { %3702 = vmatpush.bf16.msra.mxu0 %v5728_v1 }
 0x1e5   :  { %3731 = vmatmul.bf16.vlgmr.msra.gmra.mxu2 %v9524_v14  ;;  %v6157_v14 = vld [vmem:[%s10248_s4 + $0x5b8] sm:$0xf0] }
 0x1e6   :  { %v6160_v50 = vor.u32 %v6855_v43, %v6157_v14  ;;  %v6795_v43 = vld [vmem:[%s10248_s4 + $0x3cc] sm:$0xf]  ;;  %v5917_v14 = vld [vmem:[%s10248_s4 + $0x3d8] sm:$0xf0]  ;;  %4127 = vmatpush.bf16.msrb.mxu2 %v6873_v63 }
 0x1e7   :  { %3662 = vmatpush.bf16.msrb.mxu1 %v6124_v13  ;;  %v5920_v46 = vor.u32 %v6795_v43, %v5917_v14  ;;  %v5837_v13 = vld [vmem:[%s10248_s4 + $0x338] sm:$0xf0]  ;;  %v6904_v14 = vld [vmem:[%s10251_s8 + $0x130] sm:$0xff] }
 0x1e8   :  { %3738 = vmatpush.bf16.msra.mxu3 %v6160_v50  ;;  %v3524_v47 = vpop.f32.mrf.mxu2  ;;  %3703 = vmatpush.bf16.msra.mxu0 %v5712_v17  ;;  %v6791_v50 = vld [vmem:[%s10248_s4 + $0x3ac] sm:$0xf]  ;;  %v5840_v58 = vor.u32 %v6775_v10, %v5837_v13  ;;  %v6869_v17 = vld [vmem:[%s10251_s8 + $0x18] sm:$0xff] }
 0x1e9   :  { %v3525_v40 = vadd.f32 %v3524_v47, %v2470_v35  ;;  %v3537_v42 = vpop.f32.mrf.mxu3  ;;  %v5904_v57 = vor.u32 %v6791_v50, %v5901_v55  ;;  %v5821_v47 = vld [vmem:[%s10248_s4 + $0x318] sm:$0xf0]  ;;  %v6903_v55 = vld [vmem:[%s10251_s8 + $0x128] sm:$0xff] }
 0x1ea   :  { %4128 = vmatpush.bf16.msrb.mxu2 %v6872_v36  ;;  %v5824_v18 = vor.u32 %v6771_v59, %v5821_v47  ;;  %v6905_v43 = vld [vmem:[%s10251_s8 + $0x138] sm:$0xff]  ;;  %v6884_v36 = vld [vmem:[%s10251_s8 + $0x90] sm:$0xff]  ;;  %v6899_v13 = vld [vmem:[%s10251_s8 + $0x108] sm:$0xff] }
 0x1eb   :  { %3663 = vmatpush.bf16.msrb.mxu1 %v6108_v15  ;;  %v10023_v44 = vadd.f32 %v3537_v42, %v3525_v40  ;;  %v6867_v15 = vld [vmem:[%s10251_s8 + $0x8] sm:$0xff]  ;;  %v6889_v40 = vld [vmem:[%s10251_s8 + $0xb8] sm:$0xff]  ;;  %v6898_v59 = vld [vmem:[%s10251_s8 + $0x100] sm:$0xff] }
 0x1ec   :  { %3739 = vmatpush.bf16.msra.mxu3 %v6144_v62  ;;  %3704 = vmatpush.bf16.msra.mxu0 %v5696_v24  ;;  %v6783_v62 = vld [vmem:[%s10248_s4 + $0x36c] sm:$0xf]  ;;  %v6866_v24 = vld [vmem:[%s10251_s8] sm:$0xff] }
 0x1ed   :  { %v5872_v1 = vor.u32 %v6783_v62, %v5869_v54  ;;  %v6901_v54 = vld [vmem:[%s10251_s8 + $0x118] sm:$0xff] }
 0x1ee   :  { %4129 = vmatpush.bf16.msrb.mxu2 %v6871_v61  ;;  %v6883_v61 = vld [vmem:[%s10251_s8 + $0x88] sm:$0xff] }
 0x1ef   :  { %3664 = vmatpush.bf16.msrb.mxu1 %v6092_v6  ;;  %3705 = vmatmul.bf16.vlgmr.msra.gmra.mxu0 %v9047_v48  ;;  %v3756_v48 = vld [vmem:[%s10250_s6 + $0x10] sm:$0xff] }
 0x1f0   :  { %3740 = vmatpush.bf16.msra.mxu3 %v6128_v0  ;;  %v3526_v31 = vpop.f32.mrf.mxu2  ;;  %3778 = vmatpush.msrb.mxu0 %v3759_v27  ;;  %v6870_v0 = vld [vmem:[%s10251_s8 + $0x20] sm:$0xff]  ;;  %v6876_v6 = vld [vmem:[%s10251_s8 + $0x50] sm:$0xff] }
 0x1f1   :  { %v3539_v49 = vpop.f32.mrf.mxu3 }
 0x1f2   :  { %3779 = vmatpush.msrb.mxu0 %v3758_v38  ;;  %4130 = vmatpush.bf16.msrb.mxu2 %v6870_v0  ;;  %v6882_v0 = vld [vmem:[%s10251_s8 + $0x80] sm:$0xff] }
 0x1f3   :  { %3665 = vmatpush.bf16.msrb.mxu1 %v6076_v39 }
 0x1f4   :  { %3741 = vmatpush.bf16.msra.mxu3 %v6112_v21  ;;  %3780 = vmatpush.msrb.mxu0 %v3757_v41  ;;  %v6880_v21 = vld [vmem:[%s10251_s8 + $0x70] sm:$0xff] }
 0x1f6   :  { %3781 = vmatpush.msrb.mxu0 %v3756_v48  ;;  %3666 = vmatmul.bf16.vlgmr.msrb.gmra.mxu1 %v9684_v56  ;;  %v6887_v48 = vld [vmem:[%s10251_s8 + $0xa8] sm:$0xff] }
 0x1f7   :  { %3710 = vmatpush.bf16.msra.mxu1 %v5936_v12  ;;  %4131 = vmatpush.bf16.msrb.mxu2 %v6869_v17  ;;  %v6897_v17 = vld [vmem:[%s10251_s8 + $0xf8] sm:$0xff] }
 0x1f8   :  { %3742 = vmatpush.bf16.msra.mxu3 %v6096_v28  ;;  %3782 = vmatpush.msrb.mxu0 %v3755_v9 }
 0x1fa   :  { %3783 = vmatpush.msrb.mxu0 %v3754_v53  ;;  %v6886_v53 = vld [vmem:[%s10251_s8 + $0xa0] sm:$0xff] }
 0x1fb   :  { %3711 = vmatpush.bf16.msra.mxu1 %v5920_v46  ;;  %4132 = vmatpush.bf16.msrb.mxu2 %v6868_v19 }
 0x1fc   :  { %3743 = vmatpush.bf16.msra.mxu3 %v6080_v25  ;;  %4153 = vmatpush.bf16.msra.mxu0 %v6889_v40 }
 0x1ff   :  { %3744 = vmatmul.bf16.vlgmr.msra.gmra.mxu3 %v9684_v56  ;;  %3712 = vmatpush.bf16.msra.mxu1 %v5904_v57  ;;  %v5888_v56 = vor.u32 %v6787_v60, %v5885_v52  ;;  %v6902_v60 = vld [vmem:[%s10251_s8 + $0x120] sm:$0xff] }
 0x200   :  { %6193 = vmatmul.msk.f32.vlgmr.msrb.gmra.mxu0 %vm3764_vm0, %v3753_v45  ;;  %4140 = vmatpush.bf16.msrb.mxu3 %v6881_v8  ;;  %v6896_v8 = vld [vmem:[%s10251_s8 + $0xf0] sm:$0xff] }
 0x201   :  { %4133 = vmatpush.bf16.msrb.mxu2 %v6867_v15 }
 0x203   :  { %3713 = vmatpush.bf16.msra.mxu1 %v5888_v56 }
 0x204   :  { %4141 = vmatpush.bf16.msrb.mxu3 %v6880_v21  ;;  %v6895_v21 = vld [vmem:[%s10251_s8 + $0xe8] sm:$0xff] }
 0x205   :  { %4134 = vmatpush.bf16.msrb.mxu2 %v6866_v24  ;;  %v6894_v24 = vld [vmem:[%s10251_s8 + $0xe0] sm:$0xff] }
 0x207   :  { %3714 = vmatpush.bf16.msra.mxu1 %v5872_v1 }
 0x20b   :  { %3715 = vmatpush.bf16.msra.mxu1 %v5856_v7  ;;  %v3498_v3 = vpop.f32.mrf.mxu0 }
 0x20c   :  { %v3499_v33 = vadd.f32 %v3498_v3, %v9950_v5  ;;  %v6888_v5 = vld [vmem:[%s10251_s8 + $0xb0] sm:$0xff]  ;;  %v2471_v3 = vperm.slane %v9725_v51, 2 }
 0x20d   :  { %4154 = vmatpush.bf16.msra.mxu0 %v6888_v5  ;;  %v2472_v5 = vperm.slane %v9725_v51, 3  ;;  %v6913_v51 = vld [vmem:[%s10256_s10 + $0x38] sm:$0xff] }
 0x20e   :  { %4254 = vmatpush.bf16.msra.mxu2 %v6913_v51 }
 0x20f   :  { %3716 = vmatpush.bf16.msra.mxu1 %v5840_v58 }
 0x211   :  { %4155 = vmatpush.bf16.msra.mxu0 %v6887_v48 }
 0x212   :  { %v3576_v23 = vpop.f32.mrf.mxu2 }
 0x213   :  { %3717 = vmatpush.bf16.msra.mxu1 %v5824_v18  ;;  %v3500_v16 = vpop.f32.mrf.mxu0 }
 0x215   :  { %4156 = vmatpush.bf16.msra.mxu0 %v6886_v53 }
 0x216   :  { %3718 = vmatmul.bf16.vlgmr.msra.gmra.mxu1 %v9190_v11  ;;  %v6879_v11 = vld [vmem:[%s10251_s8 + $0x68] sm:$0xff] }
 0x217   :  { %4142 = vmatpush.bf16.msrb.mxu3 %v6879_v11  ;;  %3922 = vmatpush.bf16.msrb.mxu1 %v6905_v43 }
 0x21a   :  { %v3578_v26 = vpop.f32.mrf.mxu2 }
 0x21b   :  { %4143 = vmatpush.bf16.msrb.mxu3 %v6878_v22  ;;  %v3550_v35 = vpop.f32.mrf.mxu0  ;;  %3923 = vmatpush.bf16.msrb.mxu1 %v6904_v14  ;;  %v6893_v22 = vld [vmem:[%s10251_s8 + $0xd8] sm:$0xff] }
 0x21c   :  { %v3551_v9 = vadd.f32 %v3550_v35, %v10023_v44  ;;  %v6885_v44 = vld [vmem:[%s10251_s8 + $0x98] sm:$0xff] }
 0x21d   :  { %4157 = vmatpush.bf16.msra.mxu0 %v6885_v44 }
 0x21f   :  { %4144 = vmatpush.bf16.msrb.mxu3 %v6877_v32  ;;  %3924 = vmatpush.bf16.msrb.mxu1 %v6903_v55 }
 0x221   :  { %4158 = vmatpush.bf16.msra.mxu0 %v6884_v36  ;;  %v6908_v36 = vld [vmem:[%s10256_s10 + $0x10] sm:$0xff] }
 0x223   :  { %4145 = vmatpush.bf16.msrb.mxu3 %v6876_v6  ;;  %v3552_v28 = vpop.f32.mrf.mxu0  ;;  %3925 = vmatpush.bf16.msrb.mxu1 %v6902_v60  ;;  %v6892_v6 = vld [vmem:[%s10251_s8 + $0xd0] sm:$0xff] }
 0x225   :  { %4159 = vmatpush.bf16.msra.mxu0 %v6883_v61 }
 0x227   :  { %4146 = vmatpush.bf16.msrb.mxu3 %v6875_v29  ;;  %3926 = vmatpush.bf16.msrb.mxu1 %v6901_v54  ;;  %v6909_v54 = vld [vmem:[%s10256_s10 + $0x18] sm:$0xff] }
 0x228   :  { %v10118_v27 = vpop.f32.mrf.mxu2 }
 0x229   :  { %4160 = vmatpush.bf16.msra.mxu0 %v6882_v0 }
 0x22b   :  { %4147 = vmatpush.bf16.msrb.mxu3 %v6874_v30  ;;  %3927 = vmatpush.bf16.msrb.mxu1 %v6900_v4  ;;  %v6891_v30 = vld [vmem:[%s10251_s8 + $0xc8] sm:$0xff]  ;;  %v6906_v4 = vld [vmem:[%s10256_s10] sm:$0xff] }
 0x22c   :  { %v10126_v31 = vpop.f32.mrf.mxu0 }
 0x22f   :  { %3928 = vmatpush.bf16.msrb.mxu1 %v6899_v13 }
 0x230   :  { %v3630_v20 = vpop.f32.mrf.mxu2 }
 0x233   :  { %v3511_v34 = vpop.f32.mrf.mxu1  ;;  %3929 = vmatpush.bf16.msrb.mxu1 %v6898_v59  ;;  %v6915_v59 = vld [vmem:[%s10254_s9] ss:$0 sm:$0xff] }
 0x234   :  { %v3512_v37 = vadd.f32 %v3511_v34, %v3499_v33  ;;  %v3604_v39 = vpop.f32.mrf.mxu0 }
 0x236   :  { %v3749_v38 = vmax.f32 %v3512_v37, 0.0 }
 0x237   :  { %4166 = vmatpush.bf16.msra.mxu1 %v6897_v17 }
 0x238   :  { %v3789_v25 = vpack.c.bf16 %v3749_v38, %v3749_v38  ;;  %v6914_v38 = vld [vmem:[%s10253_s7] ss:$0 sm:$0xff] }
 0x23a   :  { %v3589_v12 = vpop.f32.mrf.mxu3  ;;  %4135 = vmatmul.bf16.vlgmr.msrb.gmra.mxu2 %v3789_v25 }
 0x23b   :  { %v3513_v42 = vpop.f32.mrf.mxu1  ;;  %4167 = vmatpush.bf16.msra.mxu1 %v6896_v8 }
 0x23f   :  { %4168 = vmatpush.bf16.msra.mxu1 %v6895_v21 }
 0x242   :  { %v3591_v46 = vpop.f32.mrf.mxu3 }
 0x243   :  { %v3563_v57 = vpop.f32.mrf.mxu1  ;;  %4169 = vmatpush.bf16.msra.mxu1 %v6894_v24 }
 0x244   :  { %v3564_v49 = vadd.f32 %v3563_v57, %v3551_v9 }
 0x246   :  { %v3577_v52 = vadd.f32 %v3576_v23, %v3564_v49  ;;  %v3603_v23 = vadd.f32 %v10126_v31, %v2471_v3 }
 0x247   :  { %4170 = vmatpush.bf16.msra.mxu1 %v6893_v22 }
 0x248   :  { %v10132_v41 = vpop.f32.mrf.mxu2  ;;  %v3590_v63 = vadd.f32 %v3589_v12, %v3577_v52 }
 0x249   :  { %v3681_v14 = vadd.f32 %v10132_v41, %v2472_v5  ;;  %v6912_v41 = vld [vmem:[%s10256_s10 + $0x30] sm:$0xff] }
 0x24a   :  { %v3641_v56 = vpop.f32.mrf.mxu3  ;;  %v3750_v45 = vmax.f32 %v3590_v63, 0.0  ;;  %4255 = vmatpush.bf16.msra.mxu2 %v6912_v41 }
 0x24b   :  { %v3565_v62 = vpop.f32.mrf.mxu1  ;;  %4171 = vmatpush.bf16.msra.mxu1 %v6892_v6 }
 0x24c   :  { %v3790_v1 = vpack.c.bf16 %v3750_v45, %v3750_v45  ;;  %v3654_v2 = vpop.f32.mrf.mxu0  ;;  %v6911_v45 = vld [vmem:[%s10256_s10 + $0x28] sm:$0xff]  ;;  %v6910_v62 = vld [vmem:[%s10256_s10 + $0x20] sm:$0xff] }
 0x24e   :  { %4148 = vmatmul.bf16.vlgmr.msrb.gmra.mxu3 %v3790_v1  ;;  %4256 = vmatpush.bf16.msra.mxu2 %v6911_v45 }
 0x24f   :  { %4172 = vmatpush.bf16.msra.mxu1 %v6891_v30 }
 0x250   :  { %v3682_v50 = vpop.f32.mrf.mxu2 }
 0x252   :  { %v3643_v7 = vpop.f32.mrf.mxu3  ;;  %4257 = vmatpush.bf16.msra.mxu2 %v6910_v62 }
 0x253   :  { %v3615_v10 = vpop.f32.mrf.mxu1 }
 0x254   :  { %v3656_v58 = vpop.f32.mrf.mxu0  ;;  %v3616_v11 = vadd.f32 %v3615_v10, %v3603_v23 }
 0x256   :  { %v3629_v26 = vadd.f32 %v10118_v27, %v3616_v11  ;;  %v6890_v27 = vld [vmem:[%s10251_s8 + $0xc0] sm:$0xff]  ;;  %4258 = vmatpush.bf16.msra.mxu2 %v6909_v54 }
 0x257   :  { %4173 = vmatpush.bf16.msra.mxu1 %v6890_v27 }
 0x258   :  { %v3642_v35 = vadd.f32 %v3641_v56, %v3629_v26 }
 0x25a   :  { %v3655_v28 = vadd.f32 %v3654_v2, %v3642_v35  ;;  %4259 = vmatpush.bf16.msra.mxu2 %v6908_v36  ;;  %v6907_v2 = vld [vmem:[%s10256_s10 + $0x8] sm:$0xff] }
 0x25b   :  { %v3693_v18 = vpop.f32.mrf.mxu3  ;;  %v3617_v19 = vpop.f32.mrf.mxu1 }
 0x25c   :  { %v3694_v48 = vadd.f32 %v3693_v18, %v3681_v14 }
 0x25e   :  { %4260 = vmatpush.bf16.msra.mxu2 %v6907_v2 }
 0x262   :  { %4261 = vmatpush.bf16.msra.mxu2 %v6906_v4 }
 0x263   :  { %v3695_v16 = vpop.f32.mrf.mxu3 }
 0x268   :  { %v3732_v47 = vpop.f32.mrf.mxu2 }
 0x26c   :  { %v3706_v32 = vpop.f32.mrf.mxu0 }
 0x26d   :  { %v3707_v46 = vadd.f32 %v3706_v32, %v3694_v48 }
 0x270   :  { %v3734_v15 = vpop.f32.mrf.mxu2 }
 0x271   :  { %v6916_v15 = vld [vmem:[%s10255_s11] ss:$0 sm:$0xff] }
 0x273   :  { %v3667_v29 = vpop.f32.mrf.mxu1 }
 0x274   :  { %v3668_v20 = vadd.f32 %v3667_v29, %v3655_v28  ;;  %v3708_v31 = vpop.f32.mrf.mxu0 }
 0x276   :  { %v3751_v33 = vmax.f32 %v3668_v20, 0.0 }
 0x278   :  { %v3791_v34 = vpack.c.bf16 %v3751_v33, %v3751_v33 }
 0x27a   :  { %4161 = vmatmul.bf16.vlgmr.msra.gmra.mxu0 %v3791_v34 }
 0x27b   :  { %v3669_v39 = vpop.f32.mrf.mxu1 }
 0x27d   :  { %v3785_v40 = vpop.f32.mrf.mxu0 }
 0x27e   :  { %v3786_v25 = vadd.f32 %v6914_v38, %v3785_v40 }
 0x280   :  { %v3788_v12 = vmax.f32 %v3786_v25, 0.0 }
 0x282   :  { %v3745_v37 = vpop.f32.mrf.mxu3  ;;  %v3857_v42 = vpack.c.bf16 %v3788_v12, %v3788_v12 }
 0x284   :  { %3930 = vmatmul.bf16.vlgmr.msrb.gmra.mxu1 %v3857_v42 }
 0x28a   :  { %v3747_v43 = vpop.f32.mrf.mxu3 }
 0x293   :  { %v3719_v9 = vpop.f32.mrf.mxu1 }
 0x294   :  { %v3720_v50 = vadd.f32 %v3719_v9, %v3707_v46 }
 0x296   :  { %v3733_v55 = vadd.f32 %v3732_v47, %v3720_v50 }
 0x298   :  { %v3746_v53 = vadd.f32 %v3745_v37, %v3733_v55 }
 0x29a   :  { %v3752_v57 = vmax.f32 %v3746_v53, 0.0 }
 0x29b   :  { %v3721_v49 = vpop.f32.mrf.mxu1 }
 0x29c   :  { %v3792_v60 = vpack.c.bf16 %v3752_v57, %v3752_v57 }
 0x29e   :  { %4174 = vmatmul.bf16.vlgmr.msra.gmra.mxu1 %v3792_v60 }
 0x2bd   :  { %v4136_v44 = vpop.f32.mrf.mxu2 }
 0x2c5   :  { %v4138_v52 = vpop.f32.mrf.mxu2 }
 0x2d1   :  { %v4149_v63 = vpop.f32.mrf.mxu3 }
 0x2d9   :  { %v4151_v56 = vpop.f32.mrf.mxu3 }
 0x2f7   :  { %v4162_v1 = vpop.f32.mrf.mxu0 }
 0x2ff   :  { %v4164_v61 = vpop.f32.mrf.mxu0 }
 0x301   :  { %v3931_v7 = vpop.f32.mrf.mxu1 }
 0x302   :  { %v4137_v10 = vadd.f32 %v4136_v44, %v3931_v7 }
 0x304   :  { %v4150_v13 = vadd.f32 %v4149_v63, %v4137_v10 }
 0x306   :  { %v4163_v58 = vadd.f32 %v4162_v1, %v4150_v13 }
 0x309   :  { %v3933_v0 = vpop.f32.mrf.mxu1 }
 0x31b   :  { %v4175_v47 = vpop.f32.mrf.mxu1 }
 0x31c   :  { %v4176_v17 = vadd.f32 %v4175_v47, %v4163_v58 }
 0x31e   :  { %v4183_v18 = vadd.f32 %v6915_v59, %v4176_v17 }
 0x320   :  { %v4184_v19 = vmax.f32 %v4183_v18, 0.0 }
 0x322   :  { %v4185_v8 = vpack.c.bf16 %v4184_v19, %v4184_v19 }
 0x323   :  { %v4177_v3 = vpop.f32.mrf.mxu1 }
 0x324   :  { %4262 = vmatmul.bf16.vlgmr.msra.gmra.mxu2 %v4185_v8 }
 0x3a7   :  { %v4263_v21 = vpop.f32.mrf.mxu2 }
 0x3a8   :  { %v4264_v23 = vadd.f32 %v6916_v15, %v4263_v21 }
 0x3aa   :  { %v4267_v16 = vpack.c.bf16 %v4264_v23, %v4264_v23 }
 0x3ac   :  { %4268 = vst [vmem:[%s10257_s12] sm:$0xf] %v4267_v16 }
 0x3af   :  { %v4265_v24 = vpop.f32.mrf.mxu2 }

</bundles_post_ra>
